<compile_context>
chip_gen: v7x
topology: tpu7x:2x2x1
jax: 0.10.0
libtpu: 0.0.40
codegen_flags: <defaults>
</compile_context>

<pallas_src>
import math
import functools

import jax
import jax.numpy as jnp
from jax import lax
from jax.experimental import pallas as pl
from jax.experimental.pallas import tpu as pltpu

# ----------------------------------------------------------------------------
# Small config (scaled-down CLIP: real model is 49408 vocab, 768 embd, 77 tok,
# 12 heads, 12 layers — same structure, smaller sizes for a fast synthetic run)
# ----------------------------------------------------------------------------
N_VOCAB  = 1000
N_EMBD   = 128          # lane-aligned (multiple of 128)
N_HEAD   = 4
D_HEAD   = N_EMBD // N_HEAD
N_TOKEN  = 16           # sequence length (multiple of 8 for sublane tiling)
N_LAYERS = 2
BATCH    = 2
LN_EPS   = 1e-5


# ----------------------------------------------------------------------------
# Kernel
# ----------------------------------------------------------------------------
def _layernorm(x, gamma, beta):
    mu = jnp.mean(x, axis=-1, keepdims=True)
    var = jnp.mean(jnp.square(x - mu), axis=-1, keepdims=True)
    return (x - mu) * lax.rsqrt(var + LN_EPS) * gamma + beta


def clip_encoder_kernel(x_ref, bias_ref,
                        ln1_g_ref, ln1_b_ref,
                        wqkv_ref, bqkv_ref,
                        wo_ref, bo_ref,
                        ln2_g_ref, ln2_b_ref,
                        w1_ref, b1_ref,
                        w2_ref, b2_ref,
                        lnf_g_ref, lnf_b_ref,
                        out_ref, act_ref,
                        *, n_head):
    """Whole CLIP encoder: grid axis 0 iterates over layers (sequential)."""
    layer = pl.program_id(0)
    BS, D = act_ref.shape
    DH = D // n_head
    bf16 = jnp.bfloat16

    # Load the embedded tokens into the resident VMEM activation on step 0.
    @pl.when(layer == 0)
    def _():
        act_ref[...] = x_ref[...]

    x = act_ref[...]                                          # (BS, D) f32

    # ---------------- attention block ----------------
    xn = _layernorm(x, ln1_g_ref[0], ln1_b_ref[0])
    qkv = jnp.dot(xn.astype(bf16), wqkv_ref[0],
                  preferred_element_type=jnp.float32) + bqkv_ref[0]   # (BS, 3D)

    attn_bias = bias_ref[...]                                 # (BS, BS) additive mask

    ctx_heads = []
    for h in range(n_head):                                   # unrolled, 32-lane slices
        q_h = qkv[:, 0 * D + h * DH: 0 * D + (h + 1) * DH].astype(bf16)
        k_h = qkv[:, 1 * D + h * DH: 1 * D + (h + 1) * DH].astype(bf16)
        v_h = qkv[:, 2 * D + h * DH: 2 * D + (h + 1) * DH].astype(bf16)
        # (BS, BS) scores; 1/sqrt(DH) already folded into the Q projection.
        s_h = lax.dot_general(q_h, k_h, (((1,), (1,)), ((), ())),
                              preferred_element_type=jnp.float32)
        s_h = s_h + attn_bias                                 # block-diag causal mask
        m = jnp.max(s_h, axis=-1, keepdims=True)
        p = jnp.exp(s_h - m)
        p = p * pl.reciprocal(jnp.sum(p, axis=-1, keepdims=True), approx=True)
        ctx_heads.append(jnp.dot(p.astype(bf16), v_h,
                                 preferred_element_type=jnp.float32))
    ctx = jnp.concatenate(ctx_heads, axis=-1)                 # (BS, D)

    attn_out = jnp.dot(ctx.astype(bf16), wo_ref[0],
                       preferred_element_type=jnp.float32) + bo_ref[0]
    x = x + attn_out

    # ---------------- feed-forward block ----------------
    xn = _layernorm(x, ln2_g_ref[0], ln2_b_ref[0])
    h1 = jnp.dot(xn.astype(bf16), w1_ref[0],
                 preferred_element_type=jnp.float32) + b1_ref[0]       # (BS, 4D)
    h1 = h1 * jax.nn.sigmoid(1.702 * h1)                               # QuickGELU (f32)
    y = jnp.dot(h1.astype(bf16), w2_ref[0],
                preferred_element_type=jnp.float32) + b2_ref[0]        # (BS, D)
    x = x + y

    act_ref[...] = x

    # ---------------- fused final LayerNorm ----------------
    @pl.when(layer == pl.num_programs(0) - 1)
    def _():
        out_ref[...] = _layernorm(act_ref[...], lnf_g_ref[...], lnf_b_ref[...])


# ----------------------------------------------------------------------------
# Pallas wrapper
# ----------------------------------------------------------------------------
def _per_layer_spec(arr):
    """Block = one layer's slice of a (L, ...) stacked weight."""
    trailing = (0,) * (arr.ndim - 1)
    return pl.BlockSpec((1,) + arr.shape[1:], lambda l, _t=trailing: (l,) + _t)


def _full_spec(arr):
    nd = arr.ndim
    return pl.BlockSpec(arr.shape, lambda l, _nd=nd: (0,) * _nd)


def clip_encoder(x, stacked, lnf_g, lnf_b):
    """x: (B, S, D) f32 embedded tokens. Returns (B, S, D) f32."""
    B, S, D = x.shape
    BS = B * S
    L = stacked['wqkv'].shape[0]
    H = N_HEAD

    # Fold batch into the matmul M dimension.
    x2 = x.reshape(BS, D)

    # Block-diagonal (same batch element) causal additive mask, built once.
    row = jnp.arange(BS)[:, None]
    col = jnp.arange(BS)[None, :]
    allowed = jnp.logical_and(row // S == col // S, row >= col)
    attn_bias = jnp.where(allowed, 0.0, -1e30).astype(jnp.float32)

    weights = (stacked['ln1_g'], stacked['ln1_b'],
               stacked['wqkv'], stacked['bqkv'],
               stacked['wo'], stacked['bo'],
               stacked['ln2_g'], stacked['ln2_b'],
               stacked['w1'], stacked['b1'],
               stacked['w2'], stacked['b2'])

    in_specs = [pl.BlockSpec((BS, D), lambda l: (0, 0)),
                pl.BlockSpec((BS, BS), lambda l: (0, 0))]
    in_specs += [_per_layer_spec(w) for w in weights]
    in_specs += [_full_spec(lnf_g), _full_spec(lnf_b)]

    # Advisory cost estimate (per call = all L layers).
    flops = L * (2 * BS * D * 3 * D      # qkv proj
                 + 4 * BS * BS * D       # scores + ctx (all heads)
                 + 2 * BS * D * D        # out proj
                 + 16 * BS * D * D)      # MLP (two 4x matmuls)
    transcendentals = L * (H * BS * BS + 4 * BS * D + 4 * BS)
    operand_bytes = sum(int(a.size) * a.dtype.itemsize
                        for a in (x2, attn_bias, lnf_g, lnf_b) + weights)
    bytes_accessed = operand_bytes + BS * D * 4

    kernel = functools.partial(clip_encoder_kernel, n_head=H)

    # TODO(synk): for larger batches, add a leading "parallel" grid axis over
    # batch shards so v7x's second TensorCore is used; pointless at B*S=32.
    out = pl.pallas_call(
        kernel,
        out_shape=jax.ShapeDtypeStruct((BS, D), jnp.float32),
        grid_spec=pltpu.PrefetchScalarGridSpec(
            num_scalar_prefetch=0,
            grid=(L,),
            in_specs=in_specs,
            out_specs=pl.BlockSpec((BS, D), lambda l: (0, 0)),
            scratch_shapes=[pltpu.VMEM((BS, D), jnp.float32)]),
        compiler_params=pltpu.CompilerParams(
            dimension_semantics=("arbitrary",),       # layers are sequential
            vmem_limit_bytes=64 * 1024 * 1024),
        cost_estimate=pl.CostEstimate(
            flops=int(flops),
            transcendentals=int(transcendentals),
            bytes_accessed=int(bytes_accessed)),
    )(x2, attn_bias, *weights, lnf_g, lnf_b)

    return out.reshape(B, S, D)


# ----------------------------------------------------------------------------
# Parameter init (f32, shapes mirror the PyTorch module) + kernel-side prep
# ----------------------------------------------------------------------------
def init_params(key):
    keys = iter(jax.random.split(key, 8 + 16 * N_LAYERS))

    def normal(shape, scale=0.02):
        return (scale * jax.random.normal(next(keys), shape)).astype(jnp.float32)

    params = {
        'tok_emb': normal((N_VOCAB, N_EMBD)),
        'pos_emb': normal((N_TOKEN, N_EMBD)),
        'ln_f_g': jnp.ones((1, N_EMBD), jnp.float32),
        'ln_f_b': jnp.zeros((1, N_EMBD), jnp.float32),
        'layers': [],
    }
    for _ in range(N_LAYERS):
        params['layers'].append({
            'ln1_g': jnp.ones((1, N_EMBD), jnp.float32),
            'ln1_b': jnp.zeros((1, N_EMBD), jnp.float32),
            'wqkv': normal((N_EMBD, 3 * N_EMBD)),
            'bqkv': normal((1, 3 * N_EMBD)),
            'wo':   normal((N_EMBD, N_EMBD)),
            'bo':   normal((1, N_EMBD)),
            'ln2_g': jnp.ones((1, N_EMBD), jnp.float32),
            'ln2_b': jnp.zeros((1, N_EMBD), jnp.float32),
            'w1':   normal((N_EMBD, 4 * N_EMBD)),
            'b1':   normal((1, 4 * N_EMBD)),
            'w2':   normal((4 * N_EMBD, N_EMBD)),
            'b2':   normal((1, N_EMBD)),
        })
    return params


def prepare_encoder_params(params):
    """Stack per-layer weights along a leading L axis; cast matmul weights to
    bf16; fold the 1/sqrt(D_HEAD) attention scale into the Q projection."""
    D = N_EMBD
    scale = 1.0 / math.sqrt(D_HEAD)

    def stack(name):
        return jnp.stack([lp[name] for lp in params['layers']])

    wqkv = stack('wqkv')
    bqkv = stack('bqkv')
    wqkv = wqkv.at[:, :, :D].multiply(scale)
    bqkv = bqkv.at[:, :, :D].multiply(scale)

    return {
        'ln1_g': stack('ln1_g'), 'ln1_b': stack('ln1_b'),
        'wqkv': wqkv.astype(jnp.bfloat16), 'bqkv': bqkv,
        'wo': stack('wo').astype(jnp.bfloat16), 'bo': stack('bo'),
        'ln2_g': stack('ln2_g'), 'ln2_b': stack('ln2_b'),
        'w1': stack('w1').astype(jnp.bfloat16), 'b1': stack('b1'),
        'w2': stack('w2').astype(jnp.bfloat16), 'b2': stack('b2'),
    }


# ----------------------------------------------------------------------------
# Full forward (Pallas) and pure-JAX f32 reference
# ----------------------------------------------------------------------------
def clip_forward_pallas(tokens, params):
    tokens = tokens.astype(jnp.int32)
    # TODO(synk): token-embedding gather is data-dependent -> plain JAX glue.
    x = jnp.take(params['tok_emb'], tokens, axis=0) + params['pos_emb'][None]
    stacked = prepare_encoder_params(params)
    return clip_encoder(x, stacked, params['ln_f_g'], params['ln_f_b'])


def clip_forward_ref(tokens, params):
    def ln(x, g, b):
        mu = jnp.mean(x, -1, keepdims=True)
        var = jnp.mean((x - mu) ** 2, -1, keepdims=True)
        return (x - mu) / jnp.sqrt(var + LN_EPS) * g + b

    tokens = tokens.astype(jnp.int32)
    x = jnp.take(params['tok_emb'], tokens, axis=0) + params['pos_emb'][None]
    B, S, D = x.shape
    causal = jnp.tril(jnp.ones((S, S), bool))
    for lp in params['layers']:
        res = x
        h = ln(x, lp['ln1_g'][0], lp['ln1_b'][0])
        qkv = h @ lp['wqkv'] + lp['bqkv'][0]
        q, k, v = jnp.split(qkv, 3, axis=-1)
        q = q.reshape(B, S, N_HEAD, D_HEAD)
        k = k.reshape(B, S, N_HEAD, D_HEAD)
        v = v.reshape(B, S, N_HEAD, D_HEAD)
        s = jnp.einsum('bqhd,bkhd->bhqk', q, k) / math.sqrt(D_HEAD)
        s = jnp.where(causal[None, None], s, -1e30)
        p = jax.nn.softmax(s, axis=-1)
        ctx = jnp.einsum('bhqk,bkhd->bqhd', p, v).reshape(B, S, D)
        x = res + ctx @ lp['wo'] + lp['bo'][0]
        res = x
        h = ln(x, lp['ln2_g'][0], lp['ln2_b'][0])
        h = h @ lp['w1'] + lp['b1'][0]
        h = h * jax.nn.sigmoid(1.702 * h)
        x = res + h @ lp['w2'] + lp['b2'][0]
    return ln(x, params['ln_f_g'][0], params['ln_f_b'][0])


# ----------------------------------------------------------------------------
if __name__ == "__main__":
    key = jax.random.PRNGKey(0)
    pkey, tkey = jax.random.split(key)
    params = init_params(pkey)
    tokens = jax.random.randint(tkey, (BATCH, N_TOKEN), 0, N_VOCAB, dtype=jnp.int32)

    fwd = jax.jit(clip_forward_pallas)
    out = jax.block_until_ready(fwd(tokens, params))
    ref = jax.block_until_ready(clip_forward_ref(tokens, params))

    assert out.shape == (BATCH, N_TOKEN, N_EMBD)
    assert bool(jnp.all(jnp.isfinite(out)))

    # Kernel uses bf16 MXU operands (f32 accumulate) + approx reciprocal, the
    # reference is pure f32 — compare with a bf16-appropriate tolerance.
    max_err = float(jnp.max(jnp.abs(out - ref)))
    mean_err = float(jnp.mean(jnp.abs(out - ref)))
    assert max_err < 1e-1 and mean_err < 2e-2, \
        f"max abs err = {max_err}, mean abs err = {mean_err}"

    print("KERNEL_OK")
</pallas_src>

<mosaic_0001>
module attributes {stable_mosaic.version = 11 : i64} {
  func.func @clip_encoder_kernel(%arg0: i32, %arg1: memref<32x128xf32, #tpu.memory_space<vmem>>, %arg2: memref<32x32xf32, #tpu.memory_space<vmem>>, %arg3: memref<1x1x128xf32, #tpu.memory_space<vmem>>, %arg4: memref<1x1x128xf32, #tpu.memory_space<vmem>>, %arg5: memref<1x128x384xbf16, #tpu.memory_space<vmem>>, %arg6: memref<1x1x384xf32, #tpu.memory_space<vmem>>, %arg7: memref<1x128x128xbf16, #tpu.memory_space<vmem>>, %arg8: memref<1x1x128xf32, #tpu.memory_space<vmem>>, %arg9: memref<1x1x128xf32, #tpu.memory_space<vmem>>, %arg10: memref<1x1x128xf32, #tpu.memory_space<vmem>>, %arg11: memref<1x128x512xbf16, #tpu.memory_space<vmem>>, %arg12: memref<1x1x512xf32, #tpu.memory_space<vmem>>, %arg13: memref<1x512x128xbf16, #tpu.memory_space<vmem>>, %arg14: memref<1x1x128xf32, #tpu.memory_space<vmem>>, %arg15: memref<1x128xf32, #tpu.memory_space<vmem>>, %arg16: memref<1x128xf32, #tpu.memory_space<vmem>>, %arg17: memref<32x128xf32, #tpu.memory_space<vmem>>, %arg18: memref<32x128xf32, #tpu.memory_space<vmem>>) attributes {dimension_semantics = [#tpu.dimension_semantics<arbitrary>], iteration_bounds = array<i64: 2>, scalar_prefetch = 0 : i64, scratch_operands = 1 : i64, tpu.core_type = #tpu.core_type<tc>, window_params = [{pipeline_mode = #tpu.pipeline_mode<synchronous>, transform_indices = @transform_0, window_bounds = array<i64: 32, 128>}, {pipeline_mode = #tpu.pipeline_mode<synchronous>, transform_indices = @transform_1, window_bounds = array<i64: 32, 32>}, {transform_indices = @transform_2, window_bounds = array<i64: 1, 1, 128>}, {transform_indices = @transform_3, window_bounds = array<i64: 1, 1, 128>}, {transform_indices = @transform_4, window_bounds = array<i64: 1, 128, 384>}, {transform_indices = @transform_5, window_bounds = array<i64: 1, 1, 384>}, {transform_indices = @transform_6, window_bounds = array<i64: 1, 128, 128>}, {transform_indices = @transform_7, window_bounds = array<i64: 1, 1, 128>}, {transform_indices = @transform_8, window_bounds = array<i64: 1, 1, 128>}, {transform_indices = @transform_9, window_bounds = array<i64: 1, 1, 128>}, {transform_indices = @transform_10, window_bounds = array<i64: 1, 128, 512>}, {transform_indices = @transform_11, window_bounds = array<i64: 1, 1, 512>}, {transform_indices = @transform_12, window_bounds = array<i64: 1, 512, 128>}, {transform_indices = @transform_13, window_bounds = array<i64: 1, 1, 128>}, {pipeline_mode = #tpu.pipeline_mode<synchronous>, transform_indices = @transform_14, window_bounds = array<i64: 1, 128>}, {pipeline_mode = #tpu.pipeline_mode<synchronous>, transform_indices = @transform_15, window_bounds = array<i64: 1, 128>}, {pipeline_mode = #tpu.pipeline_mode<synchronous>, transform_indices = @transform_16, window_bounds = array<i64: 32, 128>}]} {
    %c0_i32 = arith.constant 0 : i32
    %0 = arith.cmpi eq, %arg0, %c0_i32 : i32
    %1 = arith.extui %0 : i1 to i32
    %c0_i32_0 = arith.constant 0 : i32
    %2 = arith.cmpi ne, %1, %c0_i32_0 : i32
    scf.if %2 {
      %c0_74 = arith.constant 0 : index
      %c0_75 = arith.constant 0 : index
      %184 = vector.load %arg1[%c0_74, %c0_75] : memref<32x128xf32, #tpu.memory_space<vmem>>, vector<32x128xf32>
      %c0_76 = arith.constant 0 : index
      %c0_77 = arith.constant 0 : index
      %185 = vector.load %arg18[%c0_76, %c0_77] : memref<32x128xf32, #tpu.memory_space<vmem>>, vector<32x128xf32>
      tpu.vector_store %arg18[%c0_76, %c0_77], %184 {strides = array<i32>} : memref<32x128xf32, #tpu.memory_space<vmem>>, vector<32x128xf32>,
    } else {
    }
    %c0 = arith.constant 0 : index
    %c0_1 = arith.constant 0 : index
    %3 = vector.load %arg18[%c0, %c0_1] : memref<32x128xf32, #tpu.memory_space<vmem>>, vector<32x128xf32>
    %c0_2 = arith.constant 0 : index
    %c0_3 = arith.constant 0 : index
    %c0_4 = arith.constant 0 : index
    %4 = vector.load %arg3[%c0_2, %c0_3, %c0_4] : memref<1x1x128xf32, #tpu.memory_space<vmem>>, vector<1x1x128xf32>
    %5 = vector.shape_cast %4 : vector<1x1x128xf32> to vector<1x128xf32>
    %c0_5 = arith.constant 0 : index
    %c0_6 = arith.constant 0 : index
    %c0_7 = arith.constant 0 : index
    %6 = vector.load %arg4[%c0_5, %c0_6, %c0_7] : memref<1x1x128xf32, #tpu.memory_space<vmem>>, vector<1x1x128xf32>
    %7 = vector.shape_cast %6 : vector<1x1x128xf32> to vector<1x128xf32>
    %cst = arith.constant dense<0.000000e+00> : vector<32xf32>
    %8 = vector.multi_reduction <add>, %3, %cst [1] : vector<32x128xf32> to vector<32xf32>
    %9 = vector.shape_cast %8 : vector<32xf32> to vector<32x1xf32>
    %cst_8 = arith.constant 1.280000e+02 : f32
    %10 = vector.broadcast %cst_8 : f32 to vector<32x1xf32>
    %11 = arith.divf %9, %10 : vector<32x1xf32>
    %12 = vector.broadcast %11 : vector<32x1xf32> to vector<32x128xf32>
    %13 = arith.subf %3, %12 : vector<32x128xf32>
    %14 = arith.mulf %13, %13 : vector<32x128xf32>
    %cst_9 = arith.constant dense<0.000000e+00> : vector<32xf32>
    %15 = vector.multi_reduction <add>, %14, %cst_9 [1] : vector<32x128xf32> to vector<32xf32>
    %16 = vector.shape_cast %15 : vector<32xf32> to vector<32x1xf32>
    %cst_10 = arith.constant 1.280000e+02 : f32
    %17 = vector.broadcast %cst_10 : f32 to vector<32x1xf32>
    %18 = arith.divf %16, %17 : vector<32x1xf32>
    %19 = vector.broadcast %11 : vector<32x1xf32> to vector<32x128xf32>
    %20 = arith.subf %3, %19 : vector<32x128xf32>
    %cst_11 = arith.constant 9.99999974E-6 : f32
    %21 = vector.broadcast %cst_11 : f32 to vector<32x1xf32>
    %22 = arith.addf %18, %21 : vector<32x1xf32>
    %23 = math.rsqrt %22 : vector<32x1xf32>
    %24 = vector.broadcast %23 : vector<32x1xf32> to vector<32x128xf32>
    %25 = arith.mulf %20, %24 : vector<32x128xf32>
    %26 = vector.broadcast %5 : vector<1x128xf32> to vector<32x128xf32>
    %27 = arith.mulf %25, %26 : vector<32x128xf32>
    %28 = vector.broadcast %7 : vector<1x128xf32> to vector<32x128xf32>
    %29 = arith.addf %27, %28 : vector<32x128xf32>
    %30 = arith.truncf %29 : vector<32x128xf32> to vector<32x128xbf16>
    %c0_12 = arith.constant 0 : index
    %c0_13 = arith.constant 0 : index
    %c0_14 = arith.constant 0 : index
    %31 = vector.load %arg5[%c0_12, %c0_13, %c0_14] : memref<1x128x384xbf16, #tpu.memory_space<vmem>>, vector<1x128x384xbf16>
    %32 = vector.shape_cast %31 : vector<1x128x384xbf16> to vector<128x384xbf16>
    %cst_15 = arith.constant dense<0.000000e+00> : vector<32x384xf32>
    %33 = tpu.matmul %30, %32, %cst_15 {dimension_numbers = #tpu.dot_dimension_numbers<[1], [0], [0], [1], [0, 0, 1, 1], [], []>} : vector<32x128xbf16>, vector<128x384xbf16>, vector<32x384xf32> -> vector<32x384xf32>
    %c0_16 = arith.constant 0 : index
    %c0_17 = arith.constant 0 : index
    %c0_18 = arith.constant 0 : index
    %34 = vector.load %arg6[%c0_16, %c0_17, %c0_18] : memref<1x1x384xf32, #tpu.memory_space<vmem>>, vector<1x1x384xf32>
    %35 = vector.shape_cast %34 : vector<1x1x384xf32> to vector<1x384xf32>
    %36 = vector.broadcast %35 : vector<1x384xf32> to vector<32x384xf32>
    %37 = arith.addf %33, %36 : vector<32x384xf32>
    %c0_19 = arith.constant 0 : index
    %c0_20 = arith.constant 0 : index
    %38 = vector.load %arg2[%c0_19, %c0_20] : memref<32x32xf32, #tpu.memory_space<vmem>>, vector<32x32xf32>
    %39 = vector.extract_strided_slice %37 {offsets = [0, 0], sizes = [32, 32], strides = [1, 1]} : vector<32x384xf32> to vector<32x32xf32>
    %40 = arith.truncf %39 : vector<32x32xf32> to vector<32x32xbf16>
    %41 = vector.extract_strided_slice %37 {offsets = [0, 128], sizes = [32, 32], strides = [1, 1]} : vector<32x384xf32> to vector<32x32xf32>
    %42 = arith.truncf %41 : vector<32x32xf32> to vector<32x32xbf16>
    %43 = vector.extract_strided_slice %37 {offsets = [0, 256], sizes = [32, 32], strides = [1, 1]} : vector<32x384xf32> to vector<32x32xf32>
    %44 = arith.truncf %43 : vector<32x32xf32> to vector<32x32xbf16>
    %cst_21 = arith.constant dense<0.000000e+00> : vector<32x32xf32>
    %45 = tpu.matmul %40, %42, %cst_21 {dimension_numbers = #tpu.dot_dimension_numbers<[1], [1], [0], [0], [0, 0, 1, 0], [], []>} : vector<32x32xbf16>, vector<32x32xbf16>, vector<32x32xf32> -> vector<32x32xf32>
    %46 = arith.addf %45, %38 : vector<32x32xf32>
    %cst_22 = arith.constant dense<0xFF800000> : vector<32xf32>
    %47 = vector.multi_reduction <maximumf>, %46, %cst_22 [1] : vector<32x32xf32> to vector<32xf32>
    %48 = vector.shape_cast %47 : vector<32xf32> to vector<32x1xf32>
    %49 = vector.broadcast %48 : vector<32x1xf32> to vector<32x32xf32>
    %50 = arith.subf %46, %49 : vector<32x32xf32>
    %51 = math.exp %50 : vector<32x32xf32>
    %cst_23 = arith.constant dense<0.000000e+00> : vector<32xf32>
    %52 = vector.multi_reduction <add>, %51, %cst_23 [1] : vector<32x32xf32> to vector<32xf32>
    %53 = vector.shape_cast %52 : vector<32xf32> to vector<32x1xf32>
    %54 = tpu.reciprocal %53 {approx = true} : vector<32x1xf32> -> vector<32x1xf32>
    %55 = vector.broadcast %54 : vector<32x1xf32> to vector<32x32xf32>
    %56 = arith.mulf %51, %55 : vector<32x32xf32>
    %57 = arith.truncf %56 : vector<32x32xf32> to vector<32x32xbf16>
    %cst_24 = arith.constant dense<0.000000e+00> : vector<32x32xf32>
    %58 = tpu.matmul %57, %44, %cst_24 {dimension_numbers = #tpu.dot_dimension_numbers<[1], [0], [0], [1], [0, 0, 1, 1], [], []>} : vector<32x32xbf16>, vector<32x32xbf16>, vector<32x32xf32> -> vector<32x32xf32>
    %59 = vector.extract_strided_slice %37 {offsets = [0, 32], sizes = [32, 32], strides = [1, 1]} : vector<32x384xf32> to vector<32x32xf32>
    %60 = arith.truncf %59 : vector<32x32xf32> to vector<32x32xbf16>
    %61 = vector.extract_strided_slice %37 {offsets = [0, 160], sizes = [32, 32], strides = [1, 1]} : vector<32x384xf32> to vector<32x32xf32>
    %62 = arith.truncf %61 : vector<32x32xf32> to vector<32x32xbf16>
    %63 = vector.extract_strided_slice %37 {offsets = [0, 288], sizes = [32, 32], strides = [1, 1]} : vector<32x384xf32> to vector<32x32xf32>
    %64 = arith.truncf %63 : vector<32x32xf32> to vector<32x32xbf16>
    %cst_25 = arith.constant dense<0.000000e+00> : vector<32x32xf32>
    %65 = tpu.matmul %60, %62, %cst_25 {dimension_numbers = #tpu.dot_dimension_numbers<[1], [1], [0], [0], [0, 0, 1, 0], [], []>} : vector<32x32xbf16>, vector<32x32xbf16>, vector<32x32xf32> -> vector<32x32xf32>
    %66 = arith.addf %65, %38 : vector<32x32xf32>
    %cst_26 = arith.constant dense<0xFF800000> : vector<32xf32>
    %67 = vector.multi_reduction <maximumf>, %66, %cst_26 [1] : vector<32x32xf32> to vector<32xf32>
    %68 = vector.shape_cast %67 : vector<32xf32> to vector<32x1xf32>
    %69 = vector.broadcast %68 : vector<32x1xf32> to vector<32x32xf32>
    %70 = arith.subf %66, %69 : vector<32x32xf32>
    %71 = math.exp %70 : vector<32x32xf32>
    %cst_27 = arith.constant dense<0.000000e+00> : vector<32xf32>
    %72 = vector.multi_reduction <add>, %71, %cst_27 [1] : vector<32x32xf32> to vector<32xf32>
    %73 = vector.shape_cast %72 : vector<32xf32> to vector<32x1xf32>
    %74 = tpu.reciprocal %73 {approx = true} : vector<32x1xf32> -> vector<32x1xf32>
    %75 = vector.broadcast %74 : vector<32x1xf32> to vector<32x32xf32>
    %76 = arith.mulf %71, %75 : vector<32x32xf32>
    %77 = arith.truncf %76 : vector<32x32xf32> to vector<32x32xbf16>
    %cst_28 = arith.constant dense<0.000000e+00> : vector<32x32xf32>
    %78 = tpu.matmul %77, %64, %cst_28 {dimension_numbers = #tpu.dot_dimension_numbers<[1], [0], [0], [1], [0, 0, 1, 1], [], []>} : vector<32x32xbf16>, vector<32x32xbf16>, vector<32x32xf32> -> vector<32x32xf32>
    %79 = vector.extract_strided_slice %37 {offsets = [0, 64], sizes = [32, 32], strides = [1, 1]} : vector<32x384xf32> to vector<32x32xf32>
    %80 = arith.truncf %79 : vector<32x32xf32> to vector<32x32xbf16>
    %81 = vector.extract_strided_slice %37 {offsets = [0, 192], sizes = [32, 32], strides = [1, 1]} : vector<32x384xf32> to vector<32x32xf32>
    %82 = arith.truncf %81 : vector<32x32xf32> to vector<32x32xbf16>
    %83 = vector.extract_strided_slice %37 {offsets = [0, 320], sizes = [32, 32], strides = [1, 1]} : vector<32x384xf32> to vector<32x32xf32>
    %84 = arith.truncf %83 : vector<32x32xf32> to vector<32x32xbf16>
    %cst_29 = arith.constant dense<0.000000e+00> : vector<32x32xf32>
    %85 = tpu.matmul %80, %82, %cst_29 {dimension_numbers = #tpu.dot_dimension_numbers<[1], [1], [0], [0], [0, 0, 1, 0], [], []>} : vector<32x32xbf16>, vector<32x32xbf16>, vector<32x32xf32> -> vector<32x32xf32>
    %86 = arith.addf %85, %38 : vector<32x32xf32>
    %cst_30 = arith.constant dense<0xFF800000> : vector<32xf32>
    %87 = vector.multi_reduction <maximumf>, %86, %cst_30 [1] : vector<32x32xf32> to vector<32xf32>
    %88 = vector.shape_cast %87 : vector<32xf32> to vector<32x1xf32>
    %89 = vector.broadcast %88 : vector<32x1xf32> to vector<32x32xf32>
    %90 = arith.subf %86, %89 : vector<32x32xf32>
    %91 = math.exp %90 : vector<32x32xf32>
    %cst_31 = arith.constant dense<0.000000e+00> : vector<32xf32>
    %92 = vector.multi_reduction <add>, %91, %cst_31 [1] : vector<32x32xf32> to vector<32xf32>
    %93 = vector.shape_cast %92 : vector<32xf32> to vector<32x1xf32>
    %94 = tpu.reciprocal %93 {approx = true} : vector<32x1xf32> -> vector<32x1xf32>
    %95 = vector.broadcast %94 : vector<32x1xf32> to vector<32x32xf32>
    %96 = arith.mulf %91, %95 : vector<32x32xf32>
    %97 = arith.truncf %96 : vector<32x32xf32> to vector<32x32xbf16>
    %cst_32 = arith.constant dense<0.000000e+00> : vector<32x32xf32>
    %98 = tpu.matmul %97, %84, %cst_32 {dimension_numbers = #tpu.dot_dimension_numbers<[1], [0], [0], [1], [0, 0, 1, 1], [], []>} : vector<32x32xbf16>, vector<32x32xbf16>, vector<32x32xf32> -> vector<32x32xf32>
    %99 = vector.extract_strided_slice %37 {offsets = [0, 96], sizes = [32, 32], strides = [1, 1]} : vector<32x384xf32> to vector<32x32xf32>
    %100 = arith.truncf %99 : vector<32x32xf32> to vector<32x32xbf16>
    %101 = vector.extract_strided_slice %37 {offsets = [0, 224], sizes = [32, 32], strides = [1, 1]} : vector<32x384xf32> to vector<32x32xf32>
    %102 = arith.truncf %101 : vector<32x32xf32> to vector<32x32xbf16>
    %103 = vector.extract_strided_slice %37 {offsets = [0, 352], sizes = [32, 32], strides = [1, 1]} : vector<32x384xf32> to vector<32x32xf32>
    %104 = arith.truncf %103 : vector<32x32xf32> to vector<32x32xbf16>
    %cst_33 = arith.constant dense<0.000000e+00> : vector<32x32xf32>
    %105 = tpu.matmul %100, %102, %cst_33 {dimension_numbers = #tpu.dot_dimension_numbers<[1], [1], [0], [0], [0, 0, 1, 0], [], []>} : vector<32x32xbf16>, vector<32x32xbf16>, vector<32x32xf32> -> vector<32x32xf32>
    %106 = arith.addf %105, %38 : vector<32x32xf32>
    %cst_34 = arith.constant dense<0xFF800000> : vector<32xf32>
    %107 = vector.multi_reduction <maximumf>, %106, %cst_34 [1] : vector<32x32xf32> to vector<32xf32>
    %108 = vector.shape_cast %107 : vector<32xf32> to vector<32x1xf32>
    %109 = vector.broadcast %108 : vector<32x1xf32> to vector<32x32xf32>
    %110 = arith.subf %106, %109 : vector<32x32xf32>
    %111 = math.exp %110 : vector<32x32xf32>
    %cst_35 = arith.constant dense<0.000000e+00> : vector<32xf32>
    %112 = vector.multi_reduction <add>, %111, %cst_35 [1] : vector<32x32xf32> to vector<32xf32>
    %113 = vector.shape_cast %112 : vector<32xf32> to vector<32x1xf32>
    %114 = tpu.reciprocal %113 {approx = true} : vector<32x1xf32> -> vector<32x1xf32>
    %115 = vector.broadcast %114 : vector<32x1xf32> to vector<32x32xf32>
    %116 = arith.mulf %111, %115 : vector<32x32xf32>
    %117 = arith.truncf %116 : vector<32x32xf32> to vector<32x32xbf16>
    %cst_36 = arith.constant dense<0.000000e+00> : vector<32x32xf32>
    %118 = tpu.matmul %117, %104, %cst_36 {dimension_numbers = #tpu.dot_dimension_numbers<[1], [0], [0], [1], [0, 0, 1, 1], [], []>} : vector<32x32xbf16>, vector<32x32xbf16>, vector<32x32xf32> -> vector<32x32xf32>
    %119 = tpu.concatenate %58, %78, %98, %118 in 1 : vector<32x32xf32>, vector<32x32xf32>, vector<32x32xf32>, vector<32x32xf32> -> vector<32x128xf32>
    %120 = arith.truncf %119 : vector<32x128xf32> to vector<32x128xbf16>
    %c0_37 = arith.constant 0 : index
    %c0_38 = arith.constant 0 : index
    %c0_39 = arith.constant 0 : index
    %121 = vector.load %arg7[%c0_37, %c0_38, %c0_39] : memref<1x128x128xbf16, #tpu.memory_space<vmem>>, vector<1x128x128xbf16>
    %122 = vector.shape_cast %121 : vector<1x128x128xbf16> to vector<128x128xbf16>
    %cst_40 = arith.constant dense<0.000000e+00> : vector<32x128xf32>
    %123 = tpu.matmul %120, %122, %cst_40 {dimension_numbers = #tpu.dot_dimension_numbers<[1], [0], [0], [1], [0, 0, 1, 1], [], []>} : vector<32x128xbf16>, vector<128x128xbf16>, vector<32x128xf32> -> vector<32x128xf32>
    %c0_41 = arith.constant 0 : index
    %c0_42 = arith.constant 0 : index
    %c0_43 = arith.constant 0 : index
    %124 = vector.load %arg8[%c0_41, %c0_42, %c0_43] : memref<1x1x128xf32, #tpu.memory_space<vmem>>, vector<1x1x128xf32>
    %125 = vector.shape_cast %124 : vector<1x1x128xf32> to vector<1x128xf32>
    %126 = vector.broadcast %125 : vector<1x128xf32> to vector<32x128xf32>
    %127 = arith.addf %123, %126 : vector<32x128xf32>
    %128 = arith.addf %3, %127 : vector<32x128xf32>
    %c0_44 = arith.constant 0 : index
    %c0_45 = arith.constant 0 : index
    %c0_46 = arith.constant 0 : index
    %129 = vector.load %arg9[%c0_44, %c0_45, %c0_46] : memref<1x1x128xf32, #tpu.memory_space<vmem>>, vector<1x1x128xf32>
    %130 = vector.shape_cast %129 : vector<1x1x128xf32> to vector<1x128xf32>
    %c0_47 = arith.constant 0 : index
    %c0_48 = arith.constant 0 : index
    %c0_49 = arith.constant 0 : index
    %131 = vector.load %arg10[%c0_47, %c0_48, %c0_49] : memref<1x1x128xf32, #tpu.memory_space<vmem>>, vector<1x1x128xf32>
    %132 = vector.shape_cast %131 : vector<1x1x128xf32> to vector<1x128xf32>
    %cst_50 = arith.constant dense<0.000000e+00> : vector<32xf32>
    %133 = vector.multi_reduction <add>, %128, %cst_50 [1] : vector<32x128xf32> to vector<32xf32>
    %134 = vector.shape_cast %133 : vector<32xf32> to vector<32x1xf32>
    %cst_51 = arith.constant 1.280000e+02 : f32
    %135 = vector.broadcast %cst_51 : f32 to vector<32x1xf32>
    %136 = arith.divf %134, %135 : vector<32x1xf32>
    %137 = vector.broadcast %136 : vector<32x1xf32> to vector<32x128xf32>
    %138 = arith.subf %128, %137 : vector<32x128xf32>
    %139 = arith.mulf %138, %138 : vector<32x128xf32>
    %cst_52 = arith.constant dense<0.000000e+00> : vector<32xf32>
    %140 = vector.multi_reduction <add>, %139, %cst_52 [1] : vector<32x128xf32> to vector<32xf32>
    %141 = vector.shape_cast %140 : vector<32xf32> to vector<32x1xf32>
    %cst_53 = arith.constant 1.280000e+02 : f32
    %142 = vector.broadcast %cst_53 : f32 to vector<32x1xf32>
    %143 = arith.divf %141, %142 : vector<32x1xf32>
    %144 = vector.broadcast %136 : vector<32x1xf32> to vector<32x128xf32>
    %145 = arith.subf %128, %144 : vector<32x128xf32>
    %cst_54 = arith.constant 9.99999974E-6 : f32
    %146 = vector.broadcast %cst_54 : f32 to vector<32x1xf32>
    %147 = arith.addf %143, %146 : vector<32x1xf32>
    %148 = math.rsqrt %147 : vector<32x1xf32>
    %149 = vector.broadcast %148 : vector<32x1xf32> to vector<32x128xf32>
    %150 = arith.mulf %145, %149 : vector<32x128xf32>
    %151 = vector.broadcast %130 : vector<1x128xf32> to vector<32x128xf32>
    %152 = arith.mulf %150, %151 : vector<32x128xf32>
    %153 = vector.broadcast %132 : vector<1x128xf32> to vector<32x128xf32>
    %154 = arith.addf %152, %153 : vector<32x128xf32>
    %155 = arith.truncf %154 : vector<32x128xf32> to vector<32x128xbf16>
    %c0_55 = arith.constant 0 : index
    %c0_56 = arith.constant 0 : index
    %c0_57 = arith.constant 0 : index
    %156 = vector.load %arg11[%c0_55, %c0_56, %c0_57] : memref<1x128x512xbf16, #tpu.memory_space<vmem>>, vector<1x128x512xbf16>
    %157 = vector.shape_cast %156 : vector<1x128x512xbf16> to vector<128x512xbf16>
    %cst_58 = arith.constant dense<0.000000e+00> : vector<32x512xf32>
    %158 = tpu.matmul %155, %157, %cst_58 {dimension_numbers = #tpu.dot_dimension_numbers<[1], [0], [0], [1], [0, 0, 1, 1], [], []>} : vector<32x128xbf16>, vector<128x512xbf16>, vector<32x512xf32> -> vector<32x512xf32>
    %c0_59 = arith.constant 0 : index
    %c0_60 = arith.constant 0 : index
    %c0_61 = arith.constant 0 : index
    %159 = vector.load %arg12[%c0_59, %c0_60, %c0_61] : memref<1x1x512xf32, #tpu.memory_space<vmem>>, vector<1x1x512xf32>
    %160 = vector.shape_cast %159 : vector<1x1x512xf32> to vector<1x512xf32>
    %161 = vector.broadcast %160 : vector<1x512xf32> to vector<32x512xf32>
    %162 = arith.addf %158, %161 : vector<32x512xf32>
    %cst_62 = arith.constant 1.702000e+00 : f32
    %163 = vector.broadcast %cst_62 : f32 to vector<32x512xf32>
    %164 = arith.mulf %163, %162 : vector<32x512xf32>
    %165 = arith.negf %164 : vector<32x512xf32>
    %166 = math.exp %165 : vector<32x512xf32>
    %cst_63 = arith.constant 1.000000e+00 : f32
    %167 = vector.broadcast %cst_63 : f32 to vector<32x512xf32>
    %168 = arith.addf %167, %166 : vector<32x512xf32>
    %169 = arith.divf %167, %168 : vector<32x512xf32>
    %170 = arith.mulf %162, %169 : vector<32x512xf32>
    %171 = arith.truncf %170 : vector<32x512xf32> to vector<32x512xbf16>
    %c0_64 = arith.constant 0 : index
    %c0_65 = arith.constant 0 : index
    %c0_66 = arith.constant 0 : index
    %172 = vector.load %arg13[%c0_64, %c0_65, %c0_66] : memref<1x512x128xbf16, #tpu.memory_space<vmem>>, vector<1x512x128xbf16>
    %173 = vector.shape_cast %172 : vector<1x512x128xbf16> to vector<512x128xbf16>
    %cst_67 = arith.constant dense<0.000000e+00> : vector<32x128xf32>
    %174 = tpu.matmul %171, %173, %cst_67 {dimension_numbers = #tpu.dot_dimension_numbers<[1], [0], [0], [1], [0, 0, 1, 1], [], []>} : vector<32x512xbf16>, vector<512x128xbf16>, vector<32x128xf32> -> vector<32x128xf32>
    %c0_68 = arith.constant 0 : index
    %c0_69 = arith.constant 0 : index
    %c0_70 = arith.constant 0 : index
    %175 = vector.load %arg14[%c0_68, %c0_69, %c0_70] : memref<1x1x128xf32, #tpu.memory_space<vmem>>, vector<1x1x128xf32>
    %176 = vector.shape_cast %175 : vector<1x1x128xf32> to vector<1x128xf32>
    %177 = vector.broadcast %176 : vector<1x128xf32> to vector<32x128xf32>
    %178 = arith.addf %174, %177 : vector<32x128xf32>
    %179 = arith.addf %128, %178 : vector<32x128xf32>
    %c0_71 = arith.constant 0 : index
    %c0_72 = arith.constant 0 : index
    %180 = vector.load %arg18[%c0_71, %c0_72] : memref<32x128xf32, #tpu.memory_space<vmem>>, vector<32x128xf32>
    tpu.vector_store %arg18[%c0_71, %c0_72], %179 {strides = array<i32>} : memref<32x128xf32, #tpu.memory_space<vmem>>, vector<32x128xf32>,
    %c1_i32 = arith.constant 1 : i32
    %181 = arith.cmpi eq, %arg0, %c1_i32 : i32
    %182 = arith.extui %181 : i1 to i32
    %c0_i32_73 = arith.constant 0 : i32
    %183 = arith.cmpi ne, %182, %c0_i32_73 : i32
    scf.if %183 {
      %c0_74 = arith.constant 0 : index
      %c0_75 = arith.constant 0 : index
      %184 = vector.load %arg18[%c0_74, %c0_75] : memref<32x128xf32, #tpu.memory_space<vmem>>, vector<32x128xf32>
      %c0_76 = arith.constant 0 : index
      %c0_77 = arith.constant 0 : index
      %185 = vector.load %arg15[%c0_76, %c0_77] : memref<1x128xf32, #tpu.memory_space<vmem>>, vector<1x128xf32>
      %c0_78 = arith.constant 0 : index
      %c0_79 = arith.constant 0 : index
      %186 = vector.load %arg16[%c0_78, %c0_79] : memref<1x128xf32, #tpu.memory_space<vmem>>, vector<1x128xf32>
      %cst_80 = arith.constant dense<0.000000e+00> : vector<32xf32>
      %187 = vector.multi_reduction <add>, %184, %cst_80 [1] : vector<32x128xf32> to vector<32xf32>
      %188 = vector.shape_cast %187 : vector<32xf32> to vector<32x1xf32>
      %cst_81 = arith.constant 1.280000e+02 : f32
      %189 = vector.broadcast %cst_81 : f32 to vector<32x1xf32>
      %190 = arith.divf %188, %189 : vector<32x1xf32>
      %191 = vector.broadcast %190 : vector<32x1xf32> to vector<32x128xf32>
      %192 = arith.subf %184, %191 : vector<32x128xf32>
      %193 = arith.mulf %192, %192 : vector<32x128xf32>
      %cst_82 = arith.constant dense<0.000000e+00> : vector<32xf32>
      %194 = vector.multi_reduction <add>, %193, %cst_82 [1] : vector<32x128xf32> to vector<32xf32>
      %195 = vector.shape_cast %194 : vector<32xf32> to vector<32x1xf32>
      %cst_83 = arith.constant 1.280000e+02 : f32
      %196 = vector.broadcast %cst_83 : f32 to vector<32x1xf32>
      %197 = arith.divf %195, %196 : vector<32x1xf32>
      %198 = vector.broadcast %190 : vector<32x1xf32> to vector<32x128xf32>
      %199 = arith.subf %184, %198 : vector<32x128xf32>
      %cst_84 = arith.constant 9.99999974E-6 : f32
      %200 = vector.broadcast %cst_84 : f32 to vector<32x1xf32>
      %201 = arith.addf %197, %200 : vector<32x1xf32>
      %202 = math.rsqrt %201 : vector<32x1xf32>
      %203 = vector.broadcast %202 : vector<32x1xf32> to vector<32x128xf32>
      %204 = arith.mulf %199, %203 : vector<32x128xf32>
      %205 = vector.broadcast %185 : vector<1x128xf32> to vector<32x128xf32>
      %206 = arith.mulf %204, %205 : vector<32x128xf32>
      %207 = vector.broadcast %186 : vector<1x128xf32> to vector<32x128xf32>
      %208 = arith.addf %206, %207 : vector<32x128xf32>
      %c0_85 = arith.constant 0 : index
      %c0_86 = arith.constant 0 : index
      %209 = vector.load %arg17[%c0_85, %c0_86] : memref<32x128xf32, #tpu.memory_space<vmem>>, vector<32x128xf32>
      tpu.vector_store %arg17[%c0_85, %c0_86], %208 {strides = array<i32>} : memref<32x128xf32, #tpu.memory_space<vmem>>, vector<32x128xf32>,
    } else {
    }
    return
  }
  func.func @transform_0(%arg0: i32) -> (i32, i32) {
    %c0_i32 = arith.constant 0 : i32
    %c0_i32_0 = arith.constant 0 : i32
    %c0_i32_1 = arith.constant 0 : i32
    return %c0_i32, %c0_i32_0 : i32, i32
  }
  func.func @transform_1(%arg0: i32) -> (i32, i32) {
    %c0_i32 = arith.constant 0 : i32
    %c0_i32_0 = arith.constant 0 : i32
    %c0_i32_1 = arith.constant 0 : i32
    return %c0_i32, %c0_i32_0 : i32, i32
  }
  func.func @transform_2(%arg0: i32) -> (i32, i32, i32) {
    %c0_i32 = arith.constant 0 : i32
    %c0_i32_0 = arith.constant 0 : i32
    %c0_i32_1 = arith.constant 0 : i32
    return %arg0, %c0_i32, %c0_i32_0 : i32, i32, i32
  }
  func.func @transform_3(%arg0: i32) -> (i32, i32, i32) {
    %c0_i32 = arith.constant 0 : i32
    %c0_i32_0 = arith.constant 0 : i32
    %c0_i32_1 = arith.constant 0 : i32
    return %arg0, %c0_i32, %c0_i32_0 : i32, i32, i32
  }
  func.func @transform_4(%arg0: i32) -> (i32, i32, i32) {
    %c0_i32 = arith.constant 0 : i32
    %c0_i32_0 = arith.constant 0 : i32
    %c0_i32_1 = arith.constant 0 : i32
    return %arg0, %c0_i32, %c0_i32_0 : i32, i32, i32
  }
  func.func @transform_5(%arg0: i32) -> (i32, i32, i32) {
    %c0_i32 = arith.constant 0 : i32
    %c0_i32_0 = arith.constant 0 : i32
    %c0_i32_1 = arith.constant 0 : i32
    return %arg0, %c0_i32, %c0_i32_0 : i32, i32, i32
  }
  func.func @transform_6(%arg0: i32) -> (i32, i32, i32) {
    %c0_i32 = arith.constant 0 : i32
    %c0_i32_0 = arith.constant 0 : i32
    %c0_i32_1 = arith.constant 0 : i32
    return %arg0, %c0_i32, %c0_i32_0 : i32, i32, i32
  }
  func.func @transform_7(%arg0: i32) -> (i32, i32, i32) {
    %c0_i32 = arith.constant 0 : i32
    %c0_i32_0 = arith.constant 0 : i32
    %c0_i32_1 = arith.constant 0 : i32
    return %arg0, %c0_i32, %c0_i32_0 : i32, i32, i32
  }
  func.func @transform_8(%arg0: i32) -> (i32, i32, i32) {
    %c0_i32 = arith.constant 0 : i32
    %c0_i32_0 = arith.constant 0 : i32
    %c0_i32_1 = arith.constant 0 : i32
    return %arg0, %c0_i32, %c0_i32_0 : i32, i32, i32
  }
  func.func @transform_9(%arg0: i32) -> (i32, i32, i32) {
    %c0_i32 = arith.constant 0 : i32
    %c0_i32_0 = arith.constant 0 : i32
    %c0_i32_1 = arith.constant 0 : i32
    return %arg0, %c0_i32, %c0_i32_0 : i32, i32, i32
  }
  func.func @transform_10(%arg0: i32) -> (i32, i32, i32) {
    %c0_i32 = arith.constant 0 : i32
    %c0_i32_0 = arith.constant 0 : i32
    %c0_i32_1 = arith.constant 0 : i32
    return %arg0, %c0_i32, %c0_i32_0 : i32, i32, i32
  }
  func.func @transform_11(%arg0: i32) -> (i32, i32, i32) {
    %c0_i32 = arith.constant 0 : i32
    %c0_i32_0 = arith.constant 0 : i32
    %c0_i32_1 = arith.constant 0 : i32
    return %arg0, %c0_i32, %c0_i32_0 : i32, i32, i32
  }
  func.func @transform_12(%arg0: i32) -> (i32, i32, i32) {
    %c0_i32 = arith.constant 0 : i32
    %c0_i32_0 = arith.constant 0 : i32
    %c0_i32_1 = arith.constant 0 : i32
    return %arg0, %c0_i32, %c0_i32_0 : i32, i32, i32
  }
  func.func @transform_13(%arg0: i32) -> (i32, i32, i32) {
    %c0_i32 = arith.constant 0 : i32
    %c0_i32_0 = arith.constant 0 : i32
    %c0_i32_1 = arith.constant 0 : i32
    return %arg0, %c0_i32, %c0_i32_0 : i32, i32, i32
  }
  func.func @transform_14(%arg0: i32) -> (i32, i32) {
    %c0_i32 = arith.constant 0 : i32
    %c0_i32_0 = arith.constant 0 : i32
    %c0_i32_1 = arith.constant 0 : i32
    return %c0_i32, %c0_i32_0 : i32, i32
  }
  func.func @transform_15(%arg0: i32) -> (i32, i32) {
    %c0_i32 = arith.constant 0 : i32
    %c0_i32_0 = arith.constant 0 : i32
    %c0_i32_1 = arith.constant 0 : i32
    return %c0_i32, %c0_i32_0 : i32, i32
  }
  func.func @transform_16(%arg0: i32) -> (i32, i32) {
    %c0_i32 = arith.constant 0 : i32
    %c0_i32_0 = arith.constant 0 : i32
    %c0_i32_1 = arith.constant 0 : i32
    return %c0_i32, %c0_i32_0 : i32, i32
  }
}

</mosaic_0001>

<bundles_post_ra>
// kernel: clip_forward_pallas.1
= control target key start
LH: loop header
LB: loop body
LE: loop exit
PB: predicated region body
PF: predicated region fallthrough
CT: control target
= control target key end

     0   :  { %s6105_s0 = inlined_call_operand.hbm [shape: f32[32,128], index: 0, kind: input, shape index: {}]   ;;  %s6106_s1 = inlined_call_operand.hbm [shape: f32[32,32], index: 1, kind: input, shape index: {}]   ;;  %s6107_s2 = inlined_call_operand.hbm [shape: f32[2,1,128], index: 2, kind: input, shape index: {}]   ;;  %s6108_s3 = inlined_call_operand.hbm [shape: f32[2,1,128], index: 3, kind: input, shape index: {}]   ;;  %s6109_s4 = inlined_call_operand.hbm [shape: bf16[2,128,384], index: 4, kind: input, shape index: {}]   ;;  %s6110_s5 = inlined_call_operand.hbm [shape: f32[2,1,384], index: 5, kind: input, shape index: {}]   ;;  %s6111_s6 = inlined_call_operand.hbm [shape: bf16[2,128,128], index: 6, kind: input, shape index: {}]   ;;  %s6112_s7 = inlined_call_operand.hbm [shape: f32[2,1,128], index: 7, kind: input, shape index: {}]   ;;  %s6113_s8 = inlined_call_operand.hbm [shape: f32[2,1,128], index: 8, kind: input, shape index: {}]   ;;  %s6114_s9 = inlined_call_operand.hbm [shape: f32[2,1,128], index: 9, kind: input, shape index: {}]   ;;  %s6115_s10 = inlined_call_operand.hbm [shape: bf16[2,128,512], index: 10, kind: input, shape index: {}]   ;;  %s6116_s11 = inlined_call_operand.hbm [shape: f32[2,1,512], index: 11, kind: input, shape index: {}]   ;;  %s6117_s12 = inlined_call_operand.hbm [shape: bf16[2,512,128], index: 12, kind: input, shape index: {}]   ;;  %s6118_s13 = inlined_call_operand.hbm [shape: f32[2,1,128], index: 13, kind: input, shape index: {}]   ;;  %s6119_s14 = inlined_call_operand.hbm [shape: f32[1,128], index: 14, kind: input, shape index: {}]   ;;  %s6120_s15 = inlined_call_operand.hbm [shape: f32[1,128], index: 15, kind: input, shape index: {}]   ;;  %s6121_s16 = inlined_call_operand.hbm [shape: f32[32,128], index: 16, kind: output, shape index: {}]  }
   0x1   :  { %6159 = sst [smem:[#allocation38_spill]] %s6105_s0 }
   0x2   :  { %6160 = sst [smem:[#allocation39_spill]] %s6106_s1 }
   0x3   :  { %6161 = sst [smem:[#allocation40_spill]] %s6107_s2 }
   0x4   :  { %6162 = sst [smem:[#allocation41_spill]] %s6108_s3 }
   0x5   :  { %6163 = sst [smem:[#allocation42_spill]] %s6109_s4 }
   0x6   :  { %6164 = sst [smem:[#allocation43_spill]] %s6110_s5 }
   0x7   :  { %6165 = sst [smem:[#allocation44_spill]] %s6111_s6 }
   0x8   :  { %6166 = sst [smem:[#allocation45_spill]] %s6118_s13 }
   0x9   :  { %6167 = sst [smem:[#allocation46_spill]] %s6119_s14 }
   0xa   :  { %6168 = sst [smem:[#allocation47_spill]] %s6120_s15 }
   0xb   :  { %6169 = sst [smem:[#allocation48_spill]] %s6121_s16 }
   0xc   :  { %21 = vsyncpa [#allocation4], 0 }
   0xd   :  { %22 = vsyncpa [#allocation7], 0 }
   0xe   :  { %23 = vsyncpa [#allocation22], 0 }
   0xf   :  { %24 = vsyncpa [#allocation5], 0  ;;  %s5017_s21 = smov 0   ;;  %s5019_s22 = smov 0  }
  0x10   :  { %s5021_s23 = smov 0   ;;  %s5023_s24 = smov 0  }
  0x11 LB: > { %6170 = sst [smem:[#allocation30_spill]] %s4891_s22  ;;  %s5036_s25 = sadd.s32 4294967295, %s4899_s24   ;;  %s4899_s24 = sphi %s5023_s24, %s6232_s24   ;;  %s4895_s23 = sphi %s5021_s23, %s6235_s23   ;;  %s4891_s22 = sphi %s5019_s22, %s6234_s22   ;;  %s4887_s21 = sphi %s5017_s21, %s6233_s21  }
  0x12   : > { %6171 = sst [smem:[#allocation31_spill]] %s4895_s23  ;;  %s5039_s26 = sadd.s32 1, %s4899_s24  }
  0x13   : > { %6172 = sst [smem:[#allocation32_spill]] %s5036_s25  ;;  %s76_s27 = ssub.s32 %s4899_s24, %s5039_s26 }
  0x14   : > { %6173 = sst [smem:[#allocation33_spill]] %s5039_s26  ;;  %s79_s28 = sadd.s32 1, %s4895_s23 }
  0x15   : > { %p77_p0 = scmp.eq.s32.totalorder %s76_s27, 0  ;;  %p86_p1 = scmp.ne.s32.totalorder %s4895_s23, %s4891_s22 }
  0x16   : > { %p87_p2 = scmp.eq.s32.totalorder %s4899_s24, 0  ;;  %p92_p3 = scmp.ne.s32.totalorder %s4891_s22, %s4887_s21 }
  0x17   : > { %s5049_s29 = scalar_select %p77_p0, %s4895_s23, %s79_s28  }
  0x18   : > { %p5051_p4 = por %p87_p2, %p86_p1  ;;  %p6133_p5 = scmp.eq.s32.totalorder %s5036_s25, 0 }
  0x19   : > { %6174 = sst [smem:[#allocation34_spill]] %s5049_s29  ;;  %p3478_p6 = scmp.ge.s32.totalorder %s4899_s24, 1 }
  0x1a   : > { %p452_p7 = scmp.lt.s32.totalorder %s4899_s24, 3  ;;  %p5060_p8 = por %p6133_p5, %p92_p3 }
  0x1b   : > { %s4901_s18 = smov [#allocation3]   ;;  %p3983_p13 = scmp.lt.s32.totalorder %s4899_s24, 2 }
  0x1c   : > { %s6176_s0 = scalar_select %p5060_p8, 1, 0 }
  0x1d   : > { %p5065_p10 = pnand %p3478_p6, %p452_p7  ;;  %s464_s19 = sshll.u32 %s4901_s18, 4  ;;  %s465_s19 = int_to_ptr.vmem [resolvable:$true] %s464_s19 }
  0x1e   : > { %6177 = sst [smem:[#allocation35_spill]] %s6176_s0  ;;  %s5079_s21 = sand.u32 1, %s4895_s23  }
  0x1f   : > { %s6178_s17 = scalar_select %p5065_p10, 1, 0 }
  0x20   : > { %p3929_p11 = pneg %p5065_p10  ;;  %s513_s27 = sand.u32 1, %s4899_s24  }
  0x21   : > { %6179 = sst [smem:[#allocation36_spill]] %s6178_s17  ;;  %p5084_p0 = pnand %p3983_p13, %p5051_p4 }
  0x22   : > { %p5073_p12 = pnand %p3929_p11, %p6133_p5  ;;  %s6183_s26 = sld [smem:[#allocation38_spill]] }
  0x23   : > { %s6182_s28 = scalar_select %p5084_p0, 1, 0 }
  0x24   : > { %s6180_s20 = scalar_select %p5073_p12, 1, 0 }
  0x25   : > { %p5096_p2 = pneg %p5073_p12 }
  0x26   : > { %6181 = sst [smem:[#allocation37_spill]] %s6180_s20 }
  0x27   : > { %s6184_s25 = scalar_select %p5096_p2, 1, 0 }
  0x28   : > { %s4347_s16 = scalar_lea.hbm %s6183_s26, 512 }
  0x29   : > { %p4348_p1 = scmp.ne.s32.totalorder %s6183_s26, %s4347_s16  ;;  %p4354_p6 = scmp.lt.u32.totalorder %s4347_s16, %s6183_s26 }
  0x2b   : > { %p4350_p3 = pnand %p5096_p2, %p4348_p1 }
  0x2d   : > { %p4351_p4 = pneg %p4350_p3 }
  0x2f   : > { %p4356_p7 = pnand %p4354_p6, %p4351_p4 }
  0x31   : > { %4359 = shalt.err (!%p4356_p7)
}
  0x32   : > { %s4360_s29 = scalar_lea.vmem %s465_s19, 512  ;;  %p4368_p5 = scmp.lt.s32.totalorder %s465_s19, %s465_s19 }
  0x33   : > { %p4361_p11 = scmp.ne.s32.totalorder %s465_s19, %s4360_s29  ;;  %p4369_p8 = scmp.lt.s32.totalorder %s4360_s29, %s4360_s29 }
  0x35   : > { %p4363_p13 = pnand %p4361_p11, %p5096_p2  ;;  %p4370_p10 = por %p4369_p8, %p4368_p5 }
  0x37   : > { %p4364_p9 = pneg %p4363_p13 }
  0x39   : > { %p4371_p0 = pnand %p4370_p10, %p4364_p9 }
  0x3b   : > { %4374 = shalt.err (!%p4371_p0)
}
  0x3c   : > { %s6141_s22 = smov 128   ;;  %s6146_s23 = smov 8  }
  0x3d   : > { %3932 = dma.hbm_to_vmem [thread:$0]  (!%p5073_p12), %s6183_s26, 512, %s465_s19, [#allocation4], %s6141_s22, %s6141_s22, %s6146_s23  }
  0x3e   : > { %s5116_s18 = sshll.u32 %s4899_s24, 4  ;;  %s6185_s2 = sld [smem:[#allocation40_spill]] }
  0x3f   : > { %s516_s15 = scalar_lea.vmem [#allocation8], %s5079_s21  ;;  %s5127_s14 = scalar_lea.sflag [#allocation4], %s513_s27 }
  0x40   : > { %s523_s13 = sshll.u32 %s516_s15, 4  ;;  %p6186_p8 = scmp.ne.s32.totalorder %s6182_s28, 0  ;;  %s5125_s13 = int_to_ptr.vmem [resolvable:$true] %s523_s13 }
  0x42   : > { %p5133_p9 = pneg %p6186_p8 }
  0x44   : > { %s5122_s17 = scalar_lea.hbm %s6185_s2, %s5116_s18  ;;  %s4380_s29 = scalar_lea.hbm %s6185_s2, 32 }
  0x45   : > { %s4375_s16 = scalar_lea.hbm %s5122_s17, 16  ;;  %p4381_p1 = scmp.lt.u32.totalorder %s5122_s17, %s6185_s2 }
  0x46   : > { %p4376_p5 = scmp.ne.s32.totalorder %s5122_s17, %s4375_s16  ;;  %p4382_p3 = scmp.lt.u32.totalorder %s4380_s29, %s4375_s16 }
  0x47   : > { %s6187_s19 = scalar_select %p5133_p9, 1, 0 }
  0x48   : > { %p4378_p10 = pnand %p5133_p9, %p4376_p5  ;;  %p4383_p4 = por %p4382_p3, %p4381_p1 }
  0x49   : > { %p4384_p6 = scmp.lt.u32.totalorder %s4375_s16, %s5122_s17 }
  0x4a   : > { %p4379_p0 = pneg %p4378_p10 }
  0x4b   : > { %p4385_p7 = por %p4384_p6, %p4383_p4 }
  0x4d   : > { %p4386_p11 = pnand %p4385_p7, %p4379_p0 }
  0x4f   : > { %4389 = shalt.err (!%p4386_p11)
}
  0x50   : > { %s4390_s27 = scalar_lea.vmem %s5125_s13, 16  ;;  %s4904_s0 = smov [#allocation8]  }
  0x51   : > { %p4391_p13 = scmp.ne.s32.totalorder %s5125_s13, %s4390_s27  ;;  %s4395_s30 = sshll.u32 %s4904_s0, 4  ;;  %s4396_s30 = int_to_ptr.vmem [resolvable:$false] %s4395_s30 }
  0x52   : > { %s4397_s22 = scalar_lea.vmem %s4396_s30, 32  ;;  %p4398_p12 = scmp.lt.s32.totalorder %s5125_s13, %s4396_s30 }
  0x53   : > { %p4393_p5 = pnand %p4391_p13, %p5133_p9  ;;  %p4399_p2 = scmp.lt.s32.totalorder %s4397_s22, %s4390_s27 }
  0x55   : > { %p4394_p10 = pneg %p4393_p5  ;;  %p4400_p1 = por %p4399_p2, %p4398_p12 }
  0x57   : > { %p4401_p3 = pnand %p4400_p1, %p4394_p10 }
  0x59   : > { %4404 = shalt.err (!%p4401_p3)
}
  0x5a   : > { %3945 = dma.hbm_to_vmem [thread:$0]  (!%p6186_p8), %s5122_s17, 16, %s5125_s13, %s5127_s14  }
  0x5b   : > { %s6188_s3 = sld [smem:[#allocation41_spill]]  ;;  %s533_s27 = scalar_lea.vmem [#allocation9], %s5079_s21 }
  0x5c   : > { %s540_s0 = sshll.u32 %s533_s27, 4  ;;  %s3879_s30 = smul.u32 192, %s5079_s21  ;;  %s541_s0 = int_to_ptr.vmem [resolvable:$true] %s540_s0 }
  0x61   : > { %s5161_s15 = scalar_lea.hbm %s6188_s3, %s5116_s18  ;;  %s4410_s17 = scalar_lea.hbm %s6188_s3, 32 }
  0x62   : > { %s4405_s22 = scalar_lea.hbm %s5161_s15, 16  ;;  %p4411_p4 = scmp.lt.u32.totalorder %s5161_s15, %s6188_s3 }
  0x63   : > { %p4406_p12 = scmp.ne.s32.totalorder %s5161_s15, %s4405_s22  ;;  %p4412_p6 = scmp.lt.u32.totalorder %s4410_s17, %s4405_s22 }
  0x64   : > { %p4414_p11 = scmp.lt.u32.totalorder %s4405_s22, %s5161_s15 }
  0x65   : > { %p4408_p2 = pnand %p4406_p12, %p5133_p9  ;;  %p4413_p7 = por %p4412_p6, %p4411_p4 }
  0x67   : > { %p4409_p0 = pneg %p4408_p2  ;;  %p4415_p13 = por %p4414_p11, %p4413_p7 }
  0x69   : > { %p4416_p5 = pnand %p4415_p13, %p4409_p0 }
  0x6b   : > { %4419 = shalt.err (!%p4416_p5)
}
  0x6c   : > { %s4420_s27 = scalar_lea.vmem %s541_s0, 16  ;;  %s4905_s2 = smov [#allocation9]  }
  0x6d   : > { %p4421_p10 = scmp.ne.s32.totalorder %s541_s0, %s4420_s27  ;;  %s4425_s26 = sshll.u32 %s4905_s2, 4  ;;  %s4426_s26 = int_to_ptr.vmem [resolvable:$false] %s4425_s26 }
  0x6e   : > { %s4427_s23 = scalar_lea.vmem %s4426_s26, 32  ;;  %p4428_p12 = scmp.lt.s32.totalorder %s541_s0, %s4426_s26 }
  0x6f   : > { %p4423_p1 = pnand %p4421_p10, %p5133_p9  ;;  %p4429_p2 = scmp.lt.s32.totalorder %s4427_s23, %s4420_s27 }
  0x71   : > { %p4424_p3 = pneg %p4423_p1  ;;  %p4430_p8 = por %p4429_p2, %p4428_p12 }
  0x73   : > { %p4431_p4 = pnand %p4430_p8, %p4424_p3 }
  0x75   : > { %4434 = shalt.err (!%p4431_p4)
}
  0x76   : > { %p6189_p6 = scmp.ne.s32.totalorder %s6182_s28, 0  ;;  %s3880_s22 = smul.u32 3072, %s4899_s24 }
  0x77   : > { %s551_s13 = scalar_lea.vmem [#allocation10], %s3879_s30  ;;  %s6190_s4 = sld [smem:[#allocation42_spill]] }
  0x78   : > { %3948 = dma.hbm_to_vmem [thread:$0]  (!%p6189_p6), %s5161_s15, 16, %s541_s0, %s5127_s14  }
  0x79   : > { %s558_s17 = sshll.u32 %s551_s13, 4  ;;  %s3881_s26 = smul.u32 3, %s5079_s21  ;;  %s5189_s17 = int_to_ptr.vmem [resolvable:$true] %s558_s17 }
  0x7d   : > { %s5187_s29 = scalar_lea.hbm %s6190_s4, %s3880_s22  ;;  %s4440_s30 = scalar_lea.hbm %s6190_s4, 6144 }
  0x7e   : > { %s4435_s27 = scalar_lea.hbm %s5187_s29, 3072  ;;  %p4441_p11 = scmp.lt.u32.totalorder %s5187_s29, %s6190_s4 }
  0x7f   : > { %p4436_p8 = scmp.ne.s32.totalorder %s5187_s29, %s4435_s27  ;;  %p4442_p13 = scmp.lt.u32.totalorder %s4440_s30, %s4435_s27 }
  0x80   : > { %p4444_p10 = scmp.lt.u32.totalorder %s4435_s27, %s5187_s29 }
  0x81   : > { %p4438_p0 = pnand %p4436_p8, %p5133_p9  ;;  %p4443_p5 = por %p4442_p13, %p4441_p11 }
  0x83   : > { %p4439_p7 = pneg %p4438_p0  ;;  %p4445_p1 = por %p4444_p10, %p4443_p5 }
  0x85   : > { %p4446_p3 = pnand %p4445_p1, %p4439_p7 }
  0x87   : > { %4449 = shalt.err (!%p4446_p3)
}
  0x88   : > { %s4450_s22 = scalar_lea.vmem %s5189_s17, 3072  ;;  %s4906_s16 = smov [#allocation10]  }
  0x89   : > { %p4451_p12 = scmp.ne.s32.totalorder %s5189_s17, %s4450_s22  ;;  %s4455_s2 = sshll.u32 %s4906_s16, 4  ;;  %s4456_s2 = int_to_ptr.vmem [resolvable:$false] %s4455_s2 }
  0x8a   : > { %s4457_s15 = scalar_lea.vmem %s4456_s2, 6144  ;;  %p4458_p8 = scmp.lt.s32.totalorder %s5189_s17, %s4456_s2 }
  0x8b   : > { %p4453_p2 = pnand %p4451_p12, %p5133_p9  ;;  %p4459_p0 = scmp.lt.s32.totalorder %s4457_s15, %s4450_s22 }
  0x8d   : > { %p4454_p4 = pneg %p4453_p2  ;;  %p4460_p11 = por %p4459_p0, %p4458_p8 }
  0x8f   : > { %p4461_p13 = pnand %p4460_p11, %p4454_p4 }
  0x91   : > { %4464 = shalt.err (!%p4461_p13)
}
  0x92   : > { %s4907_s27 = smov 192   ;;  %s4908_s0 = smov 12  }
  0x93   : > { %3951 = dma.hbm_to_vmem [thread:$0]  (!%p6189_p6), %s5187_s29, 3072, %s5189_s17, %s5127_s14, %s4907_s27, %s4907_s27, %s4908_s0  }
  0x94   : > { %s3882_s30 = smul.u32 48, %s4899_s24  ;;  %s572_s23 = scalar_lea.vmem [#allocation11], %s3881_s26 }
  0x95   : > { %s580_s13 = sshll.u32 %s572_s23, 4  ;;  %s3488_s22 = sshll.u32 %s5079_s21, 6  ;;  %s581_s13 = int_to_ptr.vmem [resolvable:$true] %s580_s13 }
  0x96   : > { %s6191_s5 = sld [smem:[#allocation43_spill]] }
  0x9c   : > { %s578_s15 = scalar_lea.hbm %s6191_s5, %s3882_s30  ;;  %s4470_s1 = scalar_lea.hbm %s6191_s5, 96 }
  0x9d   : > { %s4465_s3 = scalar_lea.hbm %s578_s15, 48  ;;  %p4471_p1 = scmp.lt.u32.totalorder %s578_s15, %s6191_s5 }
  0x9e   : > { %p4466_p7 = scmp.ne.s32.totalorder %s578_s15, %s4465_s3  ;;  %p4472_p3 = scmp.lt.u32.totalorder %s4470_s1, %s4465_s3 }
  0x9f   : > { %p4474_p2 = scmp.lt.u32.totalorder %s4465_s3, %s578_s15 }
  0xa0   : > { %p4468_p5 = pnand %p4466_p7, %p5133_p9  ;;  %p4473_p12 = por %p4472_p3, %p4471_p1 }
  0xa2   : > { %p4469_p10 = pneg %p4468_p5  ;;  %p4475_p4 = por %p4474_p2, %p4473_p12 }
  0xa4   : > { %p4476_p8 = pnand %p4475_p4, %p4469_p10 }
  0xa6   : > { %4479 = shalt.err (!%p4476_p8)
}
  0xa7   : > { %s4480_s26 = scalar_lea.vmem %s581_s13, 48  ;;  %s4909_s27 = smov [#allocation11]  }
  0xa8   : > { %p4481_p0 = scmp.ne.s32.totalorder %s581_s13, %s4480_s26  ;;  %s4485_s0 = sshll.u32 %s4909_s27, 4  ;;  %s4486_s0 = int_to_ptr.vmem [resolvable:$false] %s4485_s0 }
  0xa9   : > { %s4487_s4 = scalar_lea.vmem %s4486_s0, 96  ;;  %p4488_p7 = scmp.lt.s32.totalorder %s581_s13, %s4486_s0 }
  0xaa   : > { %p4483_p11 = pnand %p4481_p0, %p5133_p9  ;;  %p4489_p5 = scmp.lt.s32.totalorder %s4487_s4, %s4480_s26 }
  0xac   : > { %p4484_p13 = pneg %p4483_p11  ;;  %p4490_p6 = por %p4489_p5, %p4488_p7 }
  0xae   : > { %p4491_p1 = pnand %p4490_p6, %p4484_p13 }
  0xb0   : > { %4494 = shalt.err (!%p4491_p1)
}
  0xb1   : > { %p6192_p3 = scmp.ne.s32.totalorder %s6182_s28, 0  ;;  %s3655_s1 = sshll.u32 %s4899_s24, 10 }
  0xb2   : > { %s6193_s6 = sld [smem:[#allocation44_spill]]  ;;  %s591_s23 = scalar_lea.vmem [#allocation12], %s3488_s22 }
  0xb3   : > { %3954 = dma.hbm_to_vmem [thread:$0]  (!%p6192_p3), %s578_s15, 48, %s581_s13, %s5127_s14  }
  0xb4   : > { %s598_s16 = sshll.u32 %s591_s23, 4  ;;  %s5242_s16 = int_to_ptr.vmem [resolvable:$true] %s598_s16 }
  0xb8   : > { %s5238_s30 = scalar_lea.hbm %s6193_s6, %s3655_s1  ;;  %s4500_s17 = scalar_lea.hbm %s6193_s6, 2048 }
  0xb9   : > { %s4495_s2 = scalar_lea.hbm %s5238_s30, 1024  ;;  %p4501_p2 = scmp.lt.u32.totalorder %s5238_s30, %s6193_s6 }
  0xba   : > { %p4496_p6 = scmp.ne.s32.totalorder %s5238_s30, %s4495_s2  ;;  %p4502_p4 = scmp.lt.u32.totalorder %s4500_s17, %s4495_s2 }
  0xbb   : > { %p4504_p0 = scmp.lt.u32.totalorder %s4495_s2, %s5238_s30 }
  0xbc   : > { %p4498_p10 = pnand %p4496_p6, %p5133_p9  ;;  %p4503_p8 = por %p4502_p4, %p4501_p2 }
  0xbe   : > { %p4499_p12 = pneg %p4498_p10  ;;  %p4505_p11 = por %p4504_p0, %p4503_p8 }
  0xc0   : > { %p4506_p13 = pnand %p4505_p11, %p4499_p12 }
  0xc2   : > { %4509 = shalt.err (!%p4506_p13)
}
  0xc3   : > { %s4510_s22 = scalar_lea.vmem %s5242_s16, 1024  ;;  %s4910_s27 = smov [#allocation12]  }
  0xc4   : > { %p4511_p7 = scmp.ne.s32.totalorder %s5242_s16, %s4510_s22  ;;  %s4515_s0 = sshll.u32 %s4910_s27, 4  ;;  %s4516_s0 = int_to_ptr.vmem [resolvable:$false] %s4515_s0 }
  0xc5   : > { %s4517_s4 = scalar_lea.vmem %s4516_s0, 2048  ;;  %p4518_p6 = scmp.lt.s32.totalorder %s5242_s16, %s4516_s0 }
  0xc6   : > { %p4513_p5 = pnand %p4511_p7, %p5133_p9  ;;  %p4519_p10 = scmp.lt.s32.totalorder %s4517_s4, %s4510_s22 }
  0xc8   : > { %p4514_p1 = pneg %p4513_p5  ;;  %p4520_p2 = por %p4519_p10, %p4518_p6 }
  0xca   : > { %p4521_p4 = pnand %p4520_p2, %p4514_p1 }
  0xcc   : > { %4524 = shalt.err (!%p4521_p4)
}
  0xcd   : > { %s6155_s1 = smov 64   ;;  %s6156_s3 = smov 4  }
  0xce   : > { %3957 = dma.hbm_to_vmem [thread:$0]  (!%p6192_p3), %s5238_s30, 1024, %s5242_s16, %s5127_s14, %s6155_s1, %s6155_s1, %s6156_s3  }
  0xcf   : > { %s5273_s2 = scalar_lea.hbm %s6112_s7, %s5116_s18  ;;  %s611_s13 = scalar_lea.vmem [#allocation13], %s5079_s21 }
  0xd0   : > { %s618_s15 = sshll.u32 %s611_s13, 4  ;;  %s4525_s17 = scalar_lea.hbm %s5273_s2, 16  ;;  %s619_s15 = int_to_ptr.vmem [resolvable:$true] %s618_s15 }
  0xd1   : > { %p4526_p12 = scmp.ne.s32.totalorder %s5273_s2, %s4525_s17  ;;  %s4530_s30 = scalar_lea.hbm %s6112_s7, 32 }
  0xd2   : > { %p4531_p11 = scmp.lt.u32.totalorder %s5273_s2, %s6112_s7  ;;  %p4532_p13 = scmp.lt.u32.totalorder %s4530_s30, %s4525_s17 }
  0xd3   : > { %p4528_p8 = pnand %p4526_p12, %p5133_p9  ;;  %p4534_p5 = scmp.lt.u32.totalorder %s4525_s17, %s5273_s2 }
  0xd4   : > { %p4533_p7 = por %p4532_p13, %p4531_p11 }
  0xd5   : > { %p4529_p0 = pneg %p4528_p8 }
  0xd6   : > { %p4535_p1 = por %p4534_p5, %p4533_p7 }
  0xd8   : > { %p4536_p6 = pnand %p4535_p1, %p4529_p0 }
  0xda   : > { %4539 = shalt.err (!%p4536_p6)
}
  0xdb   : > { %s4540_s27 = scalar_lea.vmem %s619_s15, 16  ;;  %s4913_s0 = smov [#allocation13]  }
  0xdc   : > { %p4541_p10 = scmp.ne.s32.totalorder %s619_s15, %s4540_s27  ;;  %s4545_s4 = sshll.u32 %s4913_s0, 4  ;;  %s4546_s4 = int_to_ptr.vmem [resolvable:$false] %s4545_s4 }
  0xdd   : > { %s4547_s20 = scalar_lea.vmem %s4546_s4, 32  ;;  %p4548_p12 = scmp.lt.s32.totalorder %s619_s15, %s4546_s4 }
  0xde   : > { %p4543_p2 = pnand %p4541_p10, %p5133_p9  ;;  %p4549_p8 = scmp.lt.s32.totalorder %s4547_s20, %s4540_s27 }
  0xe0   : > { %p4544_p4 = pneg %p4543_p2  ;;  %p4550_p3 = por %p4549_p8, %p4548_p12 }
  0xe2   : > { %p4551_p11 = pnand %p4550_p3, %p4544_p4 }
  0xe4   : > { %4554 = shalt.err (!%p4551_p11)
}
  0xe5   : > { %p6194_p13 = scmp.ne.s32.totalorder %s6182_s28, 0  ;;  %s5298_s17 = scalar_lea.hbm %s6113_s8, %s5116_s18 }
  0xe6   : > { %s628_s29 = scalar_lea.vmem [#allocation14], %s5079_s21  ;;  %s4555_s30 = scalar_lea.hbm %s5298_s17, 16 }
  0xe7   : > { %3960 = dma.hbm_to_vmem [thread:$0]  (!%p6194_p13), %s5273_s2, 16, %s619_s15, %s5127_s14  }
  0xe8   : > { %s635_s26 = sshll.u32 %s628_s29, 4  ;;  %p4556_p3 = scmp.ne.s32.totalorder %s5298_s17, %s4555_s30  ;;  %s636_s26 = int_to_ptr.vmem [resolvable:$true] %s635_s26 }
  0xe9   : > { %s4560_s2 = scalar_lea.hbm %s6113_s8, 32  ;;  %p4561_p5 = scmp.lt.u32.totalorder %s5298_s17, %s6113_s8 }
  0xea   : > { %p4558_p0 = pnand %p4556_p3, %p5133_p9  ;;  %p4562_p1 = scmp.lt.u32.totalorder %s4560_s2, %s4555_s30 }
  0xeb   : > { %p4564_p10 = scmp.lt.u32.totalorder %s4555_s30, %s5298_s17 }
  0xec   : > { %p4559_p7 = pneg %p4558_p0  ;;  %p4563_p6 = por %p4562_p1, %p4561_p5 }
  0xee   : > { %p4565_p2 = por %p4564_p10, %p4563_p6 }
  0xf0   : > { %p4566_p4 = pnand %p4565_p2, %p4559_p7 }
  0xf2   : > { %4569 = shalt.err (!%p4566_p4)
}
  0xf3   : > { %s4570_s0 = scalar_lea.vmem %s636_s26, 16  ;;  %s4914_s4 = smov [#allocation14]  }
  0xf4   : > { %p4571_p12 = scmp.ne.s32.totalorder %s636_s26, %s4570_s0  ;;  %s4575_s20 = sshll.u32 %s4914_s4, 4  ;;  %s4576_s20 = int_to_ptr.vmem [resolvable:$false] %s4575_s20 }
  0xf5   : > { %s4577_s23 = scalar_lea.vmem %s4576_s20, 32  ;;  %p4578_p3 = scmp.lt.s32.totalorder %s636_s26, %s4576_s20 }
  0xf6   : > { %p4573_p8 = pnand %p4571_p12, %p5133_p9  ;;  %p4579_p0 = scmp.lt.s32.totalorder %s4577_s23, %s4570_s0 }
  0xf8   : > { %p4574_p11 = pneg %p4573_p8  ;;  %p4580_p13 = por %p4579_p0, %p4578_p3 }
  0xfa   : > { %p4581_p1 = pnand %p4580_p13, %p4574_p11 }
  0xfc   : > { %4584 = shalt.err (!%p4581_p1)
}
  0xfd   : > { %p6195_p5 = scmp.ne.s32.totalorder %s6182_s28, 0  ;;  %s5323_s30 = scalar_lea.hbm %s6114_s9, %s5116_s18 }
  0xfe   : > { %s645_s16 = scalar_lea.vmem [#allocation15], %s5079_s21  ;;  %s3494_s2 = sshll.u32 %s5079_s21, 8 }
  0xff   : > { %3963 = dma.hbm_to_vmem [thread:$0]  (!%p6195_p5), %s5298_s17, 16, %s636_s26, %s5127_s14  }
 0x100   : > { %s652_s22 = sshll.u32 %s645_s16, 4  ;;  %s4585_s15 = scalar_lea.hbm %s5323_s30, 16  ;;  %s653_s22 = int_to_ptr.vmem [resolvable:$true] %s652_s22 }
 0x101   : > { %p4586_p13 = scmp.ne.s32.totalorder %s5323_s30, %s4585_s15  ;;  %s4590_s26 = scalar_lea.hbm %s6114_s9, 32 }
 0x102   : > { %p4591_p10 = scmp.lt.u32.totalorder %s5323_s30, %s6114_s9  ;;  %p4592_p2 = scmp.lt.u32.totalorder %s4590_s26, %s4585_s15 }
 0x103   : > { %p4588_p7 = pnand %p4586_p13, %p5133_p9  ;;  %p4594_p12 = scmp.lt.u32.totalorder %s4585_s15, %s5323_s30 }
 0x104   : > { %p4593_p4 = por %p4592_p2, %p4591_p10 }
 0x105   : > { %p4589_p6 = pneg %p4588_p7 }
 0x106   : > { %p4595_p8 = por %p4594_p12, %p4593_p4 }
 0x108   : > { %p4596_p11 = pnand %p4595_p8, %p4589_p6 }
 0x10a   : > { %4599 = shalt.err (!%p4596_p11)
}
 0x10b   : > { %s4600_s20 = scalar_lea.vmem %s653_s22, 16  ;;  %s4915_s23 = smov [#allocation15]  }
 0x10c   : > { %p4601_p3 = scmp.ne.s32.totalorder %s653_s22, %s4600_s20  ;;  %s4605_s13 = sshll.u32 %s4915_s23, 4  ;;  %s4606_s13 = int_to_ptr.vmem [resolvable:$false] %s4605_s13 }
 0x10d   : > { %s4607_s29 = scalar_lea.vmem %s4606_s13, 32  ;;  %p4608_p13 = scmp.lt.s32.totalorder %s653_s22, %s4606_s13 }
 0x10e   : > { %p4603_p0 = pnand %p4601_p3, %p5133_p9  ;;  %p4609_p7 = scmp.lt.s32.totalorder %s4607_s29, %s4600_s20 }
 0x110   : > { %p4604_p1 = pneg %p4603_p0  ;;  %p4610_p5 = por %p4609_p7, %p4608_p13 }
 0x112   : > { %p4611_p2 = pnand %p4610_p5, %p4604_p1 }
 0x114   : > { %4614 = shalt.err (!%p4611_p2)
}
 0x115   : > { %p6196_p10 = scmp.ne.s32.totalorder %s6182_s28, 0  ;;  %s3656_s16 = sshll.u32 %s4899_s24, 12 }
 0x116   : > { %s5351_s17 = scalar_lea.hbm %s6115_s10, %s3656_s16  ;;  %s663_s26 = scalar_lea.vmem [#allocation16], %s3494_s2 }
 0x117   : > { %3966 = dma.hbm_to_vmem [thread:$0]  (!%p6196_p10), %s5323_s30, 16, %s653_s22, %s5127_s14  }
 0x118   : > { %s670_s0 = sshll.u32 %s663_s26, 4  ;;  %s3497_s4 = sshll.u32 %s5079_s21, 2  ;;  %s5355_s0 = int_to_ptr.vmem [resolvable:$true] %s670_s0 }
 0x119   : > { %s4615_s20 = scalar_lea.hbm %s5351_s17, 4096  ;;  %s4620_s23 = scalar_lea.hbm %s6115_s10, 8192 }
 0x11a   : > { %p4616_p5 = scmp.ne.s32.totalorder %s5351_s17, %s4615_s20  ;;  %p4621_p12 = scmp.lt.u32.totalorder %s5351_s17, %s6115_s10 }
 0x11b   : > { %p4622_p8 = scmp.lt.u32.totalorder %s4620_s23, %s4615_s20  ;;  %p4624_p3 = scmp.lt.u32.totalorder %s4615_s20, %s5351_s17 }
 0x11c   : > { %p4618_p6 = pnand %p4616_p5, %p5133_p9 }
 0x11d   : > { %p4623_p11 = por %p4622_p8, %p4621_p12 }
 0x11e   : > { %p4619_p4 = pneg %p4618_p6 }
 0x11f   : > { %p4625_p0 = por %p4624_p3, %p4623_p11 }
 0x121   : > { %p4626_p1 = pnand %p4625_p0, %p4619_p4 }
 0x123   : > { %4629 = shalt.err (!%p4626_p1)
}
 0x124   : > { %s4630_s15 = scalar_lea.vmem %s5355_s0, 4096  ;;  %s4916_s27 = smov [#allocation16]  }
 0x125   : > { %p4631_p13 = scmp.ne.s32.totalorder %s5355_s0, %s4630_s15  ;;  %s4635_s26 = sshll.u32 %s4916_s27, 4  ;;  %s4636_s26 = int_to_ptr.vmem [resolvable:$false] %s4635_s26 }
 0x126   : > { %s4637_s30 = scalar_lea.vmem %s4636_s26, 8192  ;;  %p4638_p5 = scmp.lt.s32.totalorder %s5355_s0, %s4636_s26 }
 0x127   : > { %p4633_p7 = pnand %p4631_p13, %p5133_p9  ;;  %p4639_p6 = scmp.lt.s32.totalorder %s4637_s30, %s4630_s15 }
 0x129   : > { %p4634_p2 = pneg %p4633_p7  ;;  %p4640_p12 = por %p4639_p6, %p4638_p5 }
 0x12b   : > { %p4641_p8 = pnand %p4640_p12, %p4634_p2 }
 0x12d   : > { %4644 = shalt.err (!%p4641_p8)
}
 0x12e   : > { %s4917_s20 = smov 256   ;;  %s4918_s22 = smov 16  }
 0x12f   : > { %3969 = dma.hbm_to_vmem [thread:$0]  (!%p6196_p10), %s5351_s17, 4096, %s5355_s0, %s5127_s14, %s4917_s20, %s4917_s20, %s4918_s22  }
 0x130   : > { %s3657_s23 = sshll.u32 %s4899_s24, 6  ;;  %s684_s15 = scalar_lea.vmem [#allocation17], %s3497_s4 }
 0x131   : > { %s5384_s27 = scalar_lea.hbm %s6116_s11, %s3657_s23  ;;  %s692_s26 = sshll.u32 %s684_s15, 4  ;;  %s693_s26 = int_to_ptr.vmem [resolvable:$true] %s692_s26 }
 0x132   : > { %s4645_s30 = scalar_lea.hbm %s5384_s27, 64  ;;  %s4650_s20 = scalar_lea.hbm %s6116_s11, 128 }
 0x133   : > { %p4646_p4 = scmp.ne.s32.totalorder %s5384_s27, %s4645_s30  ;;  %p4651_p0 = scmp.lt.u32.totalorder %s5384_s27, %s6116_s11 }
 0x134   : > { %p4652_p1 = scmp.lt.u32.totalorder %s4650_s20, %s4645_s30  ;;  %p4654_p7 = scmp.lt.u32.totalorder %s4645_s30, %s5384_s27 }
 0x135   : > { %p4648_p11 = pnand %p4646_p4, %p5133_p9 }
 0x136   : > { %p4653_p13 = por %p4652_p1, %p4651_p0 }
 0x137   : > { %p4649_p3 = pneg %p4648_p11 }
 0x138   : > { %p4655_p2 = por %p4654_p7, %p4653_p13 }
 0x13a   : > { %p4656_p5 = pnand %p4655_p2, %p4649_p3 }
 0x13c   : > { %4659 = shalt.err (!%p4656_p5)
}
 0x13d   : > { %s4660_s4 = scalar_lea.vmem %s693_s26, 64  ;;  %s4919_s13 = smov [#allocation17]  }
 0x13e   : > { %p4661_p6 = scmp.ne.s32.totalorder %s693_s26, %s4660_s4  ;;  %s4665_s29 = sshll.u32 %s4919_s13, 4  ;;  %s4666_s29 = int_to_ptr.vmem [resolvable:$false] %s4665_s29 }
 0x13f   : > { %s4667_s15 = scalar_lea.vmem %s4666_s29, 128  ;;  %p4668_p4 = scmp.lt.s32.totalorder %s693_s26, %s4666_s29 }
 0x140   : > { %p4663_p12 = pnand %p4661_p6, %p5133_p9  ;;  %p4669_p11 = scmp.lt.s32.totalorder %s4667_s15, %s4660_s4 }
 0x142   : > { %p4664_p8 = pneg %p4663_p12  ;;  %p4670_p10 = por %p4669_p11, %p4668_p4 }
 0x144   : > { %p4671_p0 = pnand %p4670_p10, %p4664_p8 }
 0x146   : > { %4674 = shalt.err (!%p4671_p0)
}
 0x147   : > { %p6197_p1 = scmp.ne.s32.totalorder %s6182_s28, 0  ;;  %s4920_s30 = smov [#allocation6]  }
 0x148   : > { %s477_s17 = sshll.u32 %s4920_s30, 4  ;;  %s5411_s22 = scalar_lea.hbm %s6117_s12, %s3656_s16  ;;  %s478_s17 = int_to_ptr.vmem [resolvable:$true] %s477_s17 }
 0x149   : > { %3972 = dma.hbm_to_vmem [thread:$0]  (!%p6197_p1), %s5384_s27, 64, %s693_s26, %s5127_s14  }
 0x14a   : > { %s6198_s13 = sld [smem:[#allocation39_spill]]  ;;  %p6199_p3 = scmp.ne.s32.totalorder %s6184_s25, 0 }
 0x150   : > { %s4675_s29 = scalar_lea.hbm %s6198_s13, 512 }
 0x151   : > { %p4676_p10 = scmp.ne.s32.totalorder %s6198_s13, %s4675_s29  ;;  %p4682_p2 = scmp.lt.u32.totalorder %s4675_s29, %s6198_s13 }
 0x153   : > { %p4678_p13 = pnand %p4676_p10, %p6199_p3 }
 0x155   : > { %p4679_p7 = pneg %p4678_p13 }
 0x157   : > { %p4684_p5 = pnand %p4682_p2, %p4679_p7 }
 0x159   : > { %4687 = shalt.err (!%p4684_p5)
}
 0x15a   : > { %s4688_s24 = scalar_lea.vmem %s478_s17, 512  ;;  %p4696_p4 = scmp.lt.s32.totalorder %s478_s17, %s478_s17 }
 0x15b   : > { %p4689_p6 = scmp.ne.s32.totalorder %s478_s17, %s4688_s24  ;;  %p4697_p11 = scmp.lt.s32.totalorder %s4688_s24, %s4688_s24 }
 0x15d   : > { %p4691_p12 = pnand %p4689_p6, %p6199_p3  ;;  %p4698_p0 = por %p4697_p11, %p4696_p4 }
 0x15f   : > { %p4692_p8 = pneg %p4691_p12 }
 0x161   : > { %p4699_p1 = pnand %p4698_p0, %p4692_p8 }
 0x163   : > { %4702 = shalt.err (!%p4699_p1)
}
 0x164   : > { %s6200_s1 = sld [smem:[#allocation37_spill]]  ;;  %s6202_s16 = smov 8  }
 0x165   : > { %s6203_s30 = smov 128   ;;  %s703_s23 = scalar_lea.vmem [#allocation18], %s3494_s2 }
 0x166   : > { %s710_s4 = sshll.u32 %s703_s23, 4  ;;  %s4921_s29 = smov [#allocation20]   ;;  %s5436_s4 = int_to_ptr.vmem [resolvable:$true] %s710_s4 }
 0x167   : > { %s5438_s15 = sshll.u32 %s4921_s29, 4  ;;  %s4703_s27 = scalar_lea.hbm %s5411_s22, 4096  ;;  %s492_s15 = int_to_ptr.vmem [resolvable:$true] %s5438_s15 }
 0x168   : > { %p4704_p1 = scmp.ne.s32.totalorder %s5411_s22, %s4703_s27  ;;  %s4708_s0 = scalar_lea.hbm %s6117_s12, 8192 }
 0x169   : > { %p4709_p2 = scmp.lt.u32.totalorder %s5411_s22, %s6117_s12  ;;  %p4710_p5 = scmp.lt.u32.totalorder %s4708_s0, %s4703_s27 }
 0x16a   : > { %p6201_p10 = scmp.ne.s32.totalorder %s6200_s1, 0  ;;  %p4706_p13 = pnand %p4704_p1, %p5133_p9 }
 0x16b   : > { %p4711_p6 = por %p4710_p5, %p4709_p2  ;;  %p4712_p12 = scmp.lt.u32.totalorder %s4703_s27, %s5411_s22 }
 0x16c   : > { %3935 = dma.hbm_to_vmem [thread:$0]  (!%p6201_p10), %s6198_s13, 512, %s478_s17, [#allocation7], %s6203_s30, %s6203_s30, %s6202_s16  }
 0x16d   : > { %p4707_p7 = pneg %p4706_p13  ;;  %p4713_p8 = por %p4712_p12, %p4711_p6 }
 0x16f   : > { %p4714_p4 = pnand %p4713_p8, %p4707_p7 }
 0x171   : > { %4717 = shalt.err (!%p4714_p4)
}
 0x172   : > { %s4718_s2 = scalar_lea.vmem %s5436_s4, 4096  ;;  %s4922_s17 = smov [#allocation18]  }
 0x173   : > { %p4719_p11 = scmp.ne.s32.totalorder %s5436_s4, %s4718_s2  ;;  %s4723_s16 = sshll.u32 %s4922_s17, 4  ;;  %s4724_s16 = int_to_ptr.vmem [resolvable:$false] %s4723_s16 }
 0x174   : > { %s4725_s3 = scalar_lea.vmem %s4724_s16, 8192  ;;  %p4726_p13 = scmp.lt.s32.totalorder %s5436_s4, %s4724_s16 }
 0x175   : > { %p4721_p0 = pnand %p4719_p11, %p5133_p9  ;;  %p4727_p10 = scmp.lt.s32.totalorder %s4725_s3, %s4718_s2 }
 0x177   : > { %p4722_p1 = pneg %p4721_p0  ;;  %p4728_p2 = por %p4727_p10, %p4726_p13 }
 0x179   : > { %p4729_p5 = pnand %p4728_p2, %p4722_p1 }
 0x17b   : > { %4732 = shalt.err (!%p4729_p5)
}
 0x17c   : > { %p6204_p7 = scmp.ne.s32.totalorder %s6182_s28, 0  ;;  %s6205_s30 = smov 4  }
 0x17d   : > { %s6206_s23 = smov 64   ;;  %s6207_s26 = sld [smem:[#allocation46_spill]] }
 0x17e   : > { %3975 = dma.hbm_to_vmem [thread:$0]  (!%p6204_p7), %s5411_s22, 4096, %s5436_s4, %s5127_s14, %s6206_s23, %s6206_s23, %s6205_s30  }
 0x183   : > { %s4733_s24 = scalar_lea.hbm %s6207_s26, 16 }
 0x184   : > { %p4734_p10 = scmp.ne.s32.totalorder %s6207_s26, %s4733_s24  ;;  %p4740_p8 = scmp.lt.u32.totalorder %s4733_s24, %s6207_s26 }
 0x186   : > { %p4736_p6 = pnand %p4734_p10, %p6199_p3 }
 0x188   : > { %p4737_p12 = pneg %p4736_p6 }
 0x18a   : > { %p4742_p4 = pnand %p4740_p8, %p4737_p12 }
 0x18c   : > { %4745 = shalt.err (!%p4742_p4)
}
 0x18d   : > { %s4746_s16 = scalar_lea.vmem %s492_s15, 16  ;;  %s4753_s22 = scalar_lea.vmem %s492_s15, 32 }
 0x18e   : > { %p4747_p11 = scmp.ne.s32.totalorder %s492_s15, %s4746_s16  ;;  %p4754_p13 = scmp.lt.s32.totalorder %s492_s15, %s492_s15 }
 0x18f   : > { %p4755_p2 = scmp.lt.s32.totalorder %s4753_s22, %s4746_s16 }
 0x190   : > { %p4749_p0 = pnand %p4747_p11, %p6199_p3 }
 0x191   : > { %p4756_p5 = por %p4755_p2, %p4754_p13 }
 0x192   : > { %p4750_p1 = pneg %p4749_p0 }
 0x194   : > { %p4757_p7 = pnand %p4756_p5, %p4750_p1 }
 0x196   : > { %4760 = shalt.err (!%p4757_p7)
}
 0x197   : > { %p6208_p10 = scmp.ne.s32.totalorder %s6200_s1, 0  ;;  %s4923_s30 = smov [#allocation21]  }
 0x198   : > { %s502_s23 = sshll.u32 %s4923_s30, 4  ;;  %s6209_s24 = sld [smem:[#allocation45_spill]]  ;;  %s503_s23 = int_to_ptr.vmem [resolvable:$true] %s502_s23 }
 0x199   : > { %3938 = dma.hbm_to_vmem [thread:$0]  (!%p6208_p10), %s6207_s26, 16, %s492_s15, [#allocation7]  }
 0x19a   : > { %s6211_s16 = sld [smem:[#allocation47_spill]] }
 0x19e   : > { %s6210_s0 = smov %s6209_s24  ;;  %s5488_s20 = scalar_lea.hbm %s6209_s24, %s5116_s18 }
 0x1a0   : > { %s4761_s22 = scalar_lea.hbm %s6211_s16, 16 }
 0x1a1   : > { %p4762_p7 = scmp.ne.s32.totalorder %s6211_s16, %s4761_s22  ;;  %p4768_p8 = scmp.lt.u32.totalorder %s4761_s22, %s6211_s16 }
 0x1a3   : > { %p4764_p6 = pnand %p4762_p7, %p6199_p3 }
 0x1a5   : > { %p4765_p12 = pneg %p4764_p6 }
 0x1a7   : > { %p4770_p4 = pnand %p4768_p8, %p4765_p12 }
 0x1a9   : > { %4773 = shalt.err (!%p4770_p4)
}
 0x1aa   : > { %s4774_s3 = scalar_lea.vmem %s503_s23, 16  ;;  %s4781_s18 = scalar_lea.vmem %s503_s23, 32 }
 0x1ab   : > { %p4775_p11 = scmp.ne.s32.totalorder %s503_s23, %s4774_s3  ;;  %p4782_p13 = scmp.lt.s32.totalorder %s503_s23, %s503_s23 }
 0x1ac   : > { %p4783_p2 = scmp.lt.s32.totalorder %s4781_s18, %s4774_s3 }
 0x1ad   : > { %p4777_p0 = pnand %p4775_p11, %p6199_p3 }
 0x1ae   : > { %p4784_p5 = por %p4783_p2, %p4782_p13 }
 0x1af   : > { %p4778_p1 = pneg %p4777_p0 }
 0x1b1   : > { %p4785_p9 = pnand %p4784_p5, %p4778_p1 }
 0x1b3   : > { %4788 = shalt.err (!%p4785_p9)
}
 0x1b4   : > { %3941 = dma.hbm_to_vmem [thread:$0]  (!%p6208_p10), %s6211_s16, 16, %s503_s23, [#allocation22]  }
 0x1b5   : > { %s723_s25 = scalar_lea.vmem [#allocation19], %s5079_s21  ;;  %s4789_s29 = scalar_lea.hbm %s5488_s20, 16 }
 0x1b6   : > { %s730_s30 = sshll.u32 %s723_s25, 4  ;;  %p4790_p3 = scmp.ne.s32.totalorder %s5488_s20, %s4789_s29  ;;  %s731_s30 = int_to_ptr.vmem [resolvable:$true] %s730_s30 }
 0x1b7   : > { %p6212_p7 = scmp.ne.s32.totalorder %s6187_s19, 0  ;;  %s4794_s24 = scalar_lea.hbm %s6210_s0, 32 }
 0x1b8   : > { %p4795_p12 = scmp.lt.u32.totalorder %s5488_s20, %s6210_s0  ;;  %p4796_p8 = scmp.lt.u32.totalorder %s4794_s24, %s4789_s29 }
 0x1b9   : > { %p4792_p6 = pnand %p4790_p3, %p6212_p7  ;;  %p4798_p11 = scmp.lt.u32.totalorder %s4789_s29, %s5488_s20 }
 0x1ba   : > { %p4797_p4 = por %p4796_p8, %p4795_p12 }
 0x1bb   : > { %p4793_p9 = pneg %p4792_p6 }
 0x1bc   : > { %p4799_p10 = por %p4798_p11, %p4797_p4 }
 0x1be   : > { %p4800_p0 = pnand %p4799_p10, %p4793_p9 }
 0x1c0   : > { %4803 = shalt.err (!%p4800_p0)
}
 0x1c1   : > { %s4804_s21 = scalar_lea.vmem %s731_s30, 16  ;;  %s4924_s23 = smov [#allocation19]  }
 0x1c2   : > { %p4805_p1 = scmp.ne.s32.totalorder %s731_s30, %s4804_s21  ;;  %s4809_s22 = sshll.u32 %s4924_s23, 4  ;;  %s4810_s22 = int_to_ptr.vmem [resolvable:$false] %s4809_s22 }
 0x1c3   : > { %s4811_s15 = scalar_lea.vmem %s4810_s22, 32  ;;  %p4812_p5 = scmp.lt.s32.totalorder %s731_s30, %s4810_s22 }
 0x1c4   : > { %p4807_p13 = pnand %p4805_p1, %p6212_p7  ;;  %p4813_p3 = scmp.lt.s32.totalorder %s4811_s15, %s4804_s21 }
 0x1c6   : > { %p4808_p2 = pneg %p4807_p13  ;;  %p4814_p6 = por %p4813_p3, %p4812_p5 }
 0x1c8   : > { %p4815_p8 = pnand %p4814_p6, %p4808_p2 }
 0x1ca   : > { %4818 = shalt.err (!%p4815_p8)
}
 0x1cb   : > { %p6213_p12 = scmp.ne.s32.totalorder %s6182_s28, 0  ;;  %s6214_s4 = sld [smem:[#allocation36_spill]] }
 0x1cd   : > { %3978 = dma.hbm_to_vmem [thread:$0]  (!%p6213_p12), %s5488_s20, 16, %s731_s30, %s5127_s14  }
 0x1d1   : > { %p6215_p9 = scmp.ne.s32.totalorder %s6214_s4, 0 }
 0x1d2   : > { %s6216_s19 = sld [smem:[#allocation32_spill]] (!%p6215_p9) }
 0x1d3   : > { %739 = sbr.rel (%p6215_p9) target bundleno = 4463 (0x116f), region = 84 }
 0x1d8   : > { %p6217_p7 = scmp.eq.s32.totalorder (!%p6215_p9), %s6216_s19, 0 }
 0x1da   : > { %4862 = dma.done.wait (%p6217_p7), [#allocation4], 512   ;;  %p6218_p4 = pmov %p6217_p7 }
 0x1dc   : > { %4864 = vsyncadd (%p6218_p4), [#allocation4], 4294966784  ;;  %p6219_p11 = pmov %p6218_p4 }
 0x1dd   : > { %p6220_p10 = pmov %p6218_p4 }
 0x1de   : > { %4866 = dma.done.wait (%p6219_p11), [#allocation7], 512  }
 0x1df   : > { %4868 = vsyncadd (%p6220_p10), [#allocation7], 4294966784  ;;  %s6221_s28 = sld [smem:[#allocation30_spill]]  ;;  %s6222_s3 = sld [smem:[#allocation35_spill]] }
 0x1e0   : > { %s749_s18 = sand.u32 1, %s6216_s19  }
 0x1e1   : > { %s750_s20 = scalar_lea.sflag [#allocation4], %s749_s18 }
 0x1e5   : > { %s5539_s14 = sand.u32 1, %s6221_s28   ;;  %p6223_p0 = scmp.ne.s32.totalorder %s6222_s3, 0 }
 0x1e6   : > { %s752_s5 = scalar_lea.vmem [#allocation8], %s5539_s14 }
 0x1e7   : > { %4870 = dma.done.wait (%p6223_p0), %s750_s20, 12496  }
 0x1e8   : > { %4872 = vsyncadd (%p6223_p0), %s750_s20, 4294954800  ;;  %s3883_s6 = smul.u32 192, %s5539_s14  ;;  %s3507_s30 = sshll.u32 %s5539_s14, 6 }
 0x1e9   : > { %s3884_s25 = smul.u32 3, %s5539_s14  ;;  %s3508_s29 = sshll.u32 %s5539_s14, 8 }
 0x1ea   : > { %s3509_s27 = sshll.u32 %s5539_s14, 2  ;;  %s760_s1 = scalar_lea.vmem [#allocation9], %s5539_s14 }
 0x1eb   : > { %s5552_s24 = scalar_lea.vmem [#allocation10], %s3883_s6  ;;  %s5554_s2 = scalar_lea.vmem [#allocation11], %s3884_s25 }
 0x1ec   : > { %s5556_s17 = scalar_lea.vmem [#allocation12], %s3507_s30  ;;  %s795_s21 = scalar_lea.vmem [#allocation13], %s5539_s14 }
 0x1ed   : > { %s803_s23 = scalar_lea.vmem [#allocation14], %s5539_s14  ;;  %s811_s22 = scalar_lea.vmem [#allocation15], %s5539_s14 }
 0x1ee   : > { %s5561_s15 = scalar_lea.vmem [#allocation16], %s3508_s29  ;;  %s5563_s4 = scalar_lea.vmem [#allocation17], %s3509_s27 }
 0x1ef   : > { %s5565_s28 = scalar_lea.vmem [#allocation18], %s3508_s29  ;;  %s846_s3 = scalar_lea.vmem [#allocation19], %s5539_s14 }
 0x1f0   : > { %p6224_p1 = pmov %p6218_p4 }
 0x1f2   : > { %4874 = dma.done.wait (%p6224_p1), [#allocation7], 16   ;;  %p6225_p13 = pmov %p6224_p1 }
 0x1f3   : > { %p6226_p2 = pmov %p6224_p1 }
 0x1f4   : > { %4876 = vsyncadd (%p6225_p13), [#allocation7], 4294967280 }
 0x1f5   : > { %4878 = dma.done.wait (%p6226_p2), [#allocation22], 16   ;;  %p6227_p5 = pmov %p6224_p1 }
 0x1f6   : > { %p6228_p3 = scmp.ne.s32.totalorder %s6216_s19, 0 }
 0x1f7   : > { %4880 = vsyncadd (%p6227_p5), [#allocation22], 4294967280  ;;  %v952_v0 = vld [vmem:[#allocation3] sm:$0xff] (!%p6228_p3)  ;;  %v953_v1 = vld [vmem:[#allocation3 + $0x8] sm:$0xff] (!%p6228_p3) }
 0x1f8   : > { %951 = sbr.rel (%p6228_p3) target bundleno = 511 (0x1ff), region = 152  ;;  %v954_v2 = vld [vmem:[#allocation3 + $0x10] sm:$0xff] (!%p6228_p3)  ;;  %956 = vst [vmem:[#allocation2] sm:$0xff] (!%p6228_p3), %v952_v0  ;;  %957 = vst [vmem:[#allocation2 + $0x8] sm:$0xff] (!%p6228_p3), %v953_v1  ;;  %v955_v3 = vld [vmem:[#allocation3 + $0x18] sm:$0xff] (!%p6228_p3) }
 0x1f9   : > { %958 = vst [vmem:[#allocation2 + $0x10] sm:$0xff] (!%p6228_p3), %v954_v2  ;;  %959 = vst [vmem:[#allocation2 + $0x18] sm:$0xff] (!%p6228_p3), %v955_v3 }
 0x1ff PF: > { %v960_v4 = vld [vmem:[#allocation2] sm:$0xff]  ;;  %v961_v6 = vld [vmem:[#allocation2 + $0x8] sm:$0xff]  ;;  %v4082_v32 = vld [vmem:[%s5552_s24 + $0x4c] ss:$12 sps:$4 sm:$0xff]   ;;  %v4925_v43 = vmov 0   ;;  %vm1322_vm0 = vcmask 261120  }
 0x200   : > { %v962_v5 = vld [vmem:[#allocation2 + $0x10] sm:$0xff]  ;;  %966 = vadd.xlane.f32.xlu0 %v960_v4  ;;  %v963_v7 = vld [vmem:[#allocation2 + $0x18] sm:$0xff]  ;;  %v4074_v10 = vld [vmem:[%s5552_s24 + $0x1c] ss:$12 sps:$4 sm:$0xff]   ;;  %1242 = vmatprep.mubr.bf16.mxu0 %v4925_v43  ;;  %s4926_s19 = smov 96   ;;  %s4927_s18 = smov 64  }
 0x201   : > { %970 = vadd.xlane.f32.xlu1 %v962_v5  ;;  %v4071_v8 = vld [vmem:[%s5552_s24 + $0x4] ss:$12 sps:$4 sm:$0xff]   ;;  %v4073_v9 = vld [vmem:[%s5552_s24] ss:$12 sps:$4 sm:$0xff]   ;;  %v4076_v11 = vld [vmem:[%s5552_s24 + $0x8] ss:$12 sps:$4 sm:$0xff]  }
 0x202   : > { %1210 = vmatprep.subr.bf16.mxu0 %v4071_v8  ;;  %3767 = vmatprep.subr.bf16.mxu1 %v4076_v11  ;;  %v4077_v28 = vld [vmem:[%s5552_s24 + $0x18] ss:$12 sps:$4 sm:$0xff]   ;;  %v4078_v29 = vld [vmem:[%s5552_s24 + $0x34] ss:$12 sps:$4 sm:$0xff]   ;;  %v4081_v31 = vld [vmem:[%s5552_s24 + $0x30] ss:$12 sps:$4 sm:$0xff]  }
 0x203   : > { %1211 = vmatpush1.bf16.msra.mxu0 %v4073_v9  ;;  %3768 = vmatpush3.bf16.msra.mxu1 %v4076_v11  ;;  %v4080_v30 = vld [vmem:[%s5552_s24 + $0x20] ss:$12 sps:$4 sm:$0xff]   ;;  %v4084_v33 = vld [vmem:[%s5552_s24 + $0x38] ss:$12 sps:$4 sm:$0xff]   ;;  %v4085_v34 = vld [vmem:[%s5552_s24 + $0x48] ss:$12 sps:$4 sm:$0xff]  }
 0x204   : > { %968 = vadd.xlane.f32.xlu0 %v961_v6  ;;  %1212 = vmatprep.subr.bf16.mxu0 %v4074_v10  ;;  %v4086_v35 = vld [vmem:[%s5552_s24 + $0x64] ss:$12 sps:$4 sm:$0xff]   ;;  %v4089_v37 = vld [vmem:[%s5552_s24 + $0x60] ss:$12 sps:$4 sm:$0xff]   ;;  %v4090_v38 = vld [vmem:[%s5552_s24 + $0x7c] ss:$12 sps:$4 sm:$0xff]  }
 0x205   : > { %972 = vadd.xlane.f32.xlu1 %v963_v7  ;;  %3769 = vmatprep.subr.bf16.mxu1 %v4080_v30  ;;  %v4088_v36 = vld [vmem:[%s5552_s24 + $0x50] ss:$12 sps:$4 sm:$0xff]   ;;  %v4092_v39 = vld [vmem:[%s5552_s24 + $0x68] ss:$12 sps:$4 sm:$0xff]   ;;  %v4093_v40 = vld [vmem:[%s5552_s24 + $0x78] ss:$12 sps:$4 sm:$0xff]  }
 0x206   : > { %v4094_v41 = vld [vmem:[%s5552_s24 + $0x94] ss:$12 sps:$4 sm:$0xff]   ;;  %v4097_v44 = vld [vmem:[%s5552_s24 + $0x90] ss:$12 sps:$4 sm:$0xff]   ;;  %v4098_v45 = vld [vmem:[%s5552_s24 + $0xac] ss:$12 sps:$4 sm:$0xff]  }
 0x207   : > { %1213 = vmatpush1.bf16.msra.mxu0 %v4077_v28  ;;  %3770 = vmatpush3.bf16.msra.mxu1 %v4080_v30  ;;  %v4096_v42 = vld [vmem:[%s5552_s24 + $0x80] ss:$12 sps:$4 sm:$0xff]   ;;  %v4100_v46 = vld [vmem:[%s5552_s24 + $0x98] ss:$12 sps:$4 sm:$0xff]   ;;  %v4101_v47 = vld [vmem:[%s5552_s24 + $0xa8] ss:$12 sps:$4 sm:$0xff]  }
 0x208   : > { %1214 = vmatprep.subr.bf16.mxu0 %v4078_v29  ;;  %3771 = vmatprep.subr.bf16.mxu1 %v4084_v33  ;;  %v4102_v48 = vld [vmem:[%s5552_s24 + $0xb0] ss:$12 sps:$4 sm:$0xff]   ;;  %s4928_s20 = smov 32   ;;  %vm2071_vm1 = vcmask 523264   ;;  %vm2076_vm2 = vcmask 785408   ;;  %s6229_s14 = sld [smem:[#allocation32_spill]] }
 0x209   : > { %v3514_v63 = vld [vmem:[%s752_s5] ss:$0 sm:$0xff] }
 0x20b   : > { %1215 = vmatpush1.bf16.msra.mxu0 %v4081_v31  ;;  %3772 = vmatpush3.bf16.msra.mxu1 %v4084_v33 }
 0x20c   : > { %1216 = vmatprep.subr.bf16.mxu0 %v4082_v32  ;;  %3773 = vmatprep.subr.bf16.mxu1 %v4088_v36 }
 0x20e   : > { %p3648_p6 = scmp.ne.s32.totalorder %s6229_s14, 1 }
 0x20f   : > { %1217 = vmatpush1.bf16.msra.mxu0 %v4085_v34  ;;  %3774 = vmatpush3.bf16.msra.mxu1 %v4088_v36 }
 0x210   : > { %1218 = vmatprep.subr.bf16.mxu0 %v4086_v35  ;;  %3775 = vmatprep.subr.bf16.mxu1 %v4092_v39 }
 0x213   : > { %1219 = vmatpush1.bf16.msra.mxu0 %v4089_v37  ;;  %3776 = vmatpush3.bf16.msra.mxu1 %v4092_v39 }
 0x214   : > { %1220 = vmatprep.subr.bf16.mxu0 %v4090_v38  ;;  %3777 = vmatprep.subr.bf16.mxu1 %v4096_v42 }
 0x217   : > { %1221 = vmatpush1.bf16.msra.mxu0 %v4093_v40  ;;  %3778 = vmatpush3.bf16.msra.mxu1 %v4096_v42 }
 0x218   : > { %1222 = vmatprep.subr.bf16.mxu0 %v4094_v41  ;;  %3779 = vmatprep.subr.bf16.mxu1 %v4100_v46 }
 0x21b   : > { %1223 = vmatpush1.bf16.msra.mxu0 %v4097_v44  ;;  %3780 = vmatpush3.bf16.msra.mxu1 %v4100_v46 }
 0x21c   : > { %1224 = vmatprep.subr.bf16.mxu0 %v4098_v45  ;;  %3781 = vmatprep.subr.bf16.mxu1 %v4102_v48 }
 0x21f   : > { %1225 = vmatpush1.bf16.msra.mxu0 %v4101_v47  ;;  %3782 = vmatpush3.bf16.msra.mxu1 %v4102_v48 }
 0x28d   : > { %v967_v12 = vpop.xlane.xlu0 %966 }
 0x28e   : > { %v971_v13 = vpop.xlane.xlu1 %970  ;;  %v975_v14 = vmul.f32 0.0078125, %v967_v12 }
 0x28f   : > { %v977_v15 = vmul.f32 0.0078125, %v971_v13 }
 0x290   : > { %v5582_v16 = vsub.f32 %v960_v4, %v975_v14  ;;  %v3515_v4 = vld [vmem:[%s760_s1] ss:$0 sm:$0xff] }
 0x291   : > { %v5584_v17 = vsub.f32 %v962_v5, %v977_v15  ;;  %v969_v18 = vpop.xlane.xlu0 %968 }
 0x292   : > { %v973_v19 = vpop.xlane.xlu1 %972  ;;  %v976_v20 = vmul.f32 0.0078125, %v969_v18  ;;  %v983_v21 = vmul.f32 %v5582_v16, %v5582_v16 }
 0x293   : > { %v978_v22 = vmul.f32 0.0078125, %v973_v19  ;;  %v985_v25 = vmul.f32 %v5584_v17, %v5584_v17 }
 0x294   : > { %v5588_v23 = vsub.f32 %v961_v6, %v976_v20  ;;  %987 = vadd.xlane.f32.xlu0 %v983_v21  ;;  %v1065_v20 = vld [vmem:[%s5554_s2] sm:$0x7] }
 0x295   : > { %v5590_v24 = vsub.f32 %v963_v7, %v978_v22 }
 0x296   : > { %v984_v26 = vmul.f32 %v5588_v23, %v5588_v23 }
 0x297   : > { %v986_v27 = vmul.f32 %v5590_v24, %v5590_v24 }
 0x298   : > { %991 = vadd.xlane.f32.xlu0 %v985_v25  ;;  %989 = vadd.xlane.f32.xlu1 %v984_v26 }
 0x29c   : > { %993 = vadd.xlane.f32.xlu1 %v986_v27 }
 0x321   : > { %v988_v49 = vpop.xlane.xlu0 %987 }
 0x322   : > { %v995_v50 = vmul.f32 0.0078125, %v988_v49 }
 0x324   : > { %v999_v51 = vadd.f32 1e-05, %v995_v50 }
 0x325   : > { %v990_v52 = vpop.xlane.xlu1 %989  ;;  %v992_v53 = vpop.xlane.xlu0 %991 }
 0x326   : > { %4191 = vrsqrt.f32 %v999_v51  ;;  %v996_v54 = vmul.f32 0.0078125, %v990_v52  ;;  %v997_v55 = vmul.f32 0.0078125, %v992_v53 }
 0x328   : > { %v1000_v56 = vadd.f32 1e-05, %v996_v54  ;;  %v1001_v57 = vadd.f32 1e-05, %v997_v55 }
 0x329   : > { %v994_v58 = vpop.xlane.xlu1 %993 }
 0x32a   : > { %4193 = vrsqrt.f32 %v1000_v56  ;;  %v998_v59 = vmul.f32 0.0078125, %v994_v58 }
 0x32b   : > { %4195 = vrsqrt.f32 %v1001_v57 }
 0x32c   : > { %v1002_v60 = vadd.f32 1e-05, %v998_v59  ;;  %v5668_v59 = vld [vmem:[#allocation6] sm:$0xff] }
 0x32e   : > { %4197 = vrsqrt.f32 %v1002_v60 }
 0x330   : > { %v4192_v61 = vpop.eup %4191 }
 0x331   : > { %v1007_v62 = vmul.f32 %v4192_v61, %v5582_v16  ;;  %v5670_v61 = vld [vmem:[#allocation6 + $0x10] sm:$0xff] }
 0x333   : > { %v1017_v3 = vmul.f32 %v3514_v63, %v1007_v62 }
 0x334   : > { %v4194_v0 = vpop.eup %4193 }
 0x335   : > { %v4196_v1 = vpop.eup %4195  ;;  %v1008_v2 = vmul.f32 %v4194_v0, %v5588_v23  ;;  %v1027_v8 = vadd.f32 %v3515_v4, %v1017_v3 }
 0x336   : > { %v1009_v5 = vmul.f32 %v4196_v1, %v5584_v17  ;;  %v1067_v17 = vlaneseq }
 0x337   : > { %v1018_v6 = vmul.f32 %v3514_v63, %v1008_v2  ;;  %v5675_v2 = vld [vmem:[#allocation6 + $0x18] sm:$0xff] }
 0x338   : > { %v4198_v7 = vpop.eup %4197  ;;  %v1019_v11 = vmul.f32 %v3514_v63, %v1009_v5  ;;  %v5628_v18 = vshrl.u32 %v1067_v17, 7 }
 0x339   : > { %v1028_v9 = vadd.f32 %v3515_v4, %v1018_v6  ;;  %v1010_v10 = vmul.f32 %v4198_v7, %v5590_v24 }
 0x33a   : > { %v1029_v14 = vadd.f32 %v3515_v4, %v1019_v11  ;;  %v1069_v19 = vsub.s32 0, %v5628_v18  ;;  %v1073_v21 = vsub.s32 1, %v5628_v18  ;;  %v1077_v23 = vsub.s32 2, %v5628_v18 }
 0x33b   : > { %v1031_v12 = vpack.c.bf16 %v1028_v9, %v1027_v8  ;;  %v1020_v13 = vmul.f32 %v3514_v63, %v1010_v10  ;;  %v5672_v63 = vld [vmem:[#allocation6 + $0x8] sm:$0xff] }
 0x33c   : > { %v1070_v22 = vrot.slane %v1065_v20, %v1069_v19  ;;  %v1074_v25 = vrot.slane %v1065_v20, %v1073_v21  ;;  %v1078_v31 = vrot.slane %v1065_v20, %v1077_v23 }
 0x33d   : > { %1243 = vmatmul.mubr.bf16.vlgmr.msra.gmra.mrb[0].mxu0 %v1031_v12  ;;  %3783 = vmatprep.mubr.bf16.mxu1 %v1031_v12  ;;  %v1030_v15 = vadd.f32 %v3515_v4, %v1020_v13 }
 0x33e   : > { %1252 = vmatprep.mubr.bf16.mxu0 %v4925_v43 }
 0x33f   : > { %v1032_v16 = vpack.c.bf16 %v1030_v15, %v1029_v14 }
 0x341   : > { %3784 = vmatmul.mubr.bf16.vlgmr.msra.gmra.mrb[0].mxu1 %v1032_v16 }
 0x345   : > { %1253 = vmatmul.mubr.bf16.gmra.mrb[4].mxu0 %v1032_v16 }
 0x410   : > { %v1244_v24 = vpop.f32.mrb[0].mxu0 }
 0x411   : > { %v1246_v26 = vpop.f32.mrb[1].mxu0  ;;  %v1245_v28 = vadd.f32 %v1244_v24, %v1070_v22 }
 0x412   : > { %v1248_v27 = vpop.f32.mrb[2].mxu0  ;;  %v1247_v32 = vadd.f32 %v1246_v26, %v1074_v25 }
 0x413   : > { %v1249_v29 = vadd.f32 %v1248_v27, %v1070_v22  ;;  %v1250_v30 = vpop.f32.mrb[3].mxu0 }
 0x414   : > { %v1251_v33 = vadd.f32 %v1250_v30, %v1074_v25  ;;  %v3785_v34 = vpop.f32.mrb[0].mxu1 }
 0x415   : > { %v5640_v35 = vpack.c.bf16 %v1249_v29, %v1245_v28  ;;  %v1297_v36 = vpop.f32.mrb[1].mxu1  ;;  %v1306_v39 = vadd.f32 %v3785_v34, %v1078_v31 }
 0x416   : > { %v5642_v37 = vpack.c.bf16 %v1251_v33, %v1247_v32  ;;  %v3786_v38 = vpop.f32.mrb[2].mxu1  ;;  %v1298_v42 = vadd.f32 %v1297_v36, %v1078_v31 }
 0x417   : > { %v1309_v40 = vadd.f32 %v3786_v38, %v1078_v31  ;;  %v1300_v41 = vpop.f32.mrb[3].mxu1  ;;  %3791 = vmatprep.mubr.msk.bf16.mxu0 %vm1322_vm0, %v5640_v35 }
 0x418   : > { %v1301_v44 = vadd.f32 %v1300_v41, %v1078_v31  ;;  %v1254_v45 = vpop.f32.mrb[4].mxu0  ;;  %3871 = vmatprep.subr.msk.bf16.mxu0 %vm1322_vm0, %v5642_v37  ;;  %v1330_v46 = vsel %vm1322_vm0, %v5642_v37, 0 }
 0x419   : > { %v5650_v47 = vpack.c.bf16 %v1309_v40, %v1306_v39  ;;  %v1256_v48 = vpop.f32.mrb[5].mxu0  ;;  %3788 = vmatpush3.bf16.xpose.msra.mxu0 %v1330_v46  ;;  %v1255_v51 = vadd.f32 %v1254_v45, %v1070_v22 }
 0x41a   : > { %v5652_v49 = vpack.c.bf16 %v1301_v44, %v1298_v42  ;;  %v1258_v50 = vpop.f32.mrb[6].mxu0  ;;  %v1257_v54 = vadd.f32 %v1256_v48, %v1074_v25 }
 0x41b   : > { %v1259_v52 = vadd.f32 %v1258_v50, %v1070_v22  ;;  %v1260_v53 = vpop.f32.mrb[7].mxu0 }
 0x41c   : > { %v1261_v55 = vadd.f32 %v1260_v53, %v1074_v25  ;;  %3795 = vmatprep.subr.bf16.mxu1 %v5652_v49 }
 0x41d   : > { %v5655_v56 = vpack.c.bf16 %v1259_v52, %v1255_v51  ;;  %3796 = vmatpush3.bf16.msra.mxu1 %v5652_v49 }
 0x41e   : > { %v5658_v57 = vpack.c.bf16 %v1261_v55, %v1257_v54  ;;  %3797 = vmatprep.subr.bf16.mxu1 %v5650_v47 }
 0x420   : > { %3872 = vmatprep.subr.msk.bf16.mxu0 %vm1322_vm0, %v5658_v57  ;;  %v1333_v58 = vsel %vm1322_vm0, %v5658_v57, 0 }
 0x421   : > { %3790 = vmatpush3.bf16.xpose.msra.mxu0 %v1333_v58  ;;  %3798 = vmatpush3.bf16.msra.mxu1 %v5650_v47 }
 0x428   : > { %3792 = vmatmul.mubr.msk.bf16.vlgmr.msra.gmra.mrb[8].mxu0 %vm1322_vm0, %v5655_v56 }
 0x4fb   : > { %v3793_v60 = vpop.f32.mrb[8].mxu0 }
 0x4fc   : > { %v1369_v62 = vpop.f32.mrb[9].mxu0  ;;  %v1378_v4 = vadd.f32 %v3793_v60, %v5670_v61 }
 0x4fd   : > { %v1370_v0 = vadd.f32 %v1369_v62, %v5668_v59  ;;  %v3794_v1 = vpop.f32.mrb[10].mxu0 }
 0x4fe   : > { %v1372_v3 = vpop.f32.mrb[11].mxu0  ;;  %v1381_v7 = vadd.f32 %v3794_v1, %v5675_v2  ;;  %v1390_v9 = vsel %vm1322_vm0, %v1378_v4, -inf }
 0x4ff   : > { %v1373_v5 = vadd.f32 %v1372_v3, %v5672_v63  ;;  %v1384_v6 = vsel %vm1322_vm0, %v1370_v0, -inf }
 0x500   : > { %1385 = vmax.xlane.f32.xlu0 %v1384_v6  ;;  %v1393_v10 = vsel %vm1322_vm0, %v1381_v7, -inf }
 0x501   : > { %v1387_v8 = vsel %vm1322_vm0, %v1373_v5, -inf }
 0x502   : > { %1388 = vmax.xlane.f32.xlu1 %v1387_v8 }
 0x504   : > { %1391 = vmax.xlane.f32.xlu0 %v1390_v9 }
 0x506   : > { %1394 = vmax.xlane.f32.xlu1 %v1393_v10 }
 0x58d   : > { %v1386_v11 = vpop.xlane.xlu0 %1385 }
 0x58e   : > { %v1396_v12 = vsub.f32 %v1370_v0, %v1386_v11 }
 0x58f   : > { %v1389_v13 = vpop.xlane.xlu1 %1388 }
 0x590   : > { %v1397_v14 = vsub.f32 %v1373_v5, %v1389_v13  ;;  %v1400_v20 = vmul.f32 1.442695, %v1396_v12 }
 0x591   : > { %v1392_v15 = vpop.xlane.xlu0 %1391 }
 0x592   : > { %v1402_v16 = vmul.f32 1.442695, %v1397_v14  ;;  %v1398_v17 = vsub.f32 %v1378_v4, %v1392_v15 }
 0x593   : > { %v1395_v22 = vpop.xlane.xlu1 %1394 }
 0x594   : > { %4199 = vpow2.f32 %v1402_v16  ;;  %v1404_v24 = vmul.f32 1.442695, %v1398_v17  ;;  %v1399_v25 = vsub.f32 %v1381_v7, %v1395_v22 }
 0x596   : > { %4201 = vpow2.f32 %v1404_v24  ;;  %v1406_v26 = vmul.f32 1.442695, %v1399_v25 }
 0x597   : > { %4203 = vpow2.f32 %v1400_v20 }
 0x598   : > { %4205 = vpow2.f32 %v1406_v26 }
 0x59e   : > { %v4200_v27 = vpop.eup %4199 }
 0x59f   : > { %v1411_v28 = vsel %vm1322_vm0, %v4200_v27, 0.0 }
 0x5a0   : > { %v4202_v29 = vpop.eup %4201  ;;  %1412 = vadd.xlane.f32.xlu1 %v1411_v28 }
 0x5a1   : > { %v4204_v30 = vpop.eup %4203  ;;  %v1414_v31 = vsel %vm1322_vm0, %v4202_v29, 0.0 }
 0x5a2   : > { %v4206_v32 = vpop.eup %4205  ;;  %1415 = vadd.xlane.f32.xlu0 %v1414_v31  ;;  %v1408_v34 = vsel %vm1322_vm0, %v4204_v30, 0.0 }
 0x5a3   : > { %v1417_v33 = vsel %vm1322_vm0, %v4206_v32, 0.0 }
 0x5a4   : > { %1418 = vadd.xlane.f32.xlu1 %v1417_v33 }
 0x5a6   : > { %1409 = vadd.xlane.f32.xlu0 %v1408_v34 }
 0x5b5   : > { %1495 = vrot.lane.b32.xlu1 %v5658_v57, %s4926_s19 }
 0x5b9   : > { %1487 = vrot.lane.b32.xlu1 %v5640_v35, %s4926_s19 }
 0x5bc   : > { %1493 = vrot.lane.b32.xlu0 %v5642_v37, %s4926_s19 }
 0x5bd   : > { %1671 = vrot.lane.b32.xlu1 %v5642_v37, %s4927_s18 }
 0x5c0   : > { %1489 = vrot.lane.b32.xlu0 %v5655_v56, %s4926_s19 }
 0x5c1   : > { %1673 = vrot.lane.b32.xlu1 %v5658_v57, %s4927_s18 }
 0x5c4   : > { %1667 = vrot.lane.b32.xlu0 %v5640_v35, %s4927_s18 }
 0x5c5   : > { %1669 = vrot.lane.b32.xlu1 %v5655_v56, %s4927_s18 }
 0x62d   : > { %v1413_v36 = vpop.xlane.xlu1 %1412 }
 0x62e   : > { %4207 = vrcp.f32 %v1413_v36 }
 0x62f   : > { %v1416_v38 = vpop.xlane.xlu0 %1415 }
 0x631   : > { %v1419_v39 = vpop.xlane.xlu1 %1418 }
 0x632   : > { %4209 = vrcp.f32 %v1419_v39 }
 0x633   : > { %4211 = vrcp.f32 %v1416_v38  ;;  %v1410_v40 = vpop.xlane.xlu0 %1409 }
 0x634   : > { %4213 = vrcp.f32 %v1410_v40 }
 0x635   : > { %v1496_v50 = vpop.permute.xlu1 %1495 }
 0x636   : > { %v1507_v62 = vsel %vm1322_vm0, %v1496_v50, 0 }
 0x637   : > { %v1494_v41 = vpop.permute.xlu0 %1493 }
 0x638   : > { %3873 = vmatprep.subr.msk.bf16.mxu1 %vm1322_vm0, %v1494_v41  ;;  %v4208_v42 = vpop.eup %4207  ;;  %v1504_v58 = vsel %vm1322_vm0, %v1494_v41, 0 }
 0x639   : > { %v1425_v52 = vmul.f32 %v4208_v42, %v4200_v27  ;;  %v1488_v60 = vpop.permute.xlu1 %1487 }
 0x63b   : > { %v1490_v1 = vpop.permute.xlu0 %1489 }
 0x63c   : > { %v4210_v44 = vpop.eup %4209 }
 0x63d   : > { %v4212_v45 = vpop.eup %4211  ;;  %v1427_v48 = vmul.f32 %v4210_v44, %v4206_v32  ;;  %v1672_v0 = vpop.permute.xlu1 %1671 }
 0x63e   : > { %v4214_v46 = vpop.eup %4213  ;;  %v1426_v53 = vmul.f32 %v4212_v45, %v4202_v29  ;;  %v1682_v3 = vsel %vm1322_vm0, %v1672_v0, 0 }
 0x63f   : > { %v1424_v51 = vmul.f32 %v4214_v46, %v4204_v30  ;;  %v1668_v4 = vpop.permute.xlu0 %1667 }
 0x640   : > { %v1429_v55 = vpack.c.bf16 %v1427_v48, %v1426_v53 }
 0x641   : > { %v1428_v54 = vpack.c.bf16 %v1425_v52, %v1424_v51  ;;  %v1674_v5 = vpop.permute.xlu1 %1673 }
 0x642   : > { %v1685_v6 = vsel %vm1322_vm0, %v1674_v5, 0 }
 0x643   : > { %3799 = vmatprep.mubr.msk.bf16.mxu1 %vm1322_vm0, %v1428_v54 }
 0x644   : > { %3800 = vmatmul.mubr.msk.bf16.vlgmr.msra.gmra.mrb[4].mxu1 %vm1322_vm0, %v1429_v55 }
 0x645   : > { %3804 = vmatpush3.bf16.xpose.msra.mxu1 %v1504_v58  ;;  %3807 = vmatprep.mubr.msk.bf16.mxu1 %vm1322_vm0, %v1488_v60  ;;  %v1670_v7 = vpop.permute.xlu1 %1669 }
 0x646   : > { %3874 = vmatprep.subr.msk.bf16.mxu1 %vm1322_vm0, %v1496_v50 }
 0x64d   : > { %3806 = vmatpush3.bf16.xpose.msra.mxu1 %v1507_v62 }
 0x64e   : > { %3875 = vmatprep.subr.msk.bf16.mxu1 %vm1322_vm0, %v1672_v0 }
 0x654   : > { %3808 = vmatmul.mubr.msk.bf16.vlgmr.msra.gmra.mrb[8].mxu1 %vm1322_vm0, %v1490_v1 }
 0x655   : > { %3820 = vmatpush3.bf16.xpose.msra.mxu1 %v1682_v3  ;;  %3823 = vmatprep.mubr.msk.bf16.mxu1 %vm1322_vm0, %v1668_v4 }
 0x656   : > { %3876 = vmatprep.subr.msk.bf16.mxu1 %vm1322_vm0, %v1674_v5 }
 0x65d   : > { %3822 = vmatpush3.bf16.xpose.msra.mxu1 %v1685_v6 }
 0x664   : > { %3824 = vmatmul.mubr.msk.bf16.vlgmr.msra.gmra.mrb[12].mxu1 %vm1322_vm0, %v1670_v7 }
 0x717   : > { %v5718_v8 = vpop.f32.mrb[4].mxu1 }
 0x718   : > { %v5720_v9 = vpop.f32.mrb[5].mxu1 }
 0x719   : > { %v5722_v10 = vpop.f32.mrb[6].mxu1 }
 0x71a   : > { %v5724_v11 = vpop.f32.mrb[7].mxu1 }
 0x727   : > { %v3809_v12 = vpop.f32.mrb[8].mxu1 }
 0x728   : > { %v1543_v13 = vpop.f32.mrb[9].mxu1  ;;  %v5754_v62 = vadd.f32 %v3809_v12, %v5670_v61 }
 0x729   : > { %v3810_v14 = vpop.f32.mrb[10].mxu1  ;;  %v5751_v60 = vadd.f32 %v1543_v13, %v5668_v59 }
 0x72a   : > { %v1546_v15 = vpop.f32.mrb[11].mxu1  ;;  %v5759_v0 = vadd.f32 %v3810_v14, %v5675_v2 }
 0x737   : > { %v3825_v16 = vpop.f32.mrb[12].mxu1 }
 0x738   : > { %v1721_v17 = vpop.f32.mrb[13].mxu1  ;;  %v1730_v25 = vadd.f32 %v3825_v16, %v5670_v61 }
 0x739   : > { %v1722_v20 = vadd.f32 %v1721_v17, %v5668_v59  ;;  %v3826_v22 = vpop.f32.mrb[14].mxu1 }
 0x73a   : > { %v1724_v24 = vpop.f32.mrb[15].mxu1  ;;  %v1733_v29 = vadd.f32 %v3826_v22, %v5675_v2  ;;  %v1742_v30 = vsel %vm1322_vm0, %v1730_v25, -inf }
 0x73b   : > { %v1725_v26 = vadd.f32 %v1724_v24, %v5672_v63  ;;  %v1736_v27 = vsel %vm1322_vm0, %v1722_v20, -inf }
 0x73c   : > { %1737 = vmax.xlane.f32.xlu0 %v1736_v27  ;;  %v1745_v31 = vsel %vm1322_vm0, %v1733_v29, -inf }
 0x73d   : > { %v1739_v28 = vsel %vm1322_vm0, %v1725_v26, -inf }
 0x73e   : > { %1740 = vmax.xlane.f32.xlu1 %v1739_v28 }
 0x740   : > { %1743 = vmax.xlane.f32.xlu0 %v1742_v30 }
 0x744   : > { %1746 = vmax.xlane.f32.xlu0 %v1745_v31 }
 0x74f   : > { %1784 = vrot.lane.b32.xlu1 %v5650_v47, %s4927_s18 }
 0x7c9   : > { %v1738_v32 = vpop.xlane.xlu0 %1737 }
 0x7ca   : > { %v1748_v33 = vsub.f32 %v1722_v20, %v1738_v32 }
 0x7cb   : > { %v1741_v34 = vpop.xlane.xlu1 %1740 }
 0x7cc   : > { %v1752_v39 = vmul.f32 1.442695, %v1748_v33  ;;  %v1749_v40 = vsub.f32 %v1725_v26, %v1741_v34 }
 0x7cd   : > { %v1744_v36 = vpop.xlane.xlu0 %1743 }
 0x7ce   : > { %v1750_v38 = vsub.f32 %v1730_v25, %v1744_v36  ;;  %v1754_v45 = vmul.f32 1.442695, %v1749_v40 }
 0x7cf   : > { %v1785_v3 = vpop.permute.xlu1 %1784 }
 0x7d0   : > { %v1756_v41 = vmul.f32 1.442695, %v1750_v38 }
 0x7d1   : > { %v1747_v42 = vpop.xlane.xlu0 %1746 }
 0x7d2   : > { %4215 = vpow2.f32 %v1756_v41  ;;  %v1751_v44 = vsub.f32 %v1733_v29, %v1747_v42 }
 0x7d3   : > { %4217 = vpow2.f32 %v1752_v39 }
 0x7d4   : > { %v1758_v46 = vmul.f32 1.442695, %v1751_v44 }
 0x7d6   : > { %4219 = vpow2.f32 %v1758_v46 }
 0x7d7   : > { %4221 = vpow2.f32 %v1754_v45 }
 0x7dc   : > { %v4216_v48 = vpop.eup %4215 }
 0x7dd   : > { %v1766_v50 = vsel %vm1322_vm0, %v4216_v48, 0.0  ;;  %v4218_v51 = vpop.eup %4217 }
 0x7de   : > { %1767 = vadd.xlane.f32.xlu0 %v1766_v50  ;;  %v1760_v53 = vsel %vm1322_vm0, %v4218_v51, 0.0 }
 0x7e0   : > { %v4220_v52 = vpop.eup %4219 }
 0x7e1   : > { %v1769_v54 = vsel %vm1322_vm0, %v4220_v52, 0.0  ;;  %v4222_v55 = vpop.eup %4221 }
 0x7e2   : > { %1761 = vadd.xlane.f32.xlu0 %v1760_v53  ;;  %1770 = vadd.xlane.f32.xlu1 %v1769_v54  ;;  %v1763_v58 = vsel %vm1322_vm0, %v4222_v55, 0.0 }
 0x7e6   : > { %1764 = vadd.xlane.f32.xlu1 %v1763_v58 }
 0x7f7   : > { %1847 = vrot.lane.b32.xlu1 %v5642_v37, %s4928_s20  ;;  %v1558_v37 = vsel %vm1322_vm0, %v5751_v60, -inf }
 0x7f8   : > { %1782 = vrot.lane.b32.xlu0 %v5652_v49, %s4927_s18 }
 0x7fb   : > { %1849 = vrot.lane.b32.xlu1 %v5658_v57, %s4928_s20  ;;  %v1547_v57 = vadd.f32 %v1546_v15, %v5672_v63 }
 0x7fc   : > { %1843 = vrot.lane.b32.xlu0 %v5640_v35, %s4928_s20  ;;  %v1564_v35 = vsel %vm1322_vm0, %v5754_v62, -inf }
 0x7fd   : > { %v1561_v1 = vsel %vm1322_vm0, %v1547_v57, -inf }
 0x7ff   : > { %1845 = vrot.lane.b32.xlu1 %v5655_v56, %s4928_s20  ;;  %v1567_v56 = vsel %vm1322_vm0, %v5759_v0, -inf }
 0x81b   : > { %1559 = vmax.xlane.f32.xlu0 %v1558_v37 }
 0x81f   : > { %1565 = vmax.xlane.f32.xlu0 %v1564_v35 }
 0x823   : > { %1568 = vmax.xlane.f32.xlu0 %v1567_v56  ;;  %1562 = vmax.xlane.f32.xlu1 %v1561_v1 }
 0x86b   : > { %v1768_v4 = vpop.xlane.xlu0 %1767 }
 0x86f   : > { %v1771_v5 = vpop.xlane.xlu1 %1770  ;;  %v1762_v6 = vpop.xlane.xlu0 %1761 }
 0x870   : > { %4223 = vrcp.f32 %v1771_v5 }
 0x871   : > { %4225 = vrcp.f32 %v1762_v6 }
 0x872   : > { %4227 = vrcp.f32 %v1768_v4 }
 0x873   : > { %v1765_v7 = vpop.xlane.xlu1 %1764  ;;  %v1783_v12 = vpop.permute.xlu0 %1782 }
 0x874   : > { %4229 = vrcp.f32 %v1765_v7  ;;  %3827 = vmatprep.subr.bf16.mxu1 %v1783_v12 }
 0x875   : > { %3828 = vmatpush3.bf16.msra.mxu1 %v1783_v12 }
 0x876   : > { %3829 = vmatprep.subr.bf16.mxu1 %v1785_v3 }
 0x877   : > { %v1848_v13 = vpop.permute.xlu1 %1847  ;;  %v1844_v29 = vpop.permute.xlu0 %1843 }
 0x878   : > { %v1858_v28 = vsel %vm1322_vm0, %v1848_v13, 0 }
 0x879   : > { %3830 = vmatpush3.bf16.msra.mxu1 %v1785_v3 }
 0x87a   : > { %3877 = vmatprep.subr.msk.bf16.mxu1 %vm1322_vm0, %v1848_v13  ;;  %v4224_v14 = vpop.eup %4223 }
 0x87b   : > { %v4226_v15 = vpop.eup %4225  ;;  %v1779_v20 = vmul.f32 %v4224_v14, %v4220_v52  ;;  %v1850_v30 = vpop.permute.xlu1 %1849 }
 0x87c   : > { %v4228_v16 = vpop.eup %4227  ;;  %v1776_v22 = vmul.f32 %v4226_v15, %v4218_v51  ;;  %v1861_v31 = vsel %vm1322_vm0, %v1850_v30, 0 }
 0x87d   : > { %v1778_v25 = vmul.f32 %v4228_v16, %v4216_v48 }
 0x87e   : > { %v4230_v17 = vpop.eup %4229 }
 0x87f   : > { %v1777_v24 = vmul.f32 %v4230_v17, %v4222_v55  ;;  %v1781_v27 = vpack.c.bf16 %v1779_v20, %v1778_v25  ;;  %v1846_v32 = vpop.permute.xlu1 %1845 }
 0x881   : > { %v1780_v26 = vpack.c.bf16 %v1777_v24, %v1776_v22 }
 0x883   : > { %3831 = vmatprep.mubr.msk.bf16.mxu1 %vm1322_vm0, %v1780_v26 }
 0x884   : > { %3832 = vmatmul.mubr.msk.bf16.vlgmr.msra.gmra.mrb[16].mxu1 %vm1322_vm0, %v1781_v27 }
 0x885   : > { %3836 = vmatpush3.bf16.xpose.msra.mxu1 %v1858_v28  ;;  %3839 = vmatprep.mubr.msk.bf16.mxu1 %vm1322_vm0, %v1844_v29 }
 0x886   : > { %3878 = vmatprep.subr.msk.bf16.mxu1 %vm1322_vm0, %v1850_v30 }
 0x88d   : > { %3838 = vmatpush3.bf16.xpose.msra.mxu1 %v1861_v31 }
 0x894   : > { %3840 = vmatmul.mubr.msk.bf16.vlgmr.msra.gmra.mrb[20].mxu1 %vm1322_vm0, %v1846_v32 }
 0x895   : > { %2521 = vmatprep.mubr.bf16.mxu1 %v4925_v43 }
 0x8a8   : > { %v1560_v33 = vpop.xlane.xlu0 %1559 }
 0x8a9   : > { %v1570_v45 = vsub.f32 %v5751_v60, %v1560_v33 }
 0x8ab   : > { %v1574_v50 = vmul.f32 1.442695, %v1570_v45 }
 0x8ac   : > { %v1566_v41 = vpop.xlane.xlu0 %1565 }
 0x8ad   : > { %v1572_v51 = vsub.f32 %v5754_v62, %v1566_v41  ;;  %4231 = vpow2.f32 %v1574_v50 }
 0x8af   : > { %v1578_v54 = vmul.f32 1.442695, %v1572_v51 }
 0x8b0   : > { %v1563_v44 = vpop.xlane.xlu1 %1562  ;;  %v1569_v48 = vpop.xlane.xlu0 %1568 }
 0x8b1   : > { %v1571_v46 = vsub.f32 %v1547_v57, %v1563_v44  ;;  %v1573_v53 = vsub.f32 %v5759_v0, %v1569_v48 }
 0x8b3   : > { %v1576_v52 = vmul.f32 1.442695, %v1571_v46  ;;  %v1580_v58 = vmul.f32 1.442695, %v1573_v53 }
 0x8b5   : > { %4233 = vpow2.f32 %v1576_v52 }
 0x8b6   : > { %4235 = vpow2.f32 %v1578_v54 }
 0x8b7   : > { %4237 = vpow2.f32 %v1580_v58  ;;  %v4232_v5 = vpop.eup %4231 }
 0x8bf   : > { %v4234_v6 = vpop.eup %4233 }
 0x8c0   : > { %v1585_v7 = vsel %vm1322_vm0, %v4234_v6, 0.0 }
 0x957   : > { %v5776_v34 = vpop.f32.mrb[16].mxu1 }
 0x958   : > { %v5778_v36 = vpop.f32.mrb[17].mxu1 }
 0x959   : > { %v5780_v38 = vpop.f32.mrb[18].mxu1 }
 0x95a   : > { %v4056_v39 = vpack.i.bf16 %v5780_v38, %v5776_v34  ;;  %v5784_v40 = vpop.f32.mrb[19].mxu1 }
 0x95b   : > { %v4051_v42 = vpack.i.bf16 %v5784_v40, %v5778_v36 }
 0x967   : > { %v3841_v55 = vpop.f32.mrb[20].mxu1 }
 0x968   : > { %v1897_v37 = vpop.f32.mrb[21].mxu1  ;;  %v1906_v60 = vadd.f32 %v3841_v55, %v5670_v61  ;;  %v1582_v61 = vsel %vm1322_vm0, %v4232_v5, 0.0 }
 0x969   : > { %v1898_v35 = vadd.f32 %v1897_v37, %v5668_v59  ;;  %v3842_v56 = vpop.f32.mrb[22].mxu1 }
 0x96a   : > { %v1900_v1 = vpop.f32.mrb[23].mxu1  ;;  %v1909_v0 = vadd.f32 %v3842_v56, %v5675_v2  ;;  %v1918_v4 = vsel %vm1322_vm0, %v1906_v60, -inf }
 0x96b   : > { %v1901_v57 = vadd.f32 %v1900_v1, %v5672_v63  ;;  %v1912_v62 = vsel %vm1322_vm0, %v1898_v35, -inf  ;;  %v5800_v63 = vpop.eup %4235 }
 0x96c   : > { %1913 = vmax.xlane.f32.xlu0 %v1912_v62  ;;  %v1921_v59 = vsel %vm1322_vm0, %v1909_v0, -inf  ;;  %v5803_v12 = vpop.eup %4237  ;;  %v1588_v2 = vsel %vm1322_vm0, %v5800_v63, 0.0 }
 0x96d   : > { %v1915_v3 = vsel %vm1322_vm0, %v1901_v57, -inf  ;;  %v1591_v13 = vsel %vm1322_vm0, %v5803_v12, 0.0 }
 0x96e   : > { %1916 = vmax.xlane.f32.xlu1 %v1915_v3 }
 0x970   : > { %1919 = vmax.xlane.f32.xlu0 %v1918_v4 }
 0x972   : > { %1922 = vmax.xlane.f32.xlu1 %v1921_v59 }
 0x974   : > { %1583 = vadd.xlane.f32.xlu0 %v1582_v61 }
 0x976   : > { %1586 = vadd.xlane.f32.xlu1 %v1585_v7 }
 0x978   : > { %1589 = vadd.xlane.f32.xlu0 %v1588_v2 }
 0x97a   : > { %1592 = vadd.xlane.f32.xlu1 %v1591_v13 }
 0x98b   : > { %1608 = vrot.lane.b32.xlu1 %v5650_v47, %s4926_s19 }
 0x98f   : > { %1958 = vrot.lane.b32.xlu1 %v5652_v49, %s4928_s20 }
 0x9f9   : > { %v1914_v14 = vpop.xlane.xlu0 %1913 }
 0x9fa   : > { %v1924_v15 = vsub.f32 %v1898_v35, %v1914_v14 }
 0x9fb   : > { %v1917_v16 = vpop.xlane.xlu1 %1916 }
 0x9fc   : > { %v1928_v17 = vmul.f32 1.442695, %v1924_v15  ;;  %v1925_v22 = vsub.f32 %v1901_v57, %v1917_v16 }
 0x9fd   : > { %v1920_v20 = vpop.xlane.xlu0 %1919 }
 0x9fe   : > { %v1926_v24 = vsub.f32 %v1906_v60, %v1920_v20  ;;  %4239 = vpow2.f32 %v1928_v17  ;;  %v1930_v29 = vmul.f32 1.442695, %v1925_v22  ;;  %v4103_v17 = vld [vmem:[%s5556_s17] sm:$0xff]   ;;  %v4104_v20 = vld [vmem:[%s5556_s17 + $0x8] sm:$0xff]   ;;  %v4105_v22 = vld [vmem:[%s5556_s17 + $0x10] sm:$0xff]  }
 0x9ff   : > { %v1923_v25 = vpop.xlane.xlu1 %1922 }
 0xa00   : > { %v1932_v26 = vmul.f32 1.442695, %v1926_v24  ;;  %v1927_v27 = vsub.f32 %v1909_v0, %v1923_v25  ;;  %v4106_v24 = vld [vmem:[%s5556_s17 + $0x18] sm:$0xff]   ;;  %v4107_v25 = vld [vmem:[%s5556_s17 + $0x20] sm:$0xff]  }
 0xa01   : > { %v1584_v28 = vpop.xlane.xlu0 %1583 }
 0xa02   : > { %4241 = vpow2.f32 %v1932_v26  ;;  %v1934_v30 = vmul.f32 1.442695, %v1927_v27  ;;  %v4108_v26 = vld [vmem:[%s5556_s17 + $0x28] sm:$0xff]   ;;  %v4109_v27 = vld [vmem:[%s5556_s17 + $0x30] sm:$0xff]  }
 0xa03   : > { %4243 = vrcp.f32 %v1584_v28  ;;  %v1587_v31 = vpop.xlane.xlu1 %1586 }
 0xa04   : > { %4245 = vpow2.f32 %v1934_v30 }
 0xa05   : > { %4247 = vrcp.f32 %v1587_v31  ;;  %v1590_v35 = vpop.xlane.xlu0 %1589  ;;  %v4110_v31 = vld [vmem:[%s5556_s17 + $0x38] sm:$0xff]  }
 0xa06   : > { %4249 = vpow2.f32 %v1930_v29 }
 0xa07   : > { %v1593_v58 = vpop.xlane.xlu1 %1592 }
 0xa08   : > { %v4240_v32 = vpop.eup %4239  ;;  %4251 = vrcp.f32 %v1593_v58 }
 0xa09   : > { %v1936_v53 = vsel %vm1322_vm0, %v4240_v32, 0.0  ;;  %4253 = vrcp.f32 %v1590_v35 }
 0xa0b   : > { %v1609_v37 = vpop.permute.xlu1 %1608 }
 0xa0c   : > { %v4242_v33 = vpop.eup %4241 }
 0xa0d   : > { %v4244_v41 = vpop.eup %4243  ;;  %v1942_v44 = vsel %vm1322_vm0, %v4242_v33, 0.0 }
 0xa0e   : > { %v4246_v45 = vpop.eup %4245  ;;  %1943 = vadd.xlane.f32.xlu0 %v1942_v44  ;;  %v1598_v51 = vmul.f32 %v4244_v41, %v4232_v5 }
 0xa0f   : > { %v4248_v46 = vpop.eup %4247  ;;  %v1945_v48 = vsel %vm1322_vm0, %v4246_v45, 0.0  ;;  %v1959_v56 = vpop.permute.xlu1 %1958 }
 0xa10   : > { %v4250_v50 = vpop.eup %4249  ;;  %1946 = vadd.xlane.f32.xlu1 %v1945_v48  ;;  %v1599_v52 = vmul.f32 %v4248_v46, %v4234_v6 }
 0xa11   : > { %v1939_v55 = vsel %vm1322_vm0, %v4250_v50, 0.0 }
 0xa12   : > { %1937 = vadd.xlane.f32.xlu0 %v1936_v53  ;;  %v1602_v54 = vpack.c.bf16 %v1599_v52, %v1598_v51  ;;  %v4252_v0 = vpop.eup %4251 }
 0xa14   : > { %3815 = vmatprep.mubr.msk.bf16.mxu0 %vm1322_vm0, %v1602_v54  ;;  %1940 = vadd.xlane.f32.xlu1 %v1939_v55 }
 0xa25   : > { %1960 = vrot.lane.b32.xlu1 %v5650_v47, %s4928_s20  ;;  %v4254_v47 = vpop.eup %4253 }
 0xa26   : > { %v1600_v4 = vmul.f32 %v4254_v47, %v5800_v63 }
 0xa28   : > { %1606 = vrot.lane.b32.xlu0 %v5652_v49, %s4926_s19  ;;  %v1601_v49 = vmul.f32 %v4252_v0, %v5803_v12 }
 0xa2a   : > { %v1603_v59 = vpack.c.bf16 %v1601_v49, %v1600_v4 }
 0xa9b   : > { %v1944_v1 = vpop.xlane.xlu0 %1943 }
 0xa9d   : > { %v1947_v60 = vpop.xlane.xlu1 %1946 }
 0xa9f   : > { %v1938_v57 = vpop.xlane.xlu0 %1937 }
 0xaa0   : > { %4255 = vrcp.f32 %v1938_v57 }
 0xaa1   : > { %4257 = vrcp.f32 %v1947_v60  ;;  %v1941_v62 = vpop.xlane.xlu1 %1940 }
 0xaa2   : > { %4259 = vrcp.f32 %v1941_v62 }
 0xaa3   : > { %4261 = vrcp.f32 %v1944_v1  ;;  %v1607_v3 = vpop.permute.xlu0 %1606 }
 0xaa4   : > { %3811 = vmatprep.subr.bf16.mxu0 %v1607_v3 }
 0xaa5   : > { %3812 = vmatpush3.bf16.msra.mxu0 %v1607_v3  ;;  %v1961_v2 = vpop.permute.xlu1 %1960 }
 0xaa6   : > { %3813 = vmatprep.subr.bf16.mxu0 %v1609_v37 }
 0xaa9   : > { %3814 = vmatpush3.bf16.msra.mxu0 %v1609_v37 }
 0xaaa   : > { %v4256_v5 = vpop.eup %4255  ;;  %3843 = vmatprep.subr.bf16.mxu0 %v1959_v56 }
 0xaab   : > { %v4258_v6 = vpop.eup %4257  ;;  %v1952_v13 = vmul.f32 %v4256_v5, %v4240_v32 }
 0xaac   : > { %v4260_v61 = vpop.eup %4259  ;;  %3816 = vmatmul.mubr.msk.bf16.vlgmr.msra.gmra.mrb[12].mxu0 %vm1322_vm0, %v1603_v59  ;;  %v1955_v12 = vmul.f32 %v4258_v6, %v4246_v45 }
 0xaad   : > { %v4262_v7 = vpop.eup %4261  ;;  %3844 = vmatpush3.bf16.msra.mxu0 %v1959_v56  ;;  %v1953_v14 = vmul.f32 %v4260_v61, %v4250_v50 }
 0xaae   : > { %3845 = vmatprep.subr.bf16.mxu0 %v1961_v2  ;;  %v1954_v15 = vmul.f32 %v4262_v7, %v4242_v33 }
 0xaaf   : > { %v1956_v63 = vpack.c.bf16 %v1953_v14, %v1952_v13 }
 0xab0   : > { %v1957_v16 = vpack.c.bf16 %v1955_v12, %v1954_v15 }
 0xab1   : > { %3846 = vmatpush3.bf16.msra.mxu0 %v1961_v2  ;;  %3847 = vmatprep.mubr.msk.bf16.mxu0 %vm1322_vm0, %v1956_v63  ;;  %v3556_v2 = vld [vmem:[%s795_s21] ss:$0 sm:$0xff] }
 0xab2   : > { %3851 = vmatprep.subr.bf16.mxu0 %v4103_v17 }
 0xab4   : > { %3848 = vmatmul.mubr.msk.bf16.vlgmr.msra.gmra.mrb[16].mxu0 %vm1322_vm0, %v1957_v16 }
 0xab5   : > { %3852 = vmatpush3.bf16.msra.mxu0 %v4103_v17  ;;  %v4335_v17 = vld [vmem:[#allocation2] sm:$0xff] }
 0xab6   : > { %3853 = vmatprep.subr.bf16.mxu0 %v4104_v20 }
 0xab9   : > { %3854 = vmatpush3.bf16.msra.mxu0 %v4104_v20 }
 0xaba   : > { %3855 = vmatprep.subr.bf16.mxu0 %v4105_v22 }
 0xabd   : > { %3856 = vmatpush3.bf16.msra.mxu0 %v4105_v22 }
 0xabe   : > { %3857 = vmatprep.subr.bf16.mxu0 %v4106_v24 }
 0xac1   : > { %3858 = vmatpush3.bf16.msra.mxu0 %v4106_v24  ;;  %v4336_v24 = vld [vmem:[#allocation2 + $0x8] sm:$0xff] }
 0xac2   : > { %3859 = vmatprep.subr.bf16.mxu0 %v4107_v25 }
 0xac5   : > { %3860 = vmatpush3.bf16.msra.mxu0 %v4107_v25 }
 0xac6   : > { %3861 = vmatprep.subr.bf16.mxu0 %v4108_v26 }
 0xac9   : > { %3862 = vmatpush3.bf16.msra.mxu0 %v4108_v26  ;;  %v4337_v26 = vld [vmem:[#allocation2 + $0x10] sm:$0xff] }
 0xaca   : > { %3863 = vmatprep.subr.bf16.mxu0 %v4109_v27 }
 0xacd   : > { %3864 = vmatpush3.bf16.msra.mxu0 %v4109_v27 }
 0xace   : > { %3865 = vmatprep.subr.bf16.mxu0 %v4110_v31 }
 0xad1   : > { %3866 = vmatpush3.bf16.msra.mxu0 %v4110_v31  ;;  %v4111_v31 = vld [vmem:[%s5561_s15] ss:$16 sps:$4 sm:$0xff]  }
 0xb7f   : > { %v3817_v28 = vpop.f32.mrb[12].mxu0 }
 0xb80   : > { %v1652_v29 = vpop.f32.mrb[13].mxu0 }
 0xb81   : > { %v3818_v30 = vpop.f32.mrb[14].mxu0 }
 0xb82   : > { %v4046_v32 = vpack.i.bf16 %v3818_v30, %v3817_v28  ;;  %v1655_v33 = vpop.f32.mrb[15].mxu0 }
 0xb83   : > { %v4041_v41 = vpack.i.bf16 %v1655_v33, %v1652_v29  ;;  %v4338_v29 = vld [vmem:[#allocation2 + $0x18] sm:$0xff] }
 0xb84   : > { %4047 = vrot.lane.b32.xlu1 %v4046_v32, %s4928_s20  ;;  %v4113_v32 = vld [vmem:[%s5561_s15 + $0x4] ss:$16 sps:$4 sm:$0xff]   ;;  %v4114_v33 = vld [vmem:[%s5561_s15 + $0x8] ss:$16 sps:$4 sm:$0xff]  }
 0xb85   : > { %4042 = vrot.lane.b32.xlu0 %v4041_v41, %s4928_s20  ;;  %v4116_v41 = vld [vmem:[%s5561_s15 + $0xc] ss:$16 sps:$4 sm:$0xff]   ;;  %2489 = vmatprep.subr.bf16.mxu1 %v4113_v32 }
 0xb86   : > { %2542 = vmatprep.subr.bf16.mxu0 %v4116_v41  ;;  %2490 = vmatpush1.bf16.msra.mxu1 %v4111_v31 }
 0xb87   : > { %v3849_v44 = vpop.f32.mrb[16].mxu0 }
 0xb88   : > { %4057 = vrot.lane.b32.xlu1 %v4056_v39, %s4927_s18  ;;  %v2004_v45 = vpop.f32.mrb[17].mxu0 }
 0xb89   : > { %4052 = vrot.lane.b32.xlu0 %v4051_v42, %s4927_s18  ;;  %v3850_v46 = vpop.f32.mrb[18].mxu0 }
 0xb8a   : > { %v4066_v48 = vpack.i.bf16 %v3850_v46, %v3849_v44  ;;  %v2007_v50 = vpop.f32.mrb[19].mxu0  ;;  %v4119_v44 = vld [vmem:[%s5561_s15 + $0x24] ss:$16 sps:$4 sm:$0xff]   ;;  %v4117_v46 = vld [vmem:[%s5561_s15 + $0x20] ss:$16 sps:$4 sm:$0xff]  }
 0xb8b   : > { %v4061_v51 = vpack.i.bf16 %v2007_v50, %v2004_v45  ;;  %v4122_v45 = vld [vmem:[%s5561_s15 + $0x2c] ss:$16 sps:$4 sm:$0xff]   ;;  %2491 = vmatprep.subr.bf16.mxu1 %v4119_v44 }
 0xb8c   : > { %4067 = vrot.lane.b32.xlu1 %v4066_v48, %s4926_s19  ;;  %v4120_v48 = vld [vmem:[%s5561_s15 + $0x28] ss:$16 sps:$4 sm:$0xff]   ;;  %2492 = vmatpush1.bf16.msra.mxu1 %v4117_v46  ;;  %v3565_v46 = vld [vmem:[%s803_s23] ss:$0 sm:$0xff] }
 0xb8d   : > { %4062 = vrot.lane.b32.xlu0 %v4061_v51, %s4926_s19 }
 0xbf6   : > { %v4048_v52 = vpop.permute.xlu1 %4047 }
 0xbf7   : > { %v4043_v53 = vpop.permute.xlu0 %4042  ;;  %v4050_v54 = vunpack.i.h.bf16 %v4048_v52  ;;  %v4049_v55 = vunpack.i.l.bf16 %v4048_v52 }
 0xbf8   : > { %v4045_v38 = vunpack.i.h.bf16 %v4043_v53  ;;  %v4044_v39 = vunpack.i.l.bf16 %v4043_v53 }
 0xbf9   : > { %v2070_v42 = vsel %vm1322_vm0, %v5722_v10, %v4050_v54  ;;  %v2069_v56 = vsel %vm1322_vm0, %v5718_v8, %v4049_v55 }
 0xbfa   : > { %v4058_v34 = vpop.permute.xlu1 %4057  ;;  %v2068_v60 = vsel %vm1322_vm0, %v5724_v11, %v4045_v38  ;;  %v2067_v57 = vsel %vm1322_vm0, %v5720_v9, %v4044_v39 }
 0xbfb   : > { %v4053_v58 = vpop.permute.xlu0 %4052  ;;  %v4060_v37 = vunpack.i.h.bf16 %v4058_v34  ;;  %v4059_v35 = vunpack.i.l.bf16 %v4058_v34 }
 0xbfc   : > { %v4055_v36 = vunpack.i.h.bf16 %v4053_v58  ;;  %v4054_v40 = vunpack.i.l.bf16 %v4053_v58 }
 0xbfd   : > { %v2074_v47 = vsel %vm2071_vm1, %v2069_v56, %v4059_v35  ;;  %v2075_v49 = vsel %vm2071_vm1, %v2070_v42, %v4060_v37 }
 0xbfe   : > { %v4068_v1 = vpop.permute.xlu1 %4067  ;;  %v2072_v8 = vsel %vm2071_vm1, %v2067_v57, %v4054_v40  ;;  %v2073_v5 = vsel %vm2071_vm1, %v2068_v60, %v4055_v36  ;;  %v4128_v60 = vld [vmem:[%s5561_s15 + $0x4c] ss:$16 sps:$4 sm:$0xff]   ;;  %v4123_v57 = vld [vmem:[%s5561_s15 + $0x40] ss:$16 sps:$4 sm:$0xff]  }
 0xbff   : > { %v4070_v62 = vunpack.i.h.bf16 %v4068_v1  ;;  %v4069_v0 = vunpack.i.l.bf16 %v4068_v1  ;;  %v4063_v3 = vpop.permute.xlu0 %4062  ;;  %v4125_v1 = vld [vmem:[%s5561_s15 + $0x44] ss:$16 sps:$4 sm:$0xff]  }
 0xc00   : > { %v4065_v10 = vunpack.i.h.bf16 %v4063_v3  ;;  %v4064_v4 = vunpack.i.l.bf16 %v4063_v3  ;;  %2493 = vmatprep.subr.bf16.mxu1 %v4125_v1  ;;  %v4134_v3 = vld [vmem:[%s5561_s15 + $0x6c] ss:$16 sps:$4 sm:$0xff]  }
 0xc01   : > { %v2080_v59 = vsel %vm2076_vm2, %v2075_v49, %v4070_v62  ;;  %v2079_v11 = vsel %vm2076_vm2, %v2074_v47, %v4069_v0  ;;  %v4126_v62 = vld [vmem:[%s5561_s15 + $0x48] ss:$16 sps:$4 sm:$0xff]   ;;  %2494 = vmatpush1.bf16.msra.mxu1 %v4123_v57  ;;  %v4131_v0 = vld [vmem:[%s5561_s15 + $0x64] ss:$16 sps:$4 sm:$0xff]   ;;  %v4129_v47 = vld [vmem:[%s5561_s15 + $0x60] ss:$16 sps:$4 sm:$0xff]  }
 0xc02   : > { %v2082_v6 = vpack.c.bf16 %v2080_v59, %v2079_v11  ;;  %v2077_v9 = vsel %vm2076_vm2, %v2072_v8, %v4064_v4  ;;  %v2078_v61 = vsel %vm2076_vm2, %v2073_v5, %v4065_v10  ;;  %v4132_v49 = vld [vmem:[%s5561_s15 + $0x68] ss:$16 sps:$4 sm:$0xff]   ;;  %2495 = vmatprep.subr.bf16.mxu1 %v4131_v0  ;;  %v4137_v10 = vld [vmem:[%s5561_s15 + $0x84] ss:$16 sps:$4 sm:$0xff]   ;;  %v4140_v4 = vld [vmem:[%s5561_s15 + $0x8c] ss:$16 sps:$4 sm:$0xff]  }
 0xc03   : > { %v2081_v7 = vpack.c.bf16 %v2078_v61, %v2077_v9  ;;  %v4135_v8 = vld [vmem:[%s5561_s15 + $0x80] ss:$16 sps:$4 sm:$0xff]   ;;  %v4138_v5 = vld [vmem:[%s5561_s15 + $0x88] ss:$16 sps:$4 sm:$0xff]   ;;  %v4143_v59 = vld [vmem:[%s5561_s15 + $0xa4] ss:$16 sps:$4 sm:$0xff]  }
 0xc04   : > { %v4146_v11 = vld [vmem:[%s5561_s15 + $0xac] ss:$16 sps:$4 sm:$0xff]   ;;  %v4144_v9 = vld [vmem:[%s5561_s15 + $0xa8] ss:$16 sps:$4 sm:$0xff]   ;;  %v4149_v61 = vld [vmem:[%s5561_s15 + $0xc4] ss:$16 sps:$4 sm:$0xff]  }
 0xc05   : > { %3867 = vmatprep.mubr.bf16.mxu0 %v2081_v7  ;;  %2496 = vmatpush1.bf16.msra.mxu1 %v4129_v47  ;;  %v4152_v7 = vld [vmem:[%s5561_s15 + $0xcc] ss:$16 sps:$4 sm:$0xff]   ;;  %v4165_v47 = vld [vmem:[%s5565_s28 + $0x8] sm:$0xff]  }
 0xc06   : > { %3868 = vmatmul.mubr.bf16.vlgmr.msra.gmra.mrb[20].mxu0 %v2082_v6  ;;  %2497 = vmatprep.subr.bf16.mxu1 %v4137_v10  ;;  %v4141_v6 = vld [vmem:[%s5561_s15 + $0xa0] ss:$16 sps:$4 sm:$0xff]   ;;  %v4159_v57 = vld [vmem:[%s5565_s28 + $0x40] sm:$0xff]   ;;  %v4167_v10 = vld [vmem:[%s5565_s28 + $0x50] sm:$0xff]  }
 0xc07   : > { %2574 = vmatprep.mubr.bf16.mxu0 %v4925_v43  ;;  %2543 = vmatpush1.bf16.msra.mxu0 %v4114_v33  ;;  %v4162_v0 = vld [vmem:[%s5565_s28 + $0x80] sm:$0xff]  }
 0xc08   : > { %2544 = vmatprep.subr.bf16.mxu0 %v4122_v45 }
 0xc09   : > { %2498 = vmatpush1.bf16.msra.mxu1 %v4135_v8  ;;  %v4169_v8 = vld [vmem:[%s5565_s28 + $0x10] sm:$0xff]  }
 0xc0a   : > { %2499 = vmatprep.subr.bf16.mxu1 %v4143_v59  ;;  %v4171_v59 = vld [vmem:[%s5565_s28 + $0x58] sm:$0xff]  }
 0xc0b   : > { %2545 = vmatpush1.bf16.msra.mxu0 %v4120_v48 }
 0xc0c   : > { %2546 = vmatprep.subr.bf16.mxu0 %v4128_v60 }
 0xc0d   : > { %2500 = vmatpush1.bf16.msra.mxu1 %v4141_v6  ;;  %v4173_v6 = vld [vmem:[%s5565_s28 + $0x18] sm:$0xff]  }
 0xc0e   : > { %2501 = vmatprep.subr.bf16.mxu1 %v4149_v61  ;;  %v4175_v61 = vld [vmem:[%s5565_s28 + $0x60] sm:$0xff]  }
 0xc0f   : > { %2547 = vmatpush1.bf16.msra.mxu0 %v4126_v62  ;;  %v4161_v62 = vld [vmem:[%s5565_s28] sm:$0xff]  }
 0xc10   : > { %2548 = vmatprep.subr.bf16.mxu0 %v4134_v3  ;;  %v4164_v3 = vld [vmem:[%s5565_s28 + $0xc8] sm:$0xff]  }
 0xc13   : > { %2549 = vmatpush1.bf16.msra.mxu0 %v4132_v49  ;;  %v4166_v49 = vld [vmem:[%s5565_s28 + $0x88] sm:$0xff]  }
 0xc14   : > { %2550 = vmatprep.subr.bf16.mxu0 %v4140_v4  ;;  %v4168_v4 = vld [vmem:[%s5565_s28 + $0xd0] sm:$0xff]  }
 0xc17   : > { %2551 = vmatpush1.bf16.msra.mxu0 %v4138_v5  ;;  %v4170_v5 = vld [vmem:[%s5565_s28 + $0x90] sm:$0xff]  }
 0xc18   : > { %2552 = vmatprep.subr.bf16.mxu0 %v4146_v11  ;;  %v4172_v11 = vld [vmem:[%s5565_s28 + $0xd8] sm:$0xff]  }
 0xc1b   : > { %2553 = vmatpush1.bf16.msra.mxu0 %v4144_v9  ;;  %v4174_v9 = vld [vmem:[%s5565_s28 + $0x98] sm:$0xff]  }
 0xc1c   : > { %2554 = vmatprep.subr.bf16.mxu0 %v4152_v7  ;;  %v4176_v7 = vld [vmem:[%s5565_s28 + $0xe0] sm:$0xff]  }
 0xcd9   : > { %v3869_v13 = vpop.f32.mrb[20].mxu0 }
 0xcda   : > { %v2188_v14 = vpop.f32.mrb[21].mxu0  ;;  %v2197_v16 = vadd.f32 %v3869_v13, %v3556_v2  ;;  %v4150_v13 = vld [vmem:[%s5561_s15 + $0xc8] ss:$16 sps:$4 sm:$0xff]  }
 0xcdb   : > { %v2189_v12 = vadd.f32 %v3556_v2, %v2188_v14  ;;  %v3870_v63 = vpop.f32.mrb[22].mxu0  ;;  %v4155_v14 = vld [vmem:[%s5561_s15 + $0xe4] ss:$16 sps:$4 sm:$0xff]   ;;  %2555 = vmatpush1.bf16.msra.mxu0 %v4150_v13  ;;  %v4178_v13 = vld [vmem:[%s5565_s28 + $0xa0] sm:$0xff]  }
 0xcdc   : > { %v2191_v15 = vpop.f32.mrb[23].mxu0  ;;  %v5871_v27 = vadd.f32 %v4337_v26, %v2197_v16  ;;  %v2200_v28 = vadd.f32 %v3870_v63, %v3556_v2  ;;  %v4153_v63 = vld [vmem:[%s5561_s15 + $0xe0] ss:$16 sps:$4 sm:$0xff]  }
 0xcdd   : > { %v5866_v20 = vadd.f32 %v4335_v17, %v2189_v12  ;;  %v2192_v22 = vadd.f32 %v3556_v2, %v2191_v15  ;;  %v4147_v2 = vld [vmem:[%s5561_s15 + $0xc0] ss:$16 sps:$4 sm:$0xff]   ;;  %v4158_v12 = vld [vmem:[%s5561_s15 + $0xec] ss:$16 sps:$4 sm:$0xff]   ;;  %v4156_v15 = vld [vmem:[%s5561_s15 + $0xe8] ss:$16 sps:$4 sm:$0xff]  }
 0xcde   : > { %v5875_v30 = vadd.f32 %v4338_v29, %v2200_v28  ;;  %2502 = vmatpush1.bf16.msra.mxu1 %v4147_v2  ;;  %2556 = vmatprep.subr.bf16.mxu0 %v4158_v12  ;;  %v4177_v2 = vld [vmem:[%s5565_s28 + $0x20] sm:$0xff]   ;;  %v4180_v12 = vld [vmem:[%s5565_s28 + $0xe8] sm:$0xff]  }
 0xcdf   : > { %v5868_v25 = vadd.f32 %v4336_v24, %v2192_v22  ;;  %2209 = vadd.xlane.f32.xlu0 %v5866_v20  ;;  %2503 = vmatprep.subr.bf16.mxu1 %v4155_v14  ;;  %v4179_v14 = vld [vmem:[%s5565_s28 + $0x68] sm:$0xff]  }
 0xce0   : > { %2557 = vmatpush1.bf16.msra.mxu0 %v4156_v15  ;;  %v4182_v15 = vld [vmem:[%s5565_s28 + $0xa8] sm:$0xff]  }
 0xce1   : > { %2211 = vadd.xlane.f32.xlu1 %v5868_v25 }
 0xce2   : > { %2504 = vmatpush1.bf16.msra.mxu1 %v4153_v63  ;;  %v4181_v63 = vld [vmem:[%s5565_s28 + $0x28] sm:$0xff]  }
 0xce3   : > { %2213 = vadd.xlane.f32.xlu0 %v5871_v27  ;;  %3711 = vmatprep.subr.bf16.mxu1 %v4159_v57 }
 0xce7   : > { %2215 = vadd.xlane.f32.xlu0 %v5875_v30 }
 0xd6c   : > { %v2210_v50 = vpop.xlane.xlu0 %2209 }
 0xd6d   : > { %v2217_v51 = vmul.f32 0.0078125, %v2210_v50 }
 0xd6e   : > { %v2212_v52 = vpop.xlane.xlu1 %2211 }
 0xd6f   : > { %v5887_v53 = vsub.f32 %v5866_v20, %v2217_v51  ;;  %v2218_v54 = vmul.f32 0.0078125, %v2212_v52 }
 0xd70   : > { %v2214_v55 = vpop.xlane.xlu0 %2213 }
 0xd71   : > { %v5890_v34 = vsub.f32 %v5868_v25, %v2218_v54  ;;  %v2219_v38 = vmul.f32 0.0078125, %v2214_v55  ;;  %v2225_v39 = vmul.f32 %v5887_v53, %v5887_v53  ;;  %v3566_v55 = vld [vmem:[%s811_s22] ss:$0 sm:$0xff] }
 0xd73   : > { %v5895_v58 = vsub.f32 %v5871_v27, %v2219_v38  ;;  %2229 = vadd.xlane.f32.xlu0 %v2225_v39  ;;  %v2226_v37 = vmul.f32 %v5890_v34, %v5890_v34 }
 0xd74   : > { %v2216_v35 = vpop.xlane.xlu0 %2215 }
 0xd75   : > { %v2220_v36 = vmul.f32 0.0078125, %v2216_v35  ;;  %2231 = vadd.xlane.f32.xlu1 %v2226_v37  ;;  %v2227_v40 = vmul.f32 %v5895_v58, %v5895_v58 }
 0xd77   : > { %v5902_v42 = vsub.f32 %v5875_v30, %v2220_v36  ;;  %2233 = vadd.xlane.f32.xlu0 %v2227_v40 }
 0xd79   : > { %v2228_v56 = vmul.f32 %v5902_v42, %v5902_v42 }
 0xd7b   : > { %2235 = vadd.xlane.f32.xlu1 %v2228_v56 }
 0xe00   : > { %v2230_v16 = vpop.xlane.xlu0 %2229 }
 0xe01   : > { %v2237_v17 = vmul.f32 0.0078125, %v2230_v16  ;;  %v4183_v16 = vld [vmem:[%s5565_s28 + $0x70] sm:$0xff]  }
 0xe02   : > { %v2232_v22 = vpop.xlane.xlu1 %2231 }
 0xe03   : > { %v2241_v24 = vadd.f32 1e-05, %v2237_v17  ;;  %v2238_v26 = vmul.f32 0.0078125, %v2232_v22  ;;  %v4184_v17 = vld [vmem:[%s5565_s28 + $0xf0] sm:$0xff]  }
 0xe04   : > { %v2234_v28 = vpop.xlane.xlu0 %2233  ;;  %v4185_v22 = vld [vmem:[%s5565_s28 + $0x30] sm:$0xff]  }
 0xe05   : > { %4263 = vrsqrt.f32 %v2241_v24  ;;  %v2242_v29 = vadd.f32 1e-05, %v2238_v26  ;;  %v2239_v31 = vmul.f32 0.0078125, %v2234_v28  ;;  %v4186_v24 = vld [vmem:[%s5565_s28 + $0xb0] sm:$0xff]   ;;  %v4187_v26 = vld [vmem:[%s5565_s28 + $0x78] sm:$0xff]  }
 0xe06   : > { %v4188_v28 = vld [vmem:[%s5565_s28 + $0xf8] sm:$0xff]  }
 0xe07   : > { %4265 = vrsqrt.f32 %v2242_v29  ;;  %v2243_v32 = vadd.f32 1e-05, %v2239_v31  ;;  %v4189_v29 = vld [vmem:[%s5565_s28 + $0x38] sm:$0xff]  }
 0xe08   : > { %v2236_v33 = vpop.xlane.xlu1 %2235  ;;  %v4190_v31 = vld [vmem:[%s5565_s28 + $0xb8] sm:$0xff]  }
 0xe09   : > { %4267 = vrsqrt.f32 %v2243_v32  ;;  %v2240_v41 = vmul.f32 0.0078125, %v2236_v33  ;;  %v2307_v32 = vld [vmem:[%s5563_s4] sm:$0xf]  ;;  %v2323_v33 = vsub.s32 3, %v5628_v18 }
 0xe0b   : > { %v2244_v44 = vadd.f32 1e-05, %v2240_v41  ;;  %v2312_v41 = vrot.slane %v2307_v32, %v1069_v19 }
 0xe0d   : > { %4269 = vrsqrt.f32 %v2244_v44  ;;  %v5978_v44 = vrot.slane %v2307_v32, %v1077_v23 }
 0xe0f   : > { %v4264_v45 = vpop.eup %4263 }
 0xe10   : > { %v2249_v48 = vmul.f32 %v4264_v45, %v5887_v53  ;;  %v5982_v45 = vrot.slane %v2307_v32, %v1073_v21 }
 0xe11   : > { %v4266_v50 = vpop.eup %4265 }
 0xe12   : > { %v2250_v51 = vmul.f32 %v4266_v50, %v5890_v34  ;;  %v2259_v52 = vmul.f32 %v3565_v46, %v2249_v48 }
 0xe13   : > { %v4268_v54 = vpop.eup %4267 }
 0xe14   : > { %v2260_v38 = vmul.f32 %v3565_v46, %v2250_v51  ;;  %v2269_v39 = vadd.f32 %v3566_v55, %v2259_v52  ;;  %v2251_v35 = vmul.f32 %v4268_v54, %v5895_v58 }
 0xe16   : > { %v2270_v37 = vadd.f32 %v3566_v55, %v2260_v38  ;;  %v2261_v34 = vmul.f32 %v3565_v46, %v2251_v35 }
 0xe17   : > { %v4270_v36 = vpop.eup %4269 }
 0xe18   : > { %v2273_v40 = vpack.c.bf16 %v2270_v37, %v2269_v39  ;;  %v2252_v53 = vmul.f32 %v4270_v36, %v5902_v42  ;;  %v2271_v58 = vadd.f32 %v3566_v55, %v2261_v34  ;;  %v4160_v42 = vld [vmem:[%s5565_s28 + $0xc0] sm:$0xff]  }
 0xe19   : > { %3739 = vmatprep.subr.bf16.mxu0 %v4160_v42 }
 0xe1a   : > { %2522 = vmatmul.mubr.bf16.vlgmr.msra.gmra.mrb[24].mxu1 %v2273_v40  ;;  %2575 = vmatmul.mubr.bf16.vlgmr.msra.gmra.mrb[24].mxu0 %v2273_v40  ;;  %v2262_v56 = vmul.f32 %v3565_v46, %v2252_v53  ;;  %v5984_v46 = vrot.slane %v2307_v32, %v2323_v33 }
 0xe1b   : > { %2531 = vmatprep.mubr.bf16.mxu1 %v4925_v43  ;;  %2584 = vmatprep.mubr.bf16.mxu0 %v4925_v43  ;;  %v4163_v43 = vld [vmem:[%s5565_s28 + $0x48] sm:$0xff]  }
 0xe1c   : > { %v2272_v1 = vadd.f32 %v3566_v55, %v2262_v56  ;;  %3712 = vmatpush3.bf16.msra.mxu1 %v4161_v62  ;;  %3740 = vmatpush3.bf16.msra.mxu0 %v4162_v0 }
 0xe1d   : > { %3713 = vmatprep.subr.bf16.mxu1 %v4163_v43  ;;  %3741 = vmatprep.subr.bf16.mxu0 %v4164_v3 }
 0xe1e   : > { %v2274_v60 = vpack.c.bf16 %v2272_v1, %v2271_v58 }
 0xe20   : > { %3714 = vmatpush3.bf16.msra.mxu1 %v4165_v47  ;;  %3742 = vmatpush3.bf16.msra.mxu0 %v4166_v49 }
 0xe21   : > { %3715 = vmatprep.subr.bf16.mxu1 %v4167_v10  ;;  %3743 = vmatprep.subr.bf16.mxu0 %v4168_v4 }
 0xe22   : > { %2532 = vmatmul.mubr.bf16.gmra.mrb[28].mxu1 %v2274_v60  ;;  %2585 = vmatmul.mubr.bf16.gmra.mrb[28].mxu0 %v2274_v60 }
 0xe24   : > { %3716 = vmatpush3.bf16.msra.mxu1 %v4169_v8  ;;  %3744 = vmatpush3.bf16.msra.mxu0 %v4170_v5 }
 0xe25   : > { %3717 = vmatprep.subr.bf16.mxu1 %v4171_v59  ;;  %3745 = vmatprep.subr.bf16.mxu0 %v4172_v11 }
 0xe28   : > { %3718 = vmatpush3.bf16.msra.mxu1 %v4173_v6  ;;  %3746 = vmatpush3.bf16.msra.mxu0 %v4174_v9 }
 0xe29   : > { %3719 = vmatprep.subr.bf16.mxu1 %v4175_v61  ;;  %3747 = vmatprep.subr.bf16.mxu0 %v4176_v7 }
 0xe2c   : > { %3720 = vmatpush3.bf16.msra.mxu1 %v4177_v2  ;;  %3748 = vmatpush3.bf16.msra.mxu0 %v4178_v13 }
 0xe2d   : > { %3721 = vmatprep.subr.bf16.mxu1 %v4179_v14  ;;  %3749 = vmatprep.subr.bf16.mxu0 %v4180_v12 }
 0xe30   : > { %3722 = vmatpush3.bf16.msra.mxu1 %v4181_v63  ;;  %3750 = vmatpush3.bf16.msra.mxu0 %v4182_v15 }
 0xe31   : > { %3723 = vmatprep.subr.bf16.mxu1 %v4183_v16  ;;  %3751 = vmatprep.subr.bf16.mxu0 %v4184_v17 }
 0xe34   : > { %3724 = vmatpush3.bf16.msra.mxu1 %v4185_v22  ;;  %3752 = vmatpush3.bf16.msra.mxu0 %v4186_v24 }
 0xe35   : > { %3725 = vmatprep.subr.bf16.mxu1 %v4187_v26  ;;  %3753 = vmatprep.subr.bf16.mxu0 %v4188_v28 }
 0xe38   : > { %3726 = vmatpush3.bf16.msra.mxu1 %v4189_v29  ;;  %3754 = vmatpush3.bf16.msra.mxu0 %v4190_v31 }
 0xeed   : > { %v2523_v48 = vpop.f32.mrb[24].mxu1  ;;  %v2576_v50 = vpop.f32.mrb[24].mxu0 }
 0xeee   : > { %v5986_v51 = vadd.f32 %v2523_v48, %v2312_v41  ;;  %v5989_v52 = vadd.f32 %v2576_v50, %v5978_v44  ;;  %v2525_v54 = vpop.f32.mrb[25].mxu1  ;;  %v2578_v55 = vpop.f32.mrb[25].mxu0 }
 0xeef   : > { %v5992_v19 = vadd.f32 %v2525_v54, %v5982_v45  ;;  %v5995_v23 = vadd.f32 %v2578_v55, %v5984_v46  ;;  %v2527_v18 = vpop.f32.mrb[26].mxu1  ;;  %v2580_v21 = vpop.f32.mrb[26].mxu0 }
 0xef0   : > { %v3599_v38 = vmul.f32 -1.702, %v5986_v51  ;;  %v3601_v39 = vmul.f32 -1.702, %v5989_v52  ;;  %v5999_v37 = vadd.f32 %v2527_v18, %v2312_v41  ;;  %v6002_v35 = vadd.f32 %v2580_v21, %v5978_v44  ;;  %v2529_v36 = vpop.f32.mrb[27].mxu1  ;;  %v2582_v40 = vpop.f32.mrb[27].mxu0 }
 0xef1   : > { %v3600_v53 = vmul.f32 -1.702, %v5992_v19  ;;  %v3602_v34 = vmul.f32 -1.702, %v5995_v23  ;;  %v6007_v56 = vadd.f32 %v2529_v36, %v5982_v45  ;;  %v6010_v1 = vadd.f32 %v2582_v40, %v5984_v46 }
 0xef2   : > { %v2627_v58 = vmul.f32 1.442695, %v3599_v38  ;;  %v2631_v60 = vmul.f32 1.442695, %v3601_v39  ;;  %v3603_v57 = vmul.f32 -1.702, %v5999_v37 }
 0xef3   : > { %v2629_v42 = vmul.f32 1.442695, %v3600_v53  ;;  %v2633_v62 = vmul.f32 1.442695, %v3602_v34  ;;  %v3605_v0 = vmul.f32 -1.702, %v6002_v35 }
 0xef4   : > { %4271 = vpow2.f32 %v2627_v58  ;;  %v2635_v43 = vmul.f32 1.442695, %v3603_v57  ;;  %v3604_v3 = vmul.f32 -1.702, %v6007_v56  ;;  %v3606_v47 = vmul.f32 -1.702, %v6010_v1 }
 0xef5   : > { %4273 = vpow2.f32 %v2631_v60  ;;  %v2639_v49 = vmul.f32 1.442695, %v3605_v0  ;;  %v2533_v10 = vpop.f32.mrb[28].mxu1  ;;  %v2586_v4 = vpop.f32.mrb[28].mxu0 }
 0xef6   : > { %4275 = vpow2.f32 %v2629_v42  ;;  %v2637_v8 = vmul.f32 1.442695, %v3604_v3  ;;  %v6016_v5 = vadd.f32 %v2533_v10, %v2312_v41  ;;  %v2535_v59 = vpop.f32.mrb[29].mxu1  ;;  %v2588_v11 = vpop.f32.mrb[29].mxu0  ;;  %v2641_v6 = vmul.f32 1.442695, %v3606_v47 }
 0xef7   : > { %4277 = vpow2.f32 %v2633_v62  ;;  %v6019_v9 = vadd.f32 %v2586_v4, %v5978_v44  ;;  %v6022_v61 = vadd.f32 %v2535_v59, %v5982_v45  ;;  %v2537_v7 = vpop.f32.mrb[30].mxu1  ;;  %v2590_v2 = vpop.f32.mrb[30].mxu0  ;;  %v6031_v29 = vadd.f32 %v2588_v11, %v5984_v46 }
 0xef8   : > { %4279 = vpow2.f32 %v2635_v43  ;;  %v3607_v13 = vmul.f32 -1.702, %v6016_v5  ;;  %v6025_v14 = vadd.f32 %v2537_v7, %v2312_v41  ;;  %v2539_v12 = vpop.f32.mrb[31].mxu1  ;;  %v2592_v63 = vpop.f32.mrb[31].mxu0  ;;  %v6035_v38 = vadd.f32 %v2590_v2, %v5978_v44 }
 0xef9   : > { %4281 = vpow2.f32 %v2639_v49  ;;  %v3609_v15 = vmul.f32 -1.702, %v6019_v9  ;;  %v3608_v16 = vmul.f32 -1.702, %v6022_v61  ;;  %v3610_v55 = vmul.f32 -1.702, %v6031_v29 }
 0xefa   : > { %4283 = vpow2.f32 %v2637_v8  ;;  %v2643_v17 = vmul.f32 1.442695, %v3607_v13  ;;  %v3611_v22 = vmul.f32 -1.702, %v6025_v14  ;;  %v6038_v40 = vadd.f32 %v2539_v12, %v5982_v45 }
 0xefb   : > { %4285 = vpow2.f32 %v2641_v6  ;;  %v2647_v24 = vmul.f32 1.442695, %v3609_v15  ;;  %v2645_v26 = vmul.f32 1.442695, %v3608_v16  ;;  %v6041_v58 = vadd.f32 %v2592_v63, %v5984_v46 }
 0xefc   : > { %4287 = vpow2.f32 %v2643_v17  ;;  %v2651_v28 = vmul.f32 1.442695, %v3611_v22  ;;  %v2649_v42 = vmul.f32 1.442695, %v3610_v55  ;;  %v3613_v0 = vmul.f32 -1.702, %v6035_v38 }
 0xefd   : > { %4289 = vpow2.f32 %v2647_v24  ;;  %v3612_v45 = vmul.f32 -1.702, %v6038_v40  ;;  %v3614_v47 = vmul.f32 -1.702, %v6041_v58 }
 0xefe   : > { %v4272_v31 = vpop.eup %4271  ;;  %4291 = vpow2.f32 %v2645_v26  ;;  %v2655_v10 = vmul.f32 1.442695, %v3613_v0 }
 0xeff   : > { %v4274_v32 = vpop.eup %4273  ;;  %v2659_v33 = vadd.f32 1.0, %v4272_v31  ;;  %4293 = vpow2.f32 %v2651_v28  ;;  %v2653_v59 = vmul.f32 1.442695, %v3612_v45  ;;  %v2657_v6 = vmul.f32 1.442695, %v3614_v47 }
 0xf00   : > { %v4276_v41 = vpop.eup %4275  ;;  %v2661_v48 = vadd.f32 1.0, %v4274_v32 }
 0xf01   : > { %v4278_v50 = vpop.eup %4277  ;;  %4295 = vrcp.f32 %v2659_v33  ;;  %v2660_v54 = vadd.f32 1.0, %v4276_v41 }
 0xf02   : > { %v4280_v18 = vpop.eup %4279  ;;  %4297 = vrcp.f32 %v2661_v48  ;;  %v2662_v21 = vadd.f32 1.0, %v4278_v50 }
 0xf03   : > { %v4282_v39 = vpop.eup %4281  ;;  %4299 = vrcp.f32 %v2660_v54  ;;  %v2663_v36 = vadd.f32 1.0, %v4280_v18 }
 0xf04   : > { %v4284_v53 = vpop.eup %4283  ;;  %4301 = vrcp.f32 %v2662_v21  ;;  %v2665_v34 = vadd.f32 1.0, %v4282_v39 }
 0xf05   : > { %v4286_v60 = vpop.eup %4285  ;;  %4303 = vrcp.f32 %v2663_v36  ;;  %v2664_v57 = vadd.f32 1.0, %v4284_v53 }
 0xf06   : > { %v4288_v62 = vpop.eup %4287  ;;  %4305 = vrcp.f32 %v2665_v34  ;;  %v2666_v44 = vadd.f32 1.0, %v4286_v60 }
 0xf07   : > { %4307 = vrcp.f32 %v2664_v57  ;;  %v2667_v43 = vadd.f32 1.0, %v4288_v62  ;;  %v4290_v3 = vpop.eup %4289 }
 0xf08   : > { %4309 = vrcp.f32 %v2666_v44  ;;  %v4292_v49 = vpop.eup %4291  ;;  %v2669_v48 = vadd.f32 1.0, %v4290_v3 }
 0xf09   : > { %4311 = vpow2.f32 %v2649_v42  ;;  %v4294_v46 = vpop.eup %4293  ;;  %v2668_v54 = vadd.f32 1.0, %v4292_v49 }
 0xf0a   : > { %4313 = vrcp.f32 %v2667_v43  ;;  %v2671_v8 = vadd.f32 1.0, %v4294_v46 }
 0xf0b   : > { %v4296_v4 = vpop.eup %4295 }
 0xf0c   : > { %v4298_v11 = vpop.eup %4297  ;;  %4315 = vrcp.f32 %v2671_v8  ;;  %v2707_v63 = vmul.f32 %v4296_v4, %v5986_v51 }
 0xf0d   : > { %v4300_v7 = vpop.eup %4299  ;;  %4317 = vpow2.f32 %v2655_v10  ;;  %v2709_v17 = vmul.f32 %v4298_v11, %v5989_v52 }
 0xf0e   : > { %v4302_v2 = vpop.eup %4301  ;;  %4319 = vpow2.f32 %v2653_v59  ;;  %v2708_v26 = vmul.f32 %v4300_v7, %v5992_v19 }
 0xf0f   : > { %v4304_v13 = vpop.eup %4303  ;;  %4321 = vpow2.f32 %v2657_v6  ;;  %v2710_v33 = vmul.f32 %v4302_v2, %v5995_v23 }
 0xf10   : > { %v4306_v12 = vpop.eup %4305  ;;  %v2711_v15 = vmul.f32 %v4304_v13, %v5999_v37  ;;  %4323 = vrcp.f32 %v2669_v48 }
 0xf11   : > { %v4308_v16 = vpop.eup %4307  ;;  %v2713_v22 = vmul.f32 %v4306_v12, %v6002_v35  ;;  %4325 = vrcp.f32 %v2668_v54 }
 0xf12   : > { %v4310_v24 = vpop.eup %4309  ;;  %v2723_v28 = vpack.c.bf16 %v2711_v15, %v2707_v63  ;;  %v2712_v31 = vmul.f32 %v4308_v16, %v6007_v56 }
 0xf13   : > { %v4312_v32 = vpop.eup %4311  ;;  %v2725_v41 = vpack.c.bf16 %v2713_v22, %v2709_v17  ;;  %v2714_v51 = vmul.f32 %v4310_v24, %v6010_v1 }
 0xf14   : > { %v2724_v37 = vpack.c.bf16 %v2712_v31, %v2708_v26  ;;  %v4314_v50 = vpop.eup %4313  ;;  %v2670_v52 = vadd.f32 1.0, %v4312_v32 }
 0xf15   : > { %v2726_v55 = vpack.c.bf16 %v2714_v51, %v2710_v33  ;;  %v2715_v18 = vmul.f32 %v4314_v50, %v6016_v5 }
 0xf16   : > { %3026 = vmatprep.mubr.bf16.mxu1 %v2724_v37  ;;  %v4316_v35 = vpop.eup %4315  ;;  %4327 = vrcp.f32 %v2670_v52 }
 0xf17   : > { %3075 = vmatprep.mubr.bf16.mxu0 %v2726_v55  ;;  %3027 = vmatmul.mubr.bf16.vlgmr.msra.gmra.mrb[32].mxu1 %v2723_v28  ;;  %v4318_v19 = vpop.eup %4317  ;;  %v2719_v56 = vmul.f32 %v4316_v35, %v6025_v14 }
 0xf18   : > { %3076 = vmatmul.mubr.bf16.vlgmr.msra.gmra.mrb[32].mxu0 %v2725_v41  ;;  %v4320_v23 = vpop.eup %4319  ;;  %v2673_v1 = vadd.f32 1.0, %v4318_v19 }
 0xf19   : > { %v4322_v21 = vpop.eup %4321  ;;  %v2672_v39 = vadd.f32 1.0, %v4320_v23  ;;  %v2727_v36 = vpack.c.bf16 %v2719_v56, %v2715_v18 }
 0xf1a   : > { %4329 = vrcp.f32 %v2673_v1  ;;  %v2674_v53 = vadd.f32 1.0, %v4322_v21  ;;  %v4324_v34 = vpop.eup %4323 }
 0xf1b   : > { %4331 = vrcp.f32 %v2672_v39  ;;  %v4326_v60 = vpop.eup %4325  ;;  %v2717_v62 = vmul.f32 %v4324_v34, %v6019_v9 }
 0xf1c   : > { %4333 = vrcp.f32 %v2674_v53  ;;  %v2716_v0 = vmul.f32 %v4326_v60, %v6022_v61 }
 0xf20   : > { %v4328_v57 = vpop.eup %4327 }
 0xf21   : > { %v2718_v45 = vmul.f32 %v4328_v57, %v6031_v29 }
 0xf24   : > { %v4330_v42 = vpop.eup %4329 }
 0xf25   : > { %v4332_v5 = vpop.eup %4331  ;;  %v2721_v14 = vmul.f32 %v4330_v42, %v6035_v38  ;;  %v3615_v38 = vld [vmem:[%s846_s3] ss:$0 sm:$0xff] }
 0xf26   : > { %v4334_v44 = vpop.eup %4333  ;;  %v2720_v43 = vmul.f32 %v4332_v5, %v6038_v40 }
 0xf27   : > { %v2722_v3 = vmul.f32 %v4334_v44, %v6041_v58  ;;  %v2729_v47 = vpack.c.bf16 %v2721_v14, %v2717_v62 }
 0xf28   : > { %v2728_v49 = vpack.c.bf16 %v2720_v43, %v2716_v0 }
 0xf29   : > { %v2730_v46 = vpack.c.bf16 %v2722_v3, %v2718_v45 }
 0xf2a   : > { %3034 = vmatprep.mubr.bf16.mxu1 %v2728_v49 }
 0xf2b   : > { %3083 = vmatprep.mubr.bf16.mxu0 %v2730_v46  ;;  %3035 = vmatmul.mubr.bf16.gmra.mrb[36].mxu1 %v2727_v36 }
 0xf2c   : > { %3084 = vmatmul.mubr.bf16.gmra.mrb[36].mxu0 %v2729_v47 }
 0xfea   : > { %v3727_v9 = vpop.f32.mrb[32].mxu1 }
 0xfeb   : > { %v3755_v10 = vpop.f32.mrb[32].mxu0  ;;  %v3728_v4 = vpop.f32.mrb[33].mxu1 }
 0xfec   : > { %v3729_v8 = vadd.f32 %v3728_v4, %v3727_v9  ;;  %v3756_v61 = vpop.f32.mrb[33].mxu0  ;;  %v3730_v59 = vpop.f32.mrb[34].mxu1 }
 0xfed   : > { %v3757_v40 = vadd.f32 %v3756_v61, %v3755_v10  ;;  %v3758_v11 = vpop.f32.mrb[34].mxu0  ;;  %v3731_v29 = vpop.f32.mrb[35].mxu1 }
 0xfee   : > { %v3029_v6 = vadd.f32 %v3729_v8, %v3615_v38  ;;  %v3732_v58 = vadd.f32 %v3731_v29, %v3730_v59  ;;  %v3759_v7 = vpop.f32.mrb[35].mxu0  ;;  %v3649_v59 = vld [vmem:[#allocation20] ss:$0 sm:$0xff] (!%p3648_p6) }
 0xfef   : > { %v3760_v2 = vadd.f32 %v3759_v7, %v3758_v11  ;;  %v3650_v11 = vld [vmem:[#allocation21] ss:$0 sm:$0xff] (!%p3648_p6) }
 0xff0   : > { %v3078_v13 = vadd.f32 %v3757_v40, %v3029_v6  ;;  %v3032_v12 = vadd.f32 %v3732_v58, %v3615_v38 }
 0xff2   : > { %v3092_v63 = vadd.f32 %v3078_v13, %v5866_v20  ;;  %v3081_v15 = vadd.f32 %v3760_v2, %v3032_v12 }
 0xff4   : > { %3096 = vst [vmem:[#allocation2] sm:$0xff] %v3092_v63  ;;  %v3093_v16 = vadd.f32 %v3081_v15, %v5868_v25 }
 0xff6   : > { %3097 = vst [vmem:[#allocation2 + $0x8] sm:$0xff] %v3093_v16 }
 0xffb   : > { %v3104_v35 = vld [vmem:[#allocation2] sm:$0xff] (!%p3648_p6) }
 0xffc   : > { %3110 = vadd.xlane.f32.xlu0 (!%p3648_p6), %v3104_v35 }
 0xffd   : > { %v3105_v18 = vld [vmem:[#allocation2 + $0x8] sm:$0xff] (!%p3648_p6) }
 0xffe   : > { %v3733_v17 = vpop.f32.mrb[36].mxu1 }
 0xfff   : > { %v3761_v22 = vpop.f32.mrb[36].mxu0  ;;  %v3734_v24 = vpop.f32.mrb[37].mxu1 }
0x1000   : > { %v3735_v26 = vadd.f32 %v3734_v24, %v3733_v17  ;;  %v3762_v28 = vpop.f32.mrb[37].mxu0  ;;  %v3736_v31 = vpop.f32.mrb[38].mxu1  ;;  %3112 = vadd.xlane.f32.xlu0 (!%p3648_p6), %v3105_v18 }
0x1001   : > { %v3763_v32 = vadd.f32 %v3762_v28, %v3761_v22  ;;  %v3764_v33 = vpop.f32.mrb[38].mxu0  ;;  %v3737_v41 = vpop.f32.mrb[39].mxu1 }
0x1002   : > { %v3037_v51 = vadd.f32 %v3735_v26, %v3615_v38  ;;  %v3738_v48 = vadd.f32 %v3737_v41, %v3736_v31  ;;  %v3765_v37 = vpop.f32.mrb[39].mxu0 }
0x1003   : > { %v3766_v50 = vadd.f32 %v3765_v37, %v3764_v33 }
0x1004   : > { %v3086_v54 = vadd.f32 %v3763_v32, %v3037_v51  ;;  %v3040_v20 = vadd.f32 %v3738_v48, %v3615_v38  ;;  %3103 = sbr.rel (%p3648_p6) target bundleno = 4428 (0x114c), region = 156 }
0x1006   : > { %v3094_v55 = vadd.f32 %v3086_v54, %v5871_v27  ;;  %v3089_v52 = vadd.f32 %v3766_v50, %v3040_v20 }
0x1008   : > { %3098 = vst [vmem:[#allocation2 + $0x10] sm:$0xff] %v3094_v55  ;;  %v3095_v25 = vadd.f32 %v3089_v52, %v5875_v30 }
0x100a   : > { %3099 = vst [vmem:[#allocation2 + $0x18] sm:$0xff] %v3095_v25 }
0x100f   : > { %v3106_v19 = vld [vmem:[#allocation2 + $0x10] sm:$0xff] }
0x1010   : > { %3114 = vadd.xlane.f32.xlu1 %v3106_v19 }
0x1011   : > { %v3107_v56 = vld [vmem:[#allocation2 + $0x18] sm:$0xff] }
0x1014   : > { %3116 = vadd.xlane.f32.xlu1 %v3107_v56 }
0x1089   : > { %v3111_v23 = vpop.xlane.xlu0 %3110 }
0x108a   : > { %v3118_v21 = vmul.f32 0.0078125, %v3111_v23 }
0x108c   : > { %v3122_v39 = vsub.f32 %v3104_v35, %v3118_v21 }
0x108d   : > { %v3113_v53 = vpop.xlane.xlu0 %3112 }
0x108e   : > { %v3119_v34 = vmul.f32 0.0078125, %v3113_v53  ;;  %v3126_v60 = vmul.f32 %v3122_v39, %v3122_v39 }
0x1090   : > { %v3123_v42 = vsub.f32 %v3105_v18, %v3119_v34  ;;  %3130 = vadd.xlane.f32.xlu0 %v3126_v60 }
0x1092   : > { %v3127_v14 = vmul.f32 %v3123_v42, %v3123_v42 }
0x1094   : > { %3132 = vadd.xlane.f32.xlu1 %v3127_v14 }
0x109d   : > { %v3115_v1 = vpop.xlane.xlu1 %3114 }
0x109e   : > { %v3120_v27 = vmul.f32 0.0078125, %v3115_v1 }
0x10a0   : > { %v3124_v36 = vsub.f32 %v3106_v19, %v3120_v27 }
0x10a1   : > { %v3117_v30 = vpop.xlane.xlu1 %3116 }
0x10a2   : > { %v3121_v57 = vmul.f32 0.0078125, %v3117_v30  ;;  %v3128_v62 = vmul.f32 %v3124_v36, %v3124_v36 }
0x10a4   : > { %v3125_v5 = vsub.f32 %v3107_v56, %v3121_v57  ;;  %3134 = vadd.xlane.f32.xlu0 %v3128_v62 }
0x10a6   : > { %v3129_v44 = vmul.f32 %v3125_v5, %v3125_v5 }
0x10a8   : > { %3136 = vadd.xlane.f32.xlu1 %v3129_v44 }
0x111d   : > { %v3131_v0 = vpop.xlane.xlu0 %3130 }
0x111e   : > { %v3138_v43 = vmul.f32 0.0078125, %v3131_v0 }
0x1120   : > { %v3142_v45 = vadd.f32 1e-05, %v3138_v43 }
0x1121   : > { %v3133_v3 = vpop.xlane.xlu1 %3132 }
0x1122   : > { %4339 = vrsqrt.f32 %v3142_v45  ;;  %v3139_v49 = vmul.f32 0.0078125, %v3133_v3 }
0x1124   : > { %v3143_v9 = vadd.f32 1e-05, %v3139_v49 }
0x1126   : > { %4341 = vrsqrt.f32 %v3143_v9 }
0x112c   : > { %v4340_v61 = vpop.eup %4339 }
0x112d   : > { %v3150_v40 = vmul.f32 %v4340_v61, %v3122_v39 }
0x112f   : > { %v3160_v29 = vmul.f32 %v3649_v59, %v3150_v40 }
0x1130   : > { %v4342_v6 = vpop.eup %4341 }
0x1131   : > { %v3135_v47 = vpop.xlane.xlu0 %3134  ;;  %v3170_v7 = vadd.f32 %v3650_v11, %v3160_v29  ;;  %v3151_v2 = vmul.f32 %v4342_v6, %v3123_v42 }
0x1132   : > { %v3140_v46 = vmul.f32 0.0078125, %v3135_v47 }
0x1133   : > { %3174 = vst [vmem:[#allocation23] sm:$0xff] %v3170_v7  ;;  %v3161_v12 = vmul.f32 %v3649_v59, %v3151_v2 }
0x1134   : > { %v3144_v10 = vadd.f32 1e-05, %v3140_v46 }
0x1135   : > { %v3137_v38 = vpop.xlane.xlu1 %3136  ;;  %v3171_v16 = vadd.f32 %v3650_v11, %v3161_v12 }
0x1136   : > { %v3141_v4 = vmul.f32 0.0078125, %v3137_v38  ;;  %4343 = vrsqrt.f32 %v3144_v10 }
0x1137   : > { %3175 = vst [vmem:[#allocation23 + $0x8] sm:$0xff] %v3171_v16 }
0x1138   : > { %v3145_v8 = vadd.f32 1e-05, %v3141_v4 }
0x113a   : > { %4345 = vrsqrt.f32 %v3145_v8 }
0x1140   : > { %v4344_v58 = vpop.eup %4343 }
0x1141   : > { %v3152_v13 = vmul.f32 %v4344_v58, %v3124_v36 }
0x1143   : > { %v3162_v15 = vmul.f32 %v3649_v59, %v3152_v13 }
0x1144   : > { %v4346_v63 = vpop.eup %4345 }
0x1145   : > { %v3153_v17 = vmul.f32 %v4346_v63, %v3125_v5  ;;  %v3172_v22 = vadd.f32 %v3650_v11, %v3162_v15 }
0x1147   : > { %v3163_v24 = vmul.f32 %v3649_v59, %v3153_v17  ;;  %3176 = vst [vmem:[#allocation23 + $0x10] sm:$0xff] %v3172_v22 }
0x1149   : > { %v3173_v26 = vadd.f32 %v3650_v11, %v3163_v24 }
0x114b   : > { %3177 = vst [vmem:[#allocation23 + $0x18] sm:$0xff] %v3173_v26 }
0x114c PF: > { %s6230_s5 = sld [smem:[#allocation32_spill]]  ;;  %s4929_s6 = smov [#allocation23]  }
0x114d   : > { %s3184_s25 = sshll.u32 %s4929_s6, 4  ;;  %s3185_s25 = int_to_ptr.vmem [resolvable:$true] %s3184_s25 }
0x114e   : > { %s4819_s30 = scalar_lea.vmem %s3185_s25, 512  ;;  %p4826_p4 = scmp.lt.s32.totalorder %s3185_s25, %s3185_s25 }
0x114f   : > { %p4820_p12 = scmp.ne.s32.totalorder %s3185_s25, %s4819_s30  ;;  %p4827_p11 = scmp.lt.s32.totalorder %s4819_s30, %s4819_s30 }
0x1151   : > { %p4828_p10 = por %p4827_p11, %p4826_p4 }
0x1152   : > { %p3988_p8 = scmp.eq.s32.totalorder %s6230_s5, 1 }
0x1154   : > { %p4821_p9 = pnand %p4820_p12, %p3988_p8 }
0x1156   : > { %p4822_p7 = pneg %p4821_p9 }
0x1158   : > { %p4829_p0 = pnand %p4828_p10, %p4822_p7 }
0x115a   : > { %4832 = shalt.err (!%p4829_p0)
}
0x115b   : > { %s6231_s1 = sld [smem:[#allocation48_spill]] }
0x1161   : > { %s4833_s24 = scalar_lea.hbm %s6231_s1, 512 }
0x1162   : > { %p4834_p1 = scmp.ne.s32.totalorder %s6231_s1, %s4833_s24  ;;  %p4839_p5 = scmp.lt.u32.totalorder %s4833_s24, %s6231_s1 }
0x1164   : > { %p4835_p13 = pnand %p4834_p1, %p3988_p8 }
0x1166   : > { %p4836_p2 = pneg %p4835_p13 }
0x1168   : > { %p4841_p3 = pnand %p4839_p5, %p4836_p2 }
0x116a   : > { %4844 = shalt.err (!%p4841_p3)
}
0x116b   : > { %s4930_s22 = smov 128   ;;  %s4931_s15 = smov 8  }
0x116c   : > { %3926 = dma.vmem_to_hbm [thread:$0]  (%p3988_p8), %s3185_s25, 512, %s6231_s1, [#allocation5], %s4930_s22, %s4930_s22, %s4931_s15  }
0x116d   : > { %4882 = dma.done.wait (%p3988_p8), [#allocation5], 512  }
0x116e   : > { %4884 = vsyncadd (%p3988_p8), [#allocation5], 4294966784 }
0x116f PF: > { %s6232_s24 = sld [smem:[#allocation33_spill]]  ;;  %s6233_s21 = sld [smem:[#allocation30_spill]] }
0x1170   : > { %s6234_s22 = sld [smem:[#allocation31_spill]]  ;;  %s6235_s23 = sld [smem:[#allocation34_spill]] }
0x1175   : > { %p27_p6 = scmp.ge.s32.totalorder %s6232_s24, 4  }
0x1177   :  { %29 = sbr.rel (!%p27_p6) target bundleno = 17 (0x11), region = 265 }
0x117e   :  { %3200 = vsyncpa [#allocation4], 1 }
0x117f   :  { %3202 = vsyncpa [#allocation4 + $0x1], 1 }
0x1180   :  { %3203 = vsyncpa [#allocation7], 1 }
0x1181   :  { %3204 = vsyncpa [#allocation22], 1 }
0x1182   :  { %3205 = vsyncpa [#allocation5], 1 }
0x1183   :  { %3207 = vsyncpa [#allocation5 + $0x1], 1 }

</bundles_post_ra>
